<compile_context>
chip_gen: v7x
topology: tpu7x:2x2x1
jax: 0.10.0
libtpu: 0.0.40
codegen_flags: <defaults>
</compile_context>

<pallas_src>
import functools
import math

import numpy as np

import jax
import jax.numpy as jnp
from jax.experimental import pallas as pl
from jax.experimental.pallas import tpu as pltpu


# ----------------------------------------------------------------------------------
# Kernels
# ----------------------------------------------------------------------------------
def _pos_sine_nhwc_kernel(nm_full_ref, nm_rows_ref, coltot_ref, ly_ref, tx_ref,
                          tab_ref, out_ref, *, normalize, scale):
    # nm_full_ref : (Hp, W)        bf16  not_mask for this batch element (1=valid)
    # nm_rows_ref : (tH, W)        bf16  rows of not_mask for this row tile
    # coltot_ref  : (1, W)         f32   per-column valid counts (y denominator)
    # ly_ref      : (tH, Hp)       bf16  rows of lower-triangular ones (y cumsum)
    # tx_ref      : (W, W)         bf16  upper-triangular ones (x cumsum)
    # tab_ref     : (3, 2Fp)       f32   [inv_dt*is_y | inv_dt*is_x | phase]
    # out_ref     : (tH, W, 2Fp)   out dtype, lane axis = 2Fp (multiple of 128)
    two_f_p = tab_ref.shape[-1]

    # Exact cumsums on the (otherwise idle) MXU: inputs are {0,1}, f32 accumulation.
    y_emb = jnp.dot(ly_ref[...], nm_full_ref[...], preferred_element_type=jnp.float32)
    x_emb = jnp.dot(nm_rows_ref[...], tx_ref[...], preferred_element_type=jnp.float32)

    if normalize:
        eps = 1e-6
        row_tot = x_emb[:, -1:]                                   # (tH, 1)
        y_emb = y_emb * (scale / (coltot_ref[...] + eps))         # (tH, W) * (1, W)
        x_emb = x_emb * (scale / (row_tot + eps))                 # (tH, W) * (tH, 1)

    inv_y = tab_ref[0:1, :].reshape(1, 1, two_f_p)   # 1/dim_t on y channels, else 0
    inv_x = tab_ref[1:2, :].reshape(1, 1, two_f_p)   # 1/dim_t on x channels, else 0
    phase = tab_ref[2:3, :].reshape(1, 1, two_f_p)   # 0 (even feat) / pi/2 (odd feat)

    # Disjoint inv_y/inv_x masks -> no select needed; cos(x) == sin(x + pi/2).
    arg = y_emb[:, :, None] * inv_y + x_emb[:, :, None] * inv_x + phase
    out_ref[...] = jnp.sin(arg).astype(out_ref.dtype)


def _pos_sine_nchw_kernel(nm_full_ref, nm_rows_ref, coltot_ref, ly_ref, tx_ref,
                          invy_ref, invx_ref, ph_ref, out_ref, *, normalize, scale):
    # Same math as the NHWC kernel, but the output block is (2Fp, tH, W) so the
    # NCHW result is stored directly (lane axis = W; only used when W % 128 == 0).
    # invy/invx/ph refs: (2Fp, 1, W) f32, pre-broadcast along W in the wrapper so the
    # in-kernel broadcast is a cheap sublane broadcast.
    y_emb = jnp.dot(ly_ref[...], nm_full_ref[...], preferred_element_type=jnp.float32)
    x_emb = jnp.dot(nm_rows_ref[...], tx_ref[...], preferred_element_type=jnp.float32)

    if normalize:
        eps = 1e-6
        row_tot = x_emb[:, -1:]
        y_emb = y_emb * (scale / (coltot_ref[...] + eps))
        x_emb = x_emb * (scale / (row_tot + eps))

    arg = (y_emb[None, :, :] * invy_ref[...] +
           x_emb[None, :, :] * invx_ref[...] + ph_ref[...])
    out_ref[...] = jnp.sin(arg).astype(out_ref.dtype)


# ----------------------------------------------------------------------------------
# Wrapper helpers
# ----------------------------------------------------------------------------------
def _tpu_vmem_bytes():
    try:
        return int(pltpu.get_tpu_info().vmem_capacity_bytes)
    except Exception:
        return 64 << 20       # conservative (v7x per-core VMEM)


def _pick_tile_h(Hp, W, two_f_p, B, budget_bytes):
    """Largest multiple-of-8 divisor of Hp whose f32 output block fits budget_bytes.

    When B == 1 we keep at least two row tiles (tH <= Hp/2) so both v7x TensorCores
    get grid steps to run."""
    bytes_per_row = max(W * two_f_p * 4, 1)
    max_rows = max(8, (int(budget_bytes) // bytes_per_row) // 8 * 8)
    cap = Hp
    if B == 1 and Hp >= 16:
        cap = max(8, (Hp // 2) // 8 * 8)
    limit = min(max_rows, cap, Hp)
    best = 8
    c = 8
    while c <= limit:
        if Hp % c == 0:
            best = c
        c += 8
    return best


def position_embedding_sine(mask, num_pos_feats=64, temperature=10000,
                            normalize=False, scale=None, channels_last=False,
                            out_dtype=jnp.float32):
    """mask: (B, H, W) bool padding mask (True = padded).

    Returns positional encoding of dtype `out_dtype`:
      channels_last=False -> (B, 2*num_pos_feats, H, W)   (PyTorch parity)
      channels_last=True  -> (B, H, W, 2*num_pos_feats)   (TPU-friendly)
    """
    if scale is not None and normalize is False:
        raise ValueError("normalize should be True if scale is passed")
    if scale is None:
        scale = 2 * math.pi
    scale = float(scale)

    B, H, W = mask.shape
    F = int(num_pos_feats)
    two_f = 2 * F
    two_f_p = ((two_f + 127) // 128) * 128        # lane-dense channel padding
    Hp = ((H + 7) // 8) * 8                       # sublane-aligned row padding
    out_dtype = jnp.dtype(out_dtype)

    # not_mask in bf16: values are exactly {0,1}, so the bf16 MXU cumsums with f32
    # accumulation are exact, and the input DMA is halved.
    not_mask_b = jnp.logical_not(mask)
    col_tot = jnp.sum(not_mask_b.astype(jnp.float32), axis=1, keepdims=True)   # (B,1,W)
    not_mask = not_mask_b.astype(jnp.bfloat16)
    if Hp != H:
        not_mask = jnp.pad(not_mask, ((0, 0), (0, Hp - H), (0, 0)))

    # --- Grid-invariant constants (hoisted; DMA'd once, stay VMEM-resident) --------
    ly = jnp.asarray(np.tril(np.ones((Hp, Hp), np.float32)), dtype=jnp.bfloat16)
    tx = jnp.asarray(np.triu(np.ones((W, W), np.float32)), dtype=jnp.bfloat16)

    dim_t = np.asarray(temperature, np.float64) ** (
        2.0 * (np.arange(F, dtype=np.float64) // 2) / F)
    inv_half = (1.0 / dim_t).astype(np.float32)
    ph_half = np.where(np.arange(F) % 2 == 0, 0.0, np.pi / 2.0).astype(np.float32)

    inv_full = np.zeros((two_f_p,), np.float32)
    ph_full = np.zeros((two_f_p,), np.float32)
    isy_full = np.zeros((two_f_p,), np.float32)
    inv_full[:two_f] = np.concatenate([inv_half, inv_half])
    ph_full[:two_f] = np.concatenate([ph_half, ph_half])   # cos(x) == sin(x + pi/2)
    isy_full[:F] = 1.0                                      # first F channels -> y half
    invy_full = inv_full * isy_full                         # disjoint halves -> no select
    invx_full = inv_full * (1.0 - isy_full)
    # --------------------------------------------------------------------------------

    vmem = _tpu_vmem_bytes()
    budget = max(1 << 20, min(4 << 20, vmem // 24))          # f32 output-block budget
    vmem_limit = max(32 << 20, min(vmem * 3 // 4, 96 << 20))

    tH = _pick_tile_h(Hp, W, two_f_p, B, budget)
    nH = Hp // tH

    cparams = pltpu.CompilerParams(
        dimension_semantics=("parallel", "parallel"),
        vmem_limit_bytes=int(vmem_limit))

    nm_full_spec = pl.BlockSpec((None, Hp, W), lambda b, h: (b, 0, 0))   # resident per b
    nm_rows_spec = pl.BlockSpec((None, tH, W), lambda b, h: (b, h, 0))
    coltot_spec = pl.BlockSpec((None, 1, W), lambda b, h: (b, 0, 0))
    ly_spec = pl.BlockSpec((tH, Hp), lambda b, h: (h, 0))
    tx_spec = pl.BlockSpec((W, W), lambda b, h: (0, 0))

    if (not channels_last) and (W % 128 == 0):
        # Direct NCHW output: lane axis = W (dense) -> no post-kernel transpose at all.
        invy_c = jnp.asarray(np.ascontiguousarray(
            np.broadcast_to(invy_full[:, None, None], (two_f_p, 1, W))))
        invx_c = jnp.asarray(np.ascontiguousarray(
            np.broadcast_to(invx_full[:, None, None], (two_f_p, 1, W))))
        ph_c = jnp.asarray(np.ascontiguousarray(
            np.broadcast_to(ph_full[:, None, None], (two_f_p, 1, W))))
        kern = functools.partial(_pos_sine_nchw_kernel, normalize=normalize, scale=scale)
        pos = pl.pallas_call(
            kern,
            out_shape=jax.ShapeDtypeStruct((B, two_f_p, Hp, W), out_dtype),
            grid=(B, nH),
            in_specs=[nm_full_spec, nm_rows_spec, coltot_spec, ly_spec, tx_spec,
                      pl.BlockSpec((two_f_p, 1, W), lambda b, h: (0, 0, 0)),
                      pl.BlockSpec((two_f_p, 1, W), lambda b, h: (0, 0, 0)),
                      pl.BlockSpec((two_f_p, 1, W), lambda b, h: (0, 0, 0))],
            out_specs=pl.BlockSpec((None, two_f_p, tH, W), lambda b, h: (b, 0, h, 0)),
            compiler_params=cparams,
        )(not_mask, not_mask, col_tot, ly, tx, invy_c, invx_c, ph_c)
        if Hp != H or two_f_p != two_f:
            pos = pos[:, :two_f, :H, :]
        return pos

    # NHWC kernel: channel axis (2F padded to a multiple of 128) on lanes -> dense vst.
    tab = jnp.asarray(np.stack([invy_full, invx_full, ph_full], axis=0))   # (3, 2Fp)
    kern = functools.partial(_pos_sine_nhwc_kernel, normalize=normalize, scale=scale)
    pos = pl.pallas_call(
        kern,
        out_shape=jax.ShapeDtypeStruct((B, Hp, W, two_f_p), out_dtype),
        grid=(B, nH),
        in_specs=[nm_full_spec, nm_rows_spec, coltot_spec, ly_spec, tx_spec,
                  pl.BlockSpec((3, two_f_p), lambda b, h: (0, 0))],
        out_specs=pl.BlockSpec((None, tH, W, two_f_p), lambda b, h: (b, h, 0, 0)),
        compiler_params=cparams,
    )(not_mask, not_mask, col_tot, ly, tx, tab)
    if Hp != H or two_f_p != two_f:
        pos = pos[:, :H, :, :two_f]
    if channels_last:
        return pos
    # PyTorch-parity NCHW when W is not a multiple of 128: one XLA transpose (an extra
    # HBM round trip of the output). Prefer channels_last=True when the consumer can
    # take NHWC, or a W that is a multiple of 128 for the direct-NCHW kernel.
    return jnp.transpose(pos, (0, 3, 1, 2))


# ----------------------------------------------------------------------------------
# Pure-JAX reference (transliteration of the PyTorch forward), for correctness checks.
# ----------------------------------------------------------------------------------
def _reference(mask, num_pos_feats=64, temperature=10000, normalize=False, scale=None):
    if scale is None:
        scale = 2 * math.pi
    not_mask = (~mask).astype(jnp.float32)
    y_embed = jnp.cumsum(not_mask, axis=1)
    x_embed = jnp.cumsum(not_mask, axis=2)
    if normalize:
        eps = 1e-6
        y_embed = y_embed / (y_embed[:, -1:, :] + eps) * scale
        x_embed = x_embed / (x_embed[:, :, -1:] + eps) * scale
    dim_t = jnp.arange(num_pos_feats, dtype=jnp.float32)
    dim_t = temperature ** (2 * (dim_t // 2) / num_pos_feats)
    pos_x = x_embed[:, :, :, None] / dim_t
    pos_y = y_embed[:, :, :, None] / dim_t
    B, H, W = mask.shape
    pos_x = jnp.stack([jnp.sin(pos_x[:, :, :, 0::2]),
                       jnp.cos(pos_x[:, :, :, 1::2])], axis=4).reshape(B, H, W, -1)
    pos_y = jnp.stack([jnp.sin(pos_y[:, :, :, 0::2]),
                       jnp.cos(pos_y[:, :, :, 1::2])], axis=4).reshape(B, H, W, -1)
    pos = jnp.concatenate([pos_y, pos_x], axis=3).transpose(0, 3, 1, 2)
    return pos


if __name__ == "__main__":
    F = 64

    # --- A: PyTorch-parity NCHW (W=16 not a multiple of 128 -> NHWC kernel + transpose)
    B, H, W = 2, 16, 16
    mask = jax.random.bernoulli(jax.random.PRNGKey(0), p=0.2, shape=(B, H, W))
    pos = jax.block_until_ready(position_embedding_sine(mask, F, normalize=True))
    ref = _reference(mask, F, normalize=True)
    assert pos.shape == (B, 2 * F, H, W) and pos.dtype == jnp.float32
    assert jnp.allclose(pos, ref, atol=1e-4, rtol=1e-4), float(jnp.max(jnp.abs(pos - ref)))

    # --- B: channels-last NHWC (no transpose, no extra HBM round trip)
    pos_nhwc = jax.block_until_ready(
        position_embedding_sine(mask, F, normalize=True, channels_last=True))
    ref_nhwc = jnp.transpose(ref, (0, 2, 3, 1))
    assert pos_nhwc.shape == (B, H, W, 2 * F)
    assert jnp.allclose(pos_nhwc, ref_nhwc, atol=1e-4, rtol=1e-4)

    # --- C: W multiple of 128 -> direct-NCHW kernel; B=1 -> two row tiles (v7x cores)
    mask_c = jax.random.bernoulli(jax.random.PRNGKey(1), p=0.2, shape=(1, 16, 128))
    pos_c = jax.block_until_ready(position_embedding_sine(mask_c, F, normalize=True))
    ref_c = _reference(mask_c, F, normalize=True)
    assert pos_c.shape == (1, 2 * F, 16, 128)
    assert jnp.allclose(pos_c, ref_c, atol=1e-4, rtol=1e-4), \
        float(jnp.max(jnp.abs(pos_c - ref_c)))

    # --- D: un-normalized config
    pos_d = jax.block_until_ready(position_embedding_sine(mask, F, normalize=False))
    ref_d = _reference(mask, F, normalize=False)
    assert jnp.allclose(pos_d, ref_d, atol=1e-4, rtol=1e-4)

    # --- E: H not a multiple of 8 (row padding) + small F (channel padding to 128)
    mask_e = jax.random.bernoulli(jax.random.PRNGKey(2), p=0.2, shape=(2, 12, 16))
    pos_e = jax.block_until_ready(position_embedding_sine(mask_e, 32, normalize=True))
    ref_e = _reference(mask_e, 32, normalize=True)
    assert pos_e.shape == (2, 64, 12, 16)
    assert jnp.allclose(pos_e, ref_e, atol=1e-4, rtol=1e-4)

    # --- F: bf16 output (halves the dominant HBM store traffic)
    pos_f = jax.block_until_ready(
        position_embedding_sine(mask, F, normalize=True, channels_last=True,
                                out_dtype=jnp.bfloat16))
    assert pos_f.dtype == jnp.bfloat16
    assert jnp.allclose(pos_f.astype(jnp.float32), ref_nhwc, atol=1e-2, rtol=1e-2)

    print("KERNEL_OK")
</pallas_src>

<mosaic_0001>
module attributes {stable_mosaic.version = 11 : i64} {
  func.func @_pos_sine_nhwc_kernel(%arg0: i32, %arg1: i32, %arg2: memref<1x16x16xbf16, #tpu.memory_space<vmem>>, %arg3: memref<1x16x16xbf16, #tpu.memory_space<vmem>>, %arg4: memref<1x1x16xf32, #tpu.memory_space<vmem>>, %arg5: memref<16x16xbf16, #tpu.memory_space<vmem>>, %arg6: memref<16x16xbf16, #tpu.memory_space<vmem>>, %arg7: memref<3x128xf32, #tpu.memory_space<vmem>>, %arg8: memref<1x16x16x128xf32, #tpu.memory_space<vmem>>) attributes {dimension_semantics = [#tpu.dimension_semantics<parallel>, #tpu.dimension_semantics<parallel>], iteration_bounds = array<i64: 2, 1>, scalar_prefetch = 0 : i64, scratch_operands = 0 : i64, tpu.core_type = #tpu.core_type<tc>, window_params = [{transform_indices = @transform_0, window_bounds = array<i64: 1, 16, 16>}, {transform_indices = @transform_1, window_bounds = array<i64: 1, 16, 16>}, {transform_indices = @transform_2, window_bounds = array<i64: 1, 1, 16>}, {transform_indices = @transform_3, window_bounds = array<i64: 16, 16>}, {pipeline_mode = #tpu.pipeline_mode<synchronous>, transform_indices = @transform_4, window_bounds = array<i64: 16, 16>}, {pipeline_mode = #tpu.pipeline_mode<synchronous>, transform_indices = @transform_5, window_bounds = array<i64: 3, 128>}, {transform_indices = @transform_6, window_bounds = array<i64: 1, 16, 16, 128>}]} {
    %c0 = arith.constant 0 : index
    %c0_0 = arith.constant 0 : index
    %0 = vector.load %arg5[%c0, %c0_0] : memref<16x16xbf16, #tpu.memory_space<vmem>>, vector<16x16xbf16>
    %c0_1 = arith.constant 0 : index
    %c0_2 = arith.constant 0 : index
    %c0_3 = arith.constant 0 : index
    %1 = vector.load %arg2[%c0_1, %c0_2, %c0_3] : memref<1x16x16xbf16, #tpu.memory_space<vmem>>, vector<1x16x16xbf16>
    %2 = vector.shape_cast %1 : vector<1x16x16xbf16> to vector<16x16xbf16>
    %cst = arith.constant dense<0.000000e+00> : vector<16x16xf32>
    %3 = tpu.matmul %0, %2, %cst {dimension_numbers = #tpu.dot_dimension_numbers<[1], [0], [0], [1], [0, 0, 1, 1], [], []>} : vector<16x16xbf16>, vector<16x16xbf16>, vector<16x16xf32> -> vector<16x16xf32>
    %c0_4 = arith.constant 0 : index
    %c0_5 = arith.constant 0 : index
    %c0_6 = arith.constant 0 : index
    %4 = vector.load %arg3[%c0_4, %c0_5, %c0_6] : memref<1x16x16xbf16, #tpu.memory_space<vmem>>, vector<1x16x16xbf16>
    %5 = vector.shape_cast %4 : vector<1x16x16xbf16> to vector<16x16xbf16>
    %c0_7 = arith.constant 0 : index
    %c0_8 = arith.constant 0 : index
    %6 = vector.load %arg6[%c0_7, %c0_8] : memref<16x16xbf16, #tpu.memory_space<vmem>>, vector<16x16xbf16>
    %cst_9 = arith.constant dense<0.000000e+00> : vector<16x16xf32>
    %7 = tpu.matmul %5, %6, %cst_9 {dimension_numbers = #tpu.dot_dimension_numbers<[1], [0], [0], [1], [0, 0, 1, 1], [], []>} : vector<16x16xbf16>, vector<16x16xbf16>, vector<16x16xf32> -> vector<16x16xf32>
    %8 = vector.extract_strided_slice %7 {offsets = [0, 15], sizes = [16, 1], strides = [1, 1]} : vector<16x16xf32> to vector<16x1xf32>
    %c0_10 = arith.constant 0 : index
    %c0_11 = arith.constant 0 : index
    %c0_12 = arith.constant 0 : index
    %9 = vector.load %arg4[%c0_10, %c0_11, %c0_12] : memref<1x1x16xf32, #tpu.memory_space<vmem>>, vector<1x1x16xf32>
    %10 = vector.shape_cast %9 : vector<1x1x16xf32> to vector<1x16xf32>
    %cst_13 = arith.constant 9.99999997E-7 : f32
    %11 = vector.broadcast %cst_13 : f32 to vector<1x16xf32>
    %12 = arith.addf %10, %11 : vector<1x16xf32>
    %cst_14 = arith.constant 6.28318548 : f32
    %13 = vector.broadcast %cst_14 : f32 to vector<1x16xf32>
    %14 = arith.divf %13, %12 : vector<1x16xf32>
    %15 = vector.broadcast %14 : vector<1x16xf32> to vector<16x16xf32>
    %16 = arith.mulf %3, %15 : vector<16x16xf32>
    %cst_15 = arith.constant 9.99999997E-7 : f32
    %17 = vector.broadcast %cst_15 : f32 to vector<16x1xf32>
    %18 = arith.addf %8, %17 : vector<16x1xf32>
    %cst_16 = arith.constant 6.28318548 : f32
    %19 = vector.broadcast %cst_16 : f32 to vector<16x1xf32>
    %20 = arith.divf %19, %18 : vector<16x1xf32>
    %21 = vector.broadcast %20 : vector<16x1xf32> to vector<16x16xf32>
    %22 = arith.mulf %7, %21 : vector<16x16xf32>
    %c0_17 = arith.constant 0 : index
    %c0_18 = arith.constant 0 : index
    %23 = vector.load %arg7[%c0_17, %c0_18] : memref<3x128xf32, #tpu.memory_space<vmem>>, vector<1x128xf32>
    %24 = vector.shape_cast %23 : vector<1x128xf32> to vector<1x1x128xf32>
    %c1 = arith.constant 1 : index
    %c0_19 = arith.constant 0 : index
    %25 = vector.load %arg7[%c1, %c0_19] : memref<3x128xf32, #tpu.memory_space<vmem>>, vector<1x128xf32>
    %26 = vector.shape_cast %25 : vector<1x128xf32> to vector<1x1x128xf32>
    %c2 = arith.constant 2 : index
    %c0_20 = arith.constant 0 : index
    %27 = vector.load %arg7[%c2, %c0_20] : memref<3x128xf32, #tpu.memory_space<vmem>>, vector<1x128xf32>
    %28 = vector.shape_cast %27 : vector<1x128xf32> to vector<1x1x128xf32>
    %29 = vector.shape_cast %16 : vector<16x16xf32> to vector<16x16x1xf32>
    %30 = vector.broadcast %29 : vector<16x16x1xf32> to vector<16x16x128xf32>
    %31 = vector.broadcast %24 : vector<1x1x128xf32> to vector<16x16x128xf32>
    %32 = arith.mulf %30, %31 : vector<16x16x128xf32>
    %33 = vector.shape_cast %22 : vector<16x16xf32> to vector<16x16x1xf32>
    %34 = vector.broadcast %33 : vector<16x16x1xf32> to vector<16x16x128xf32>
    %35 = vector.broadcast %26 : vector<1x1x128xf32> to vector<16x16x128xf32>
    %36 = arith.mulf %34, %35 : vector<16x16x128xf32>
    %37 = arith.addf %32, %36 : vector<16x16x128xf32>
    %38 = vector.broadcast %28 : vector<1x1x128xf32> to vector<16x16x128xf32>
    %39 = arith.addf %37, %38 : vector<16x16x128xf32>
    %40 = math.sin %39 : vector<16x16x128xf32>
    %c0_21 = arith.constant 0 : index
    %c0_22 = arith.constant 0 : index
    %c0_23 = arith.constant 0 : index
    %c0_24 = arith.constant 0 : index
    %41 = vector.load %arg8[%c0_21, %c0_22, %c0_23, %c0_24] : memref<1x16x16x128xf32, #tpu.memory_space<vmem>>, vector<1x16x16x128xf32>
    %42 = vector.shape_cast %41 : vector<1x16x16x128xf32> to vector<16x16x128xf32>
    %43 = vector.shape_cast %40 : vector<16x16x128xf32> to vector<1x16x16x128xf32>
    tpu.vector_store %arg8[%c0_21, %c0_22, %c0_23, %c0_24], %43 {strides = array<i32>} : memref<1x16x16x128xf32, #tpu.memory_space<vmem>>, vector<1x16x16x128xf32>,
    return
  }
  func.func @transform_0(%arg0: i32, %arg1: i32) -> (i32, i32, i32) {
    %c0_i32 = arith.constant 0 : i32
    %c0_i32_0 = arith.constant 0 : i32
    %c0_i32_1 = arith.constant 0 : i32
    return %arg0, %c0_i32, %c0_i32_0 : i32, i32, i32
  }
  func.func @transform_1(%arg0: i32, %arg1: i32) -> (i32, i32, i32) {
    %c0_i32 = arith.constant 0 : i32
    %c0_i32_0 = arith.constant 0 : i32
    return %arg0, %arg1, %c0_i32 : i32, i32, i32
  }
  func.func @transform_2(%arg0: i32, %arg1: i32) -> (i32, i32, i32) {
    %c0_i32 = arith.constant 0 : i32
    %c0_i32_0 = arith.constant 0 : i32
    %c0_i32_1 = arith.constant 0 : i32
    return %arg0, %c0_i32, %c0_i32_0 : i32, i32, i32
  }
  func.func @transform_3(%arg0: i32, %arg1: i32) -> (i32, i32) {
    %c0_i32 = arith.constant 0 : i32
    %c0_i32_0 = arith.constant 0 : i32
    return %arg1, %c0_i32 : i32, i32
  }
  func.func @transform_4(%arg0: i32, %arg1: i32) -> (i32, i32) {
    %c0_i32 = arith.constant 0 : i32
    %c0_i32_0 = arith.constant 0 : i32
    %c0_i32_1 = arith.constant 0 : i32
    return %c0_i32, %c0_i32_0 : i32, i32
  }
  func.func @transform_5(%arg0: i32, %arg1: i32) -> (i32, i32) {
    %c0_i32 = arith.constant 0 : i32
    %c0_i32_0 = arith.constant 0 : i32
    %c0_i32_1 = arith.constant 0 : i32
    return %c0_i32, %c0_i32_0 : i32, i32
  }
  func.func @transform_6(%arg0: i32, %arg1: i32) -> (i32, i32, i32, i32) {
    %c0_i32 = arith.constant 0 : i32
    %c0_i32_0 = arith.constant 0 : i32
    %c0_i32_1 = arith.constant 0 : i32
    return %arg0, %arg1, %c0_i32, %c0_i32_0 : i32, i32, i32, i32
  }
}

</mosaic_0001>

<bundles_post_ra>
// kernel: tpu_custom_call.1
= control target key start
LH: loop header
LB: loop body
LE: loop exit
PB: predicated region body
PF: predicated region fallthrough
CT: control target
= control target key end

     0   :  { %s8513_s0 = inlined_call_operand.hbm [shape: bf16[2,16,16], index: 0, kind: input, shape index: {}]   ;;  %s8514_s1 = inlined_call_operand.hbm [shape: bf16[2,16,16], index: 1, kind: input, shape index: {}]   ;;  %s8515_s2 = inlined_call_operand.vmem [shape: f32[2,1,16], index: 2, kind: input, shape index: {}]   ;;  %s8516_s3 = inlined_call_operand.vmem [shape: bf16[16,16], index: 3, kind: input, shape index: {}]   ;;  %s8517_s4 = inlined_call_operand.hbm [shape: bf16[16,16], index: 4, kind: input, shape index: {}]   ;;  %s8518_s5 = inlined_call_operand.vmem [shape: f32[3,128], index: 5, kind: input, shape index: {}]   ;;  %s8519_s6 = inlined_call_operand.hbm [shape: f32[2,16,16,128], index: 6, kind: output, shape index: {}]  }
   0x1   :  { %8543 = sst [smem:[#allocation31_spill]] %s8513_s0 }
   0x2   :  { %8544 = sst [smem:[#allocation32_spill]] %s8517_s4 }
   0x3   :  { %11 = vsyncpa [#allocation3], 0 }
   0x4   :  { %13 = vsyncpa [#allocation3 + $0x1], 0 }
   0x5   :  { %14 = vsyncpa [#allocation6], 0 }
   0x6   :  { %16 = vsyncpa [#allocation6 + $0x1], 0 }
   0x7   :  { %17 = vsyncpa [#allocation4], 0 }
   0x8   :  { %19 = vsyncpa [#allocation4 + $0x1], 0  ;;  %s5328_s21 = smov 0   ;;  %s5330_s22 = smov 0  }
   0x9   :  { %s5332_s23 = smov 0   ;;  %s5334_s24 = smov 0  }
   0xa   :  { %s5336_s25 = smov 0   ;;  %s5338_s26 = smov 0  }
   0xb LB: > { %8545 = sst [smem:[#allocation13_spill]] %s5270_s25  ;;  %s5359_s27 = sadd.s32 4294967295, %s5274_s26   ;;  %s5274_s26 = sphi %s5338_s26, %s25_s26   ;;  %s5270_s25 = sphi %s5336_s25, %s8670_s25   ;;  %s5266_s24 = sphi %s5334_s24, %s8669_s24   ;;  %s5262_s23 = sphi %s5332_s23, %s8673_s23   ;;  %s5258_s22 = sphi %s5330_s22, %s8672_s22   ;;  %s5254_s21 = sphi %s5328_s21, %s8671_s21  }
   0xc   : > { %s4546_s28 = sadd.s32 4294967294, %s5274_s26   ;;  %p57_p0 = scmp.ne.s32.totalorder %s5258_s22, %s5254_s21 }
   0xd   : > { %p8520_p1 = scmp.eq.s32.totalorder %s5359_s27, 0  ;;  %p211_p3 = scmp.eq.s32.totalorder %s4546_s28, 1 }
   0xe   : > { %p4547_p5 = scmp.ge.s32.totalorder %s5274_s26, 1  ;;  %p218_p7 = scmp.lt.s32.totalorder %s5274_s26, 3 }
   0xf   : > { %p5368_p4 = por %p8520_p1, %p57_p0  ;;  %p5373_p6 = por %p211_p3, %p57_p0 }
  0x10   : > { %p5378_p8 = pnand %p4547_p5, %p218_p7  ;;  %s5276_s8 = smov [#allocation7]  }
  0x11   : > { %s8546_s29 = scalar_select %p5368_p4, 1, 0 }
  0x12   : > { %s8547_s30 = scalar_select %p5373_p6, 1, 0 }
  0x13   : > { %s8548_s7 = scalar_select %p5378_p8, 1, 0 }
  0x14   : > { %s239_s9 = sshll.u32 %s5276_s8, 4  ;;  %p4861_p9 = pneg %p5378_p8  ;;  %s240_s9 = int_to_ptr.vmem [resolvable:$true] %s239_s9 }
  0x15   : > { %s37_s11 = sadd.s32 1, %s5270_s25  ;;  %s8550_s4 = sld [smem:[#allocation32_spill]] }
  0x16   : > { %p5387_p11 = pnand %p4861_p9, %p8520_p1 }
  0x18   : > { %p5098_p13 = pneg %p5387_p11 }
  0x1b   : > { %s5096_s14 = scalar_lea.hbm %s8550_s4, 128 }
  0x1c   : > { %p5097_p12 = scmp.ne.s32.totalorder %s8550_s4, %s5096_s14  ;;  %p5103_p5 = scmp.lt.u32.totalorder %s5096_s14, %s8550_s4 }
  0x1e   : > { %p5099_p0 = pnand %p5098_p13, %p5097_p12 }
  0x20   : > { %p5100_p3 = pneg %p5099_p0 }
  0x22   : > { %p5105_p7 = pnand %p5103_p5, %p5100_p3 }
  0x24   : > { %5108 = shalt.err (!%p5105_p7)
}
  0x25   : > { %s5109_s19 = scalar_lea.vmem %s240_s9, 128  ;;  %p5117_p2 = scmp.lt.s32.totalorder %s240_s9, %s240_s9 }
  0x26   : > { %p5110_p9 = scmp.ne.s32.totalorder %s240_s9, %s5109_s19  ;;  %p5118_p6 = scmp.lt.s32.totalorder %s5109_s19, %s5109_s19 }
  0x28   : > { %p5112_p10 = pnand %p5110_p9, %p5098_p13  ;;  %p5119_p4 = por %p5118_p6, %p5117_p2 }
  0x2a   : > { %p5113_p1 = pneg %p5112_p10 }
  0x2c   : > { %p5120_p8 = pnand %p5119_p4, %p5113_p1 }
  0x2e   : > { %5123 = shalt.err (!%p5120_p8)
}
  0x2f   : > { %s8523_s20 = smov 64   ;;  %s8525_s28 = smov 4  }
  0x30   : > { %4864 = dma.hbm_to_vmem [thread:$0]  (!%p5387_p11), %s8550_s4, 128, %s240_s9, [#allocation6], %s8523_s20, %s8523_s20, %s8525_s28  }
  0x31   : > { %p39_p1 = scmp.ge.s32.totalorder %s37_s11, 2  ;;  %s44_s13 = sadd.s32 1, %s5262_s23 }
  0x32   : > { %p51_p2 = scmp.ne.s32.totalorder %s5262_s23, %s5258_s22  ;;  %p52_p4 = scmp.eq.s32.totalorder %s5274_s26, 0 }
  0x33   : > { %s8675_s11 = smov (%p39_p1, %s37_s11), 0  ;;  %p8553_p8 = scmp.eq.s32.totalorder %s5359_s27, 1 }
  0x34   : > { %8551 = sst [smem:[#allocation14_spill]] %s8675_s11  ;;  %p5417_p6 = por %p52_p4, %p51_p2 }
  0x35   : > { %p5423_p10 = por %p8553_p8, %p51_p2  ;;  %s41_s15 = ssub.s32 %s5270_s25, %s8675_s11 }
  0x36   : > { %p4877_p12 = scmp.lt.s32.totalorder %s5274_s26, 2  ;;  %p42_p11 = scmp.eq.s32.totalorder %s41_s15, 0 }
  0x37   : > { %s256_s9 = sand.u32 1, %s5262_s23   ;;  %s4704_s18 = sshll.u32 %s5270_s25, 7 }
  0x38   : > { %s4551_s16 = sshll.u32 %s256_s9, 3  ;;  %s8556_s0 = sld [smem:[#allocation31_spill]] }
  0x39   : > { %s5432_s17 = scalar_select %p42_p11, %s5262_s23, %s44_s13  }
  0x3a   : > { %s260_s20 = scalar_lea.vmem [#allocation2], %s4551_s16  ;;  %p5444_p13 = pnand %p4877_p12, %p5417_p6 }
  0x3b   : > { %8555 = sst [smem:[#allocation15_spill]] %s5432_s17  ;;  %s267_s28 = sshll.u32 %s260_s20, 4  ;;  %s5440_s28 = int_to_ptr.vmem [resolvable:$true] %s267_s28 }
  0x3c   : > { %s5451_s19 = scalar_lea.hbm %s8514_s1, %s4704_s18  ;;  %s281_s8 = scalar_lea.vmem [#allocation5], %s4551_s16 }
  0x3d   : > { %s5453_s11 = sshll.u32 %s281_s8, 4  ;;  %s5455_s25 = scalar_lea.sflag [#allocation3], %s256_s9  ;;  %s5487_s11 = int_to_ptr.vmem [resolvable:$true] %s5453_s11 }
  0x3e   : > { %s5438_s12 = scalar_lea.hbm %s8556_s0, %s4704_s18  ;;  %p5126_p3 = pneg %p5444_p13 }
  0x3f   : > { %s5124_s20 = scalar_lea.hbm %s5438_s12, 128  ;;  %s5129_s4 = scalar_lea.hbm %s8556_s0, 256 }
  0x40   : > { %p5125_p0 = scmp.ne.s32.totalorder %s5438_s12, %s5124_s20  ;;  %p5130_p9 = scmp.lt.u32.totalorder %s5438_s12, %s8556_s0 }
  0x41   : > { %p5131_p1 = scmp.lt.u32.totalorder %s5129_s4, %s5124_s20  ;;  %p5133_p4 = scmp.lt.u32.totalorder %s5124_s20, %s5438_s12 }
  0x42   : > { %p5127_p5 = pnand %p5126_p3, %p5125_p0 }
  0x43   : > { %p5132_p2 = por %p5131_p1, %p5130_p9 }
  0x44   : > { %p5128_p7 = pneg %p5127_p5 }
  0x45   : > { %p5134_p6 = por %p5133_p4, %p5132_p2 }
  0x47   : > { %p5135_p8 = pnand %p5134_p6, %p5128_p7 }
  0x49   : > { %5138 = shalt.err (!%p5135_p8)
}
  0x4a   : > { %s5139_s9 = scalar_lea.vmem %s5440_s28, 128  ;;  %s5279_s16 = smov [#allocation2]  }
  0x4b   : > { %p5140_p12 = scmp.ne.s32.totalorder %s5440_s28, %s5139_s9  ;;  %s5144_s17 = sshll.u32 %s5279_s16, 4  ;;  %s5145_s17 = int_to_ptr.vmem [resolvable:$false] %s5144_s17 }
  0x4c   : > { %s5146_s8 = scalar_lea.vmem %s5145_s17, 256  ;;  %p5147_p5 = scmp.lt.s32.totalorder %s5440_s28, %s5145_s17 }
  0x4d   : > { %p5142_p11 = pnand %p5140_p12, %p5126_p3  ;;  %p5148_p9 = scmp.lt.s32.totalorder %s5146_s8, %s5139_s9 }
  0x4f   : > { %p5143_p0 = pneg %p5142_p11  ;;  %p5149_p1 = por %p5148_p9, %p5147_p5 }
  0x51   : > { %p5150_p2 = pnand %p5149_p1, %p5143_p0 }
  0x53   : > { %5153 = shalt.err (!%p5150_p2)
}
  0x54   : > { %s8558_s20 = smov 4   ;;  %s8559_s14 = smov 64  }
  0x55   : > { %4868 = dma.hbm_to_vmem [thread:$0]  (!%p5444_p13), %s5438_s12, 128, %s5440_s28, %s5455_s25, %s8559_s14, %s8559_s14, %s8558_s20  }
  0x56   : > { %s277_s4 = sand.u32 1, %s5274_s26   ;;  %s5154_s18 = scalar_lea.hbm %s5451_s19, 128 }
  0x57   : > { %s5490_s13 = scalar_lea.sflag [#allocation6], %s277_s4  ;;  %p5155_p7 = scmp.ne.s32.totalorder %s5451_s19, %s5154_s18 }
  0x58   : > { %s5159_s17 = scalar_lea.hbm %s8514_s1, 256  ;;  %p5160_p8 = scmp.lt.u32.totalorder %s5451_s19, %s8514_s1 }
  0x59   : > { %p5157_p4 = pnand %p5155_p7, %p5126_p3  ;;  %p5161_p12 = scmp.lt.u32.totalorder %s5159_s17, %s5154_s18 }
  0x5a   : > { %p5163_p0 = scmp.lt.u32.totalorder %s5154_s18, %s5451_s19 }
  0x5b   : > { %p5158_p6 = pneg %p5157_p4  ;;  %p5162_p11 = por %p5161_p12, %p5160_p8 }
  0x5d   : > { %p5164_p5 = por %p5163_p0, %p5162_p11 }
  0x5f   : > { %p5165_p9 = pnand %p5164_p5, %p5158_p6 }
  0x61   : > { %5168 = shalt.err (!%p5165_p9)
}
  0x62   : > { %s5169_s25 = scalar_lea.vmem %s5487_s11, 128  ;;  %s5280_s28 = smov [#allocation5]  }
  0x63   : > { %p5170_p1 = scmp.ne.s32.totalorder %s5487_s11, %s5169_s25  ;;  %s5174_s12 = sshll.u32 %s5280_s28, 4  ;;  %s5175_s12 = int_to_ptr.vmem [resolvable:$false] %s5174_s12 }
  0x64   : > { %s5176_s0 = scalar_lea.vmem %s5175_s12, 256  ;;  %p5177_p4 = scmp.lt.s32.totalorder %s5487_s11, %s5175_s12 }
  0x65   : > { %p5172_p2 = pnand %p5170_p1, %p5126_p3  ;;  %p5178_p8 = scmp.lt.s32.totalorder %s5176_s0, %s5169_s25 }
  0x67   : > { %p5173_p7 = pneg %p5172_p2  ;;  %p5179_p12 = por %p5178_p8, %p5177_p4 }
  0x69   : > { %p5180_p11 = pnand %p5179_p12, %p5173_p7 }
  0x6b   : > { %5183 = shalt.err (!%p5180_p11)
}
  0x6c   : > { %4871 = dma.hbm_to_vmem [thread:$0]  (!%p5444_p13), %s5451_s19, 128, %s5487_s11, %s5490_s13, %s8559_s14, %s8559_s14, %s8558_s20  }
  0x6d   : > { %p8560_p3 = scmp.ne.s32.totalorder %s8548_s7, 0 }
  0x6f   : > { %308 = sbr.rel (%p8560_p3) target bundleno = 1527 (0x5f7), region = 44 }
  0x76   : > { %s5522_s4 = sand.u32 1, %s5258_s22   ;;  %p8561_p6 = scmp.ne.s32.totalorder %s8546_s29, 0 }
  0x77   : > { %s4558_s18 = sshll.u32 %s5522_s4, 3  ;;  %s311_s9 = scalar_lea.sflag [#allocation3], %s5522_s4 }
  0x78   : > { %s314_s16 = scalar_lea.vmem [#allocation2], %s4558_s18 }
  0x79   : > { %5237 = dma.done.wait (%p8561_p6), %s311_s9, 128  }
  0x7a   : > { %5239 = vsyncadd (%p8561_p6), %s311_s9, 4294967168  ;;  %s319_s11 = sand.u32 1, %s5359_s27   ;;  %s323_s7 = scalar_lea.vmem [#allocation5], %s4558_s18 }
  0x7b   : > { %s320_s15 = scalar_lea.sflag [#allocation6], %s319_s11 }
  0x7c   : > { %5241 = dma.done.wait (%p8561_p6), %s320_s15, 128  }
  0x7d   : > { %5243 = vsyncadd (%p8561_p6), %s320_s15, 4294967168  ;;  %p8562_p13 = scmp.eq.s32.totalorder %s5359_s27, 0 }
  0x7f   : > { %5245 = dma.done.wait (%p8562_p13), [#allocation6], 128   ;;  %p8563_p0 = pmov %p8562_p13 }
  0x80   : > { %v5281_v0 = vmov 0.0   ;;  %vm5282_vm0 = vmmov 0   ;;  %v4943_v1 = vld [vmem:[%s314_s16] sm:$0xff]   ;;  %vm396_vm1 = vcmask 130048   ;;  %v4946_v4 = vld [vmem:[%s323_s7] sm:$0xff]   ;;  %v5283_v5 = vmov 15  }
  0x81   : > { %5247 = vsyncadd (%p8563_p0), [#allocation6], 4294967168  ;;  %4711 = vmatprep.subr.bf16.mxu0 %v5281_v0  ;;  %4713 = vmatprep.mubr.msk.bf16.mxu0 %vm5282_vm0, %v5281_v0  ;;  %v4944_v2 = vld [vmem:[%s8516_s3] sm:$0xff]   ;;  %p370_p5 = scmp.lt.s32.totalorder %s5266_s24, 1  ;;  %v505_v8 = vlaneseq  ;;  %s4561_s18 = sshll.u32 %s5522_s4, 8 }
  0x82   : > { %4717 = vmatprep.subr.bf16.mxu1 %v5281_v0  ;;  %4719 = vmatprep.mubr.msk.bf16.mxu1 %vm5282_vm0, %v5281_v0  ;;  %v4945_v3 = vld [vmem:[#allocation7] sm:$0xff]   ;;  %s5975_s9 = scalar_lea.vmem [#allocation8], %s4561_s18  ;;  %s4706_s28 = sshll.u32 %s5266_s24, 12 }
  0x83   : > { %4712 = vmatpush3.bf16.msra.mxu0 %v4943_v1  ;;  %4718 = vmatpush3.bf16.msra.mxu1 %v4945_v3  ;;  %s371_s27 = scalar_select %p370_p5, %s5266_s24, 1  ;;  %v506_v9 = vshrl.u32 %v505_v8, 7 }
  0x84   : > { %4942 = vset.pattern.permute.xlu0 %v5283_v5  ;;  %s4402_s12 = sshll.u32 %s5975_s9, 4  ;;  %s8460_s16 = scalar_lea.hbm %s8519_s6, %s4706_s28  ;;  %s8462_s12 = int_to_ptr.vmem [resolvable:$true] %s4402_s12 }
  0x85   : > { %s372_s13 = scalar_lea.vmem %s8515_s2, %s371_s27  ;;  %v5547_v12 = vsub.s32 0, %v506_v9  ;;  %v5550_v14 = vsub.s32 1, %v506_v9  ;;  %v5556_v23 = vsub.s32 2, %v506_v9  ;;  %v5561_v28 = vsub.s32 3, %v506_v9  ;;  %s4386_s24 = scalar_lea.sflag [#allocation4], %s5522_s4 }
  0x86   : > { %4714 = vmatmul.mubr.msk.bf16.vlgmr.msra.gmra.mrb[0].mxu0 %vm396_vm1, %v4944_v2  ;;  %4720 = vmatmul.mubr.msk.bf16.vlgmr.msra.gmra.mrb[0].mxu1 %vm396_vm1, %v4946_v4  ;;  %v500_v6 = vld [vmem:[%s372_s13] sm:$0x1]  ;;  %v5564_v30 = vsub.s32 4, %v506_v9  ;;  %v5567_v32 = vsub.s32 5, %v506_v9  ;;  %v5570_v34 = vsub.s32 6, %v506_v9  ;;  %v5573_v36 = vsub.s32 7, %v506_v9 }
  0x87   : > { %v501_v7 = vadd.f32 1e-06, %v500_v6  ;;  %s5184_s11 = scalar_lea.vmem %s8462_s12, 4096  ;;  %s5290_s15 = smov [#allocation8]  }
  0x88   : > { %p5185_p9 = scmp.ne.s32.totalorder %s8462_s12, %s5184_s11  ;;  %s5188_s7 = sshll.u32 %s5290_s15, 4  ;;  %s5189_s7 = int_to_ptr.vmem [resolvable:$false] %s5188_s7 }
  0x89   : > { %4947 = vrcp.f32 %v501_v7  ;;  %s5190_s19 = scalar_lea.vmem %s5189_s7, 8192  ;;  %p5191_p7 = scmp.lt.s32.totalorder %s8462_s12, %s5189_s7 }
  0x8a   : > { %p5186_p1 = pnand %p5185_p9, %p5423_p10  ;;  %p5192_p4 = scmp.lt.s32.totalorder %s5190_s19, %s5184_s11 }
  0x8c   : > { %p5187_p2 = pneg %p5186_p1  ;;  %p5193_p8 = por %p5192_p4, %p5191_p7 }
  0x8e   : > { %p5194_p12 = pnand %p5193_p8, %p5187_p2 }
  0x93   : > { %v4948_v10 = vpop.eup %4947 }
  0x94   : > { %v503_v11 = vmul.f32 6.2831855, %v4948_v10 }
  0x96   : > { %v508_v13 = vrot.slane %v503_v11, %v5547_v12 }
 0x159   : > { %v434_v15 = vpop.f32.mrb[0].mxu0  ;;  %v5552_v19 = vpop.f32.mrb[0].mxu1 }
 0x15a   : > { %v510_v16 = vmul.f32 %v508_v13, %v434_v15  ;;  %v4715_v17 = vpop.f32.mrb[1].mxu0  ;;  %v4721_v24 = vpop.f32.mrb[1].mxu1  ;;  %v512_v42 = vadd.f32 1e-06, %v5552_v19 }
 0x15b   : > { %v437_v18 = vpop.f32.mrb[2].mxu0  ;;  %v5558_v25 = vpop.f32.mrb[2].mxu1 }
 0x15c   : > { %v4716_v20 = vpop.f32.mrb[3].mxu0  ;;  %v547_v21 = vrot.slane %v510_v16, %v5550_v14  ;;  %v536_v22 = vrot.slane %v510_v16, %v5547_v12  ;;  %v4722_v26 = vpop.f32.mrb[3].mxu1  ;;  %v558_v27 = vrot.slane %v510_v16, %v5556_v23  ;;  %v569_v29 = vrot.slane %v510_v16, %v5561_v28 }
 0x15d   : > { %v580_v31 = vrot.slane %v510_v16, %v5564_v30  ;;  %v591_v33 = vrot.slane %v510_v16, %v5567_v32  ;;  %v602_v35 = vrot.slane %v510_v16, %v5570_v34  ;;  %v511_v37 = vmul.f32 %v508_v13, %v437_v18 }
 0x15e   : > { %549 = vbcast.lane.b32.xlu0 %v547_v21, 256  ;;  %538 = vbcast.lane.b32.xlu1 %v536_v22, 256  ;;  %v613_v38 = vrot.slane %v510_v16, %v5573_v36  ;;  %4949 = vrcp.f32 %v512_v42  ;;  %v513_v44 = vadd.f32 1e-06, %v5558_v25  ;;  %v5670_v42 = vld [vmem:[%s8518_s5 + $0x1] ss:$0 sm:$0xff] }
 0x15f   : > { %v624_v39 = vrot.slane %v511_v37, %v5547_v12  ;;  %v635_v40 = vrot.slane %v511_v37, %v5550_v14  ;;  %v646_v41 = vrot.slane %v511_v37, %v5556_v23  ;;  %v657_v43 = vrot.slane %v511_v37, %v5561_v28 }
 0x160   : > { %v668_v45 = vrot.slane %v511_v37, %v5564_v30  ;;  %4951 = vrcp.f32 %v513_v44  ;;  %v679_v46 = vrot.slane %v511_v37, %v5567_v32  ;;  %v690_v48 = vrot.slane %v511_v37, %v5570_v34 }
 0x161   : > { %v701_v52 = vrot.slane %v511_v37, %v5573_v36 }
 0x162   : > { %560 = vbcast.lane.b32.xlu0 %v558_v27, 256  ;;  %542 = vbcast.lane.b32.xlu1 %v536_v22, 264 }
 0x166   : > { %571 = vbcast.lane.b32.xlu0 %v569_v29, 256  ;;  %553 = vbcast.lane.b32.xlu1 %v547_v21, 264 }
 0x168   : > { %v4950_v47 = vpop.eup %4949 }
 0x169   : > { %v515_v49 = vmul.f32 6.2831855, %v4950_v47 }
 0x16a   : > { %582 = vbcast.lane.b32.xlu0 %v580_v31, 256  ;;  %564 = vbcast.lane.b32.xlu1 %v558_v27, 264  ;;  %v4952_v50 = vpop.eup %4951 }
 0x16b   : > { %v517_v51 = vmul.f32 6.2831855, %v4952_v50 }
 0x16e   : > { %593 = vbcast.lane.b32.xlu0 %v591_v33, 256  ;;  %575 = vbcast.lane.b32.xlu1 %v569_v29, 264 }
 0x172   : > { %604 = vbcast.lane.b32.xlu0 %v602_v35, 256  ;;  %586 = vbcast.lane.b32.xlu1 %v580_v31, 264 }
 0x176   : > { %615 = vbcast.lane.b32.xlu0 %v613_v38, 256  ;;  %597 = vbcast.lane.b32.xlu1 %v591_v33, 264 }
 0x17a   : > { %608 = vbcast.lane.b32.xlu1 %v602_v35, 264  ;;  %626 = vbcast.lane.b32.xlu0 %v624_v39, 256 }
 0x17e   : > { %619 = vbcast.lane.b32.xlu1 %v613_v38, 264  ;;  %637 = vbcast.lane.b32.xlu0 %v635_v40, 256 }
 0x182   : > { %630 = vbcast.lane.b32.xlu1 %v624_v39, 264  ;;  %648 = vbcast.lane.b32.xlu0 %v646_v41, 256 }
 0x186   : > { %641 = vbcast.lane.b32.xlu1 %v635_v40, 264  ;;  %659 = vbcast.lane.b32.xlu0 %v657_v43, 256 }
 0x18a   : > { %652 = vbcast.lane.b32.xlu1 %v646_v41, 264  ;;  %670 = vbcast.lane.b32.xlu0 %v668_v45, 256  ;;  %v5665_v41 = vld [vmem:[%s8518_s5] ss:$0 sm:$0xff] }
 0x18e   : > { %663 = vbcast.lane.b32.xlu1 %v657_v43, 264  ;;  %681 = vbcast.lane.b32.xlu0 %v679_v46, 256 }
 0x192   : > { %674 = vbcast.lane.b32.xlu1 %v668_v45, 264  ;;  %692 = vbcast.lane.b32.xlu0 %v690_v48, 256 }
 0x196   : > { %685 = vbcast.lane.b32.xlu1 %v679_v46, 264  ;;  %520 = vperm.xlu0 %4942, %v515_v49   ;;  %v5679_v49 = vld [vmem:[%s8518_s5 + $0x2] ss:$0 sm:$0xff] }
 0x19a   : > { %696 = vbcast.lane.b32.xlu1 %v690_v48, 264  ;;  %525 = vperm.xlu0 %4942, %v517_v51  }
 0x19e   : > { %707 = vbcast.lane.b32.xlu1 %v701_v52, 264  ;;  %703 = vbcast.lane.b32.xlu0 %v701_v52, 256 }
 0x1d0   : > { %v5586_v53 = vpop.permute.xlu0 %549  ;;  %v539_v9 = vpop.permute.xlu1 %538 }
 0x1d1   : > { %v713_v45 = vmul.f32 %v5665_v41, %v539_v9 }
 0x1d4   : > { %v5588_v54 = vpop.permute.xlu0 %560  ;;  %v543_v13 = vpop.permute.xlu1 %542 }
 0x1d5   : > { %v714_v46 = vmul.f32 %v5665_v41, %v543_v13 }
 0x1d8   : > { %v5590_v55 = vpop.permute.xlu0 %571  ;;  %v554_v17 = vpop.permute.xlu1 %553 }
 0x1dc   : > { %v5592_v56 = vpop.permute.xlu0 %582  ;;  %v5625_v21 = vpop.permute.xlu1 %564 }
 0x1e0   : > { %v5594_v57 = vpop.permute.xlu0 %593  ;;  %v5628_v24 = vpop.permute.xlu1 %575 }
 0x1e4   : > { %v5596_v58 = vpop.permute.xlu0 %604  ;;  %v5632_v27 = vpop.permute.xlu1 %586 }
 0x1e8   : > { %v5598_v59 = vpop.permute.xlu0 %615  ;;  %v5635_v29 = vpop.permute.xlu1 %597 }
 0x1ec   : > { %v5600_v60 = vpop.permute.xlu0 %626  ;;  %v5639_v31 = vpop.permute.xlu1 %608 }
 0x1ed   : > { %8564 = vst [vmem:[#allocation16_spill] sm:$0xff] %v5600_v60 }
 0x1f0   : > { %v5602_v61 = vpop.permute.xlu0 %637  ;;  %v5642_v33 = vpop.permute.xlu1 %619 }
 0x1f1   : > { %8565 = vst [vmem:[#allocation17_spill] sm:$0xff] %v5602_v61 }
 0x1f4   : > { %v5604_v62 = vpop.permute.xlu0 %648 }
 0x1f5   : > { %8566 = vst [vmem:[#allocation18_spill] sm:$0xff] %v5604_v62 }
 0x1f8   : > { %v5606_v63 = vpop.permute.xlu0 %659 }
 0x1f9   : > { %8567 = vst [vmem:[#allocation19_spill] sm:$0xff] %v5606_v63 }
 0x1fc   : > { %v5608_v0 = vpop.permute.xlu0 %670 }
 0x1fd   : > { %8568 = vst [vmem:[#allocation20_spill] sm:$0xff] %v5608_v0 }
 0x200   : > { %v5610_v1 = vpop.permute.xlu0 %681 }
 0x201   : > { %8569 = vst [vmem:[#allocation21_spill] sm:$0xff] %v5610_v1 }
 0x204   : > { %v5612_v2 = vpop.permute.xlu0 %692 }
 0x205   : > { %8570 = vst [vmem:[#allocation22_spill] sm:$0xff] %v5612_v2 }
 0x215   : > { %v521_v3 = vpop.permute.xlu0 %520 }
 0x216   : > { %v528_v4 = vmul.f32 %v521_v3, %v5552_v19 }
 0x218   : > { %v748_v5 = vrot.slane %v528_v4, %v5547_v12  ;;  %v759_v6 = vrot.slane %v528_v4, %v5550_v14  ;;  %v770_v7 = vrot.slane %v528_v4, %v5556_v23  ;;  %v781_v8 = vrot.slane %v528_v4, %v5561_v28 }
 0x219   : > { %v792_v10 = vrot.slane %v528_v4, %v5564_v30  ;;  %v803_v11 = vrot.slane %v528_v4, %v5567_v32  ;;  %v814_v15 = vrot.slane %v528_v4, %v5570_v34  ;;  %v526_v16 = vpop.permute.xlu0 %525  ;;  %v825_v19 = vrot.slane %v528_v4, %v5573_v36 }
 0x21a   : > { %754 = vbcast.lane.b32.xlu1 %v748_v5, 264  ;;  %750 = vbcast.lane.b32.xlu0 %v748_v5, 256  ;;  %v529_v18 = vmul.f32 %v526_v16, %v5558_v25 }
 0x21c   : > { %v836_v20 = vrot.slane %v529_v18, %v5547_v12  ;;  %v847_v22 = vrot.slane %v529_v18, %v5550_v14  ;;  %v858_v26 = vrot.slane %v529_v18, %v5556_v23  ;;  %v869_v25 = vrot.slane %v529_v18, %v5561_v28 }
 0x21d   : > { %v880_v12 = vrot.slane %v529_v18, %v5564_v30  ;;  %v891_v14 = vrot.slane %v529_v18, %v5567_v32  ;;  %v902_v23 = vrot.slane %v529_v18, %v5570_v34  ;;  %v913_v28 = vrot.slane %v529_v18, %v5573_v36  ;;  %v5644_v30 = vpop.permute.xlu1 %630  ;;  %v5660_v36 = vpop.permute.xlu0 %703 }
 0x21e   : > { %765 = vbcast.lane.b32.xlu1 %v759_v6, 264  ;;  %761 = vbcast.lane.b32.xlu0 %v759_v6, 256  ;;  %8578 = vst [vmem:[#allocation30_spill] sm:$0xff] %v5660_v36  ;;  %v716_v6 = vmul.f32 %v5665_v41, %v554_v17 }
 0x221   : > { %v5646_v35 = vpop.permute.xlu1 %641 }
 0x222   : > { %776 = vbcast.lane.b32.xlu1 %v770_v7, 264  ;;  %772 = vbcast.lane.b32.xlu0 %v770_v7, 256  ;;  %8571 = vst [vmem:[#allocation23_spill] sm:$0xff] %v5646_v35 }
 0x225   : > { %v5648_v37 = vpop.permute.xlu1 %652 }
 0x226   : > { %787 = vbcast.lane.b32.xlu1 %v781_v8, 264  ;;  %783 = vbcast.lane.b32.xlu0 %v781_v8, 256  ;;  %8572 = vst [vmem:[#allocation24_spill] sm:$0xff] %v5648_v37 }
 0x229   : > { %v5650_v32 = vpop.permute.xlu1 %663 }
 0x22a   : > { %798 = vbcast.lane.b32.xlu1 %v792_v10, 264  ;;  %794 = vbcast.lane.b32.xlu0 %v792_v10, 256  ;;  %8573 = vst [vmem:[#allocation25_spill] sm:$0xff] %v5650_v32 }
 0x22d   : > { %v5652_v38 = vpop.permute.xlu1 %674 }
 0x22e   : > { %809 = vbcast.lane.b32.xlu1 %v803_v11, 264  ;;  %805 = vbcast.lane.b32.xlu0 %v803_v11, 256  ;;  %8574 = vst [vmem:[#allocation26_spill] sm:$0xff] %v5652_v38 }
 0x231   : > { %v5654_v34 = vpop.permute.xlu1 %685 }
 0x232   : > { %820 = vbcast.lane.b32.xlu1 %v814_v15, 264  ;;  %816 = vbcast.lane.b32.xlu0 %v814_v15, 256  ;;  %8575 = vst [vmem:[#allocation27_spill] sm:$0xff] %v5654_v34 }
 0x235   : > { %v5656_v39 = vpop.permute.xlu1 %696 }
 0x236   : > { %831 = vbcast.lane.b32.xlu1 %v825_v19, 264  ;;  %827 = vbcast.lane.b32.xlu0 %v825_v19, 256  ;;  %8576 = vst [vmem:[#allocation28_spill] sm:$0xff] %v5656_v39 }
 0x239   : > { %v5658_v40 = vpop.permute.xlu1 %707 }
 0x23a   : > { %842 = vbcast.lane.b32.xlu1 %v836_v20, 264  ;;  %838 = vbcast.lane.b32.xlu0 %v836_v20, 256  ;;  %8577 = vst [vmem:[#allocation29_spill] sm:$0xff] %v5658_v40 }
 0x23e   : > { %853 = vbcast.lane.b32.xlu1 %v847_v22, 264  ;;  %849 = vbcast.lane.b32.xlu0 %v847_v22, 256 }
 0x242   : > { %864 = vbcast.lane.b32.xlu1 %v858_v26, 264  ;;  %860 = vbcast.lane.b32.xlu0 %v858_v26, 256 }
 0x246   : > { %875 = vbcast.lane.b32.xlu1 %v869_v25, 264  ;;  %871 = vbcast.lane.b32.xlu0 %v869_v25, 256 }
 0x24a   : > { %886 = vbcast.lane.b32.xlu1 %v880_v12, 264  ;;  %882 = vbcast.lane.b32.xlu0 %v880_v12, 256 }
 0x24e   : > { %897 = vbcast.lane.b32.xlu1 %v891_v14, 264  ;;  %893 = vbcast.lane.b32.xlu0 %v891_v14, 256 }
 0x252   : > { %908 = vbcast.lane.b32.xlu1 %v902_v23, 264  ;;  %904 = vbcast.lane.b32.xlu0 %v902_v23, 256 }
 0x256   : > { %919 = vbcast.lane.b32.xlu1 %v913_v28, 264  ;;  %915 = vbcast.lane.b32.xlu0 %v913_v28, 256 }
 0x28c   : > { %v755_v43 = vpop.permute.xlu1 %754  ;;  %v751_v44 = vpop.permute.xlu0 %750 }
 0x28d   : > { %v926_v47 = vmul.f32 %v5670_v42, %v755_v43  ;;  %v925_v48 = vmul.f32 %v5670_v42, %v751_v44  ;;  %v715_v43 = vmul.f32 %v5665_v41, %v5586_v53 }
 0x28f   : > { %v958_v50 = vadd.f32 %v926_v47, %v714_v46  ;;  %v957_v51 = vadd.f32 %v925_v48, %v713_v45 }
 0x290   : > { %v766_v52 = vpop.permute.xlu1 %765  ;;  %v762_v19 = vpop.permute.xlu0 %761 }
 0x291   : > { %v5682_v3 = vadd.f32 %v5679_v49, %v958_v50  ;;  %v5685_v4 = vadd.f32 %v5679_v49, %v957_v51  ;;  %v928_v5 = vmul.f32 %v5670_v42, %v766_v52  ;;  %v927_v25 = vmul.f32 %v5670_v42, %v762_v19 }
 0x293   : > { %v8530_v7 = vand.u32 2147483647, %v5682_v3  ;;  %v1132_v8 = vand.u32 2139095040, %v5682_v3  ;;  %v8529_v9 = vand.u32 2147483647, %v5685_v4  ;;  %v1028_v10 = vand.u32 2139095040, %v5685_v4 }
 0x294   : > { %v960_v13 = vadd.f32 %v928_v5, %v716_v6  ;;  %v5704_v50 = vadd.f32 %v927_v25, %v715_v43  ;;  %vm1131_vm15 = vcmp.lt.s32.totalorder %v5682_v3, 0  ;;  %vm1027_vm1 = vcmp.lt.s32.totalorder %v5685_v4, 0 }
 0x295   : > { %v1133_v11 = vshrl.u32 %v1132_v8, 23  ;;  %v1136_v15 = vand.u32 8388607, %v8530_v7  ;;  %v1029_v16 = vshrl.u32 %v1028_v10, 23  ;;  %v1032_v18 = vand.u32 8388607, %v8529_v9 }
 0x296   : > { %v5698_v17 = vadd.f32 %v5679_v49, %v960_v13  ;;  %v8537_v10 = vmov 683565275  }
 0x297   : > { %v4575_v20 = vadd.s32 4294967169, %v1133_v11  ;;  %v4571_v22 = vadd.s32 4294967169, %v1029_v16  ;;  %v1137_v12 = vor.u32 8388608, %v1136_v15  ;;  %v1033_v14 = vor.u32 8388608, %v1032_v18 }
 0x298   : > { %v1340_v28 = vand.u32 2139095040, %v5698_v17  ;;  %v8535_v15 = vmov 2475754826   ;;  %v8531_v18 = vmov 2131351028  }
 0x299   : > { %v1139_v26 = vadd.s32 1, %v4575_v20  ;;  %v1035_v23 = vadd.s32 1, %v4571_v22  ;;  %v5706_v51 = vshll.u32 %v1137_v12, 8  ;;  %v5710_v5 = vshll.u32 %v1033_v14, 8 }
 0x29a   : > { %v1341_v45 = vshrl.u32 %v1340_v28, 23  ;;  %v8533_v20 = vmov 2102212464  }
 0x29b   : > { %vm1140_vm2 = vcmp.gt.s32.totalorder %v1139_v26, 0  ;;  %vm1036_vm3 = vcmp.gt.s32.totalorder %v1035_v23, 0 }
 0x29c   : > { %v1141_v44 = vsel %vm1140_vm2, %v1139_v26, 0  ;;  %v1037_v48 = vsel %vm1036_vm3, %v1035_v23, 0  ;;  %v5714_v13 = vadd.s32 4294967169, %v1341_v45  ;;  %v8539_v26 = vmov 920167782  }
 0x29d   : > { %v1142_v46 = vshrl.u32 %v1141_v44, 5  ;;  %v1143_v47 = vand.u32 31, %v1141_v44  ;;  %v5708_v52 = vshrl.u32 %v1037_v48, 5  ;;  %v1039_v11 = vand.u32 31, %v1037_v48 }
 0x29e   : > { %v8541_v44 = vmov 1326507024  }
 0x29f   : > { %v1144_v8 = vsub.s32 32, %v1143_v47  ;;  %v1146_v53 = vshll.u32 %v8537_v10, %v1143_v47  ;;  %v1149_v16 = vshll.u32 %v8535_v15, %v1143_v47  ;;  %v1152_v19 = vshll.u32 %v8531_v18, %v1143_v47 }
 0x2a0   : > { %v1155_v22 = vshll.u32 %v8533_v20, %v1143_v47  ;;  %v1158_v25 = vshll.u32 %v8539_v26, %v1143_v47  ;;  %vm1161_vm4 = vcmp.lt.s32.totalorder %v1142_v46, 1  ;;  %vm1162_vm5 = vcmp.lt.s32.totalorder %v1142_v46, 2 }
 0x2a1   : > { %v1147_v12 = vshrl.u32 %v8535_v15, %v1144_v8  ;;  %v1150_v14 = vshrl.u32 %v8531_v18, %v1144_v8  ;;  %v1153_v23 = vshrl.u32 %v8533_v20, %v1144_v8  ;;  %v1145_v28 = vshrl.u32 %v8537_v10, %v1144_v8 }
 0x2a2   : > { %v1156_v43 = vshrl.u32 %v8539_v26, %v1144_v8  ;;  %v1159_v45 = vshrl.u32 %v8541_v44, %v1144_v8  ;;  %v1040_v6 = vsub.s32 32, %v1039_v11  ;;  %vm1163_vm6 = vcmp.lt.s32.totalorder %v1142_v46, 3 }
 0x2a3   : > { %v1148_v48 = vor.u32 %v1147_v12, %v1146_v53  ;;  %v1151_v9 = vor.u32 %v1150_v14, %v1149_v16  ;;  %v1154_v7 = vor.u32 %v1153_v23, %v1152_v19  ;;  %vm1164_vm7 = vcmp.lt.s32.totalorder %v1142_v46, 4 }
 0x2a4   : > { %v1157_v47 = vor.u32 %v1156_v43, %v1155_v22  ;;  %v1160_v36 = vor.u32 %v1159_v45, %v1158_v25  ;;  %v8579_v8 = vmov 683565275   ;;  %v8580_v19 = vmov 2475754826  }
 0x2a5   : > { %v1165_v18 = vsel %vm1161_vm4, %v1145_v28, %v1148_v48  ;;  %v1166_v20 = vsel %vm1164_vm7, %v1154_v7, 2102212464  ;;  %v1169_v15 = vsel %vm1161_vm4, %v1148_v48, %v1151_v9  ;;  %v1173_v10 = vsel %vm1161_vm4, %v1151_v9, %v1154_v7 }
 0x2a6   : > { %v1167_v26 = vsel %vm1163_vm6, %v1151_v9, %v1166_v20  ;;  %v1170_v40 = vsel %vm1164_vm7, %v1157_v47, 920167782  ;;  %v1174_v2 = vsel %vm1164_vm7, %v1160_v36, 1326507024  ;;  %v1042_v44 = vshll.u32 %v8579_v8, %v1039_v11 }
 0x2a7   : > { %v1171_v53 = vsel %vm1163_vm6, %v1154_v7, %v1170_v40  ;;  %v1175_v16 = vsel %vm1163_vm6, %v1157_v47, %v1174_v2  ;;  %v1043_v12 = vshrl.u32 %v8580_v19, %v1040_v6  ;;  %v1045_v22 = vshll.u32 %v8580_v19, %v1039_v11 }
 0x2a8   : > { %v1168_v25 = vsel %vm1162_vm5, %v1165_v18, %v1167_v26  ;;  %v1172_v14 = vsel %vm1162_vm5, %v1169_v15, %v1171_v53  ;;  %v1176_v23 = vsel %vm1162_vm5, %v1173_v10, %v1175_v16  ;;  %v8581_v28 = vmov 2131351028  }
 0x2a9   : > { %v1046_v43 = vshrl.u32 %v8581_v28, %v1040_v6  ;;  %v5737_v9 = vmul.u32.u64.low %v5706_v51, %v1176_v23  ;;  %v5738_v20 = vmul.u32.u64.high %v5706_v51, %v1176_v23, %v5737_v9  ;;  %v1044_v2 = vor.u32 %v1043_v12, %v1042_v44 }
 0x2aa   : > { %v5741_v36 = vmul.u32.u64.low %v5706_v51, %v1172_v14  ;;  %v5742_v40 = vmul.u32.u64.high %v5706_v51, %v1172_v14, %v5741_v36  ;;  %v1048_v45 = vshll.u32 %v8581_v28, %v1039_v11  ;;  %v8582_v18 = vmov 2102212464  }
 0x2ab   : > { %v1047_v7 = vor.u32 %v1046_v43, %v1045_v22  ;;  %v1049_v26 = vshrl.u32 %v8582_v18, %v1040_v6  ;;  %v1041_v46 = vshrl.u32 %v8579_v8, %v1040_v6  ;;  %v1051_v10 = vshll.u32 %v8582_v18, %v1039_v11 }
 0x2ac   : > { %v8583_v15 = vmov 920167782   ;;  %v8584_v47 = vmov 1326507024   ;;  %v1184_v16 = vmul.u32 %v5706_v51, %v1168_v25  ;;  %vm1057_vm8 = vcmp.lt.s32.totalorder %v5708_v52, 1 }
 0x2ad   : > { %v1052_v48 = vshrl.u32 %v8583_v15, %v1040_v6  ;;  %v1055_v53 = vshrl.u32 %v8584_v47, %v1040_v6  ;;  %v1050_v23 = vor.u32 %v1049_v26, %v1048_v45  ;;  %v1054_v14 = vshll.u32 %v8583_v15, %v1039_v11 }
 0x2ae   : > { %vm1186_vm9 = vc.u32 %v5738_v20, %v5741_v36  ;;  %v1187_v44 = vadd.s32 1, %v5742_v40  ;;  %vm1058_vm10 = vcmp.lt.s32.totalorder %v5708_v52, 2  ;;  %vm1059_vm11 = vcmp.lt.s32.totalorder %v5708_v52, 3 }
 0x2af   : > { %v1053_v12 = vor.u32 %v1052_v48, %v1051_v10  ;;  %v1056_v22 = vor.u32 %v1055_v53, %v1054_v14  ;;  %vm1060_vm12 = vcmp.lt.s32.totalorder %v5708_v52, 4  ;;  %v1065_v6 = vsel %vm1057_vm8, %v1044_v2, %v1047_v7 }
 0x2b0   : > { %v1188_v51 = vsel %vm1186_vm9, %v1187_v44, %v5742_v40  ;;  %v1062_v25 = vsel %vm1060_vm12, %v1050_v23, 2102212464  ;;  %v1069_v43 = vsel %vm1057_vm8, %v1047_v7, %v1050_v23  ;;  %v1061_v45 = vsel %vm1057_vm8, %v1041_v46, %v1044_v2 }
 0x2b1   : > { %v1066_v11 = vsel %vm1060_vm12, %v1053_v12, 920167782  ;;  %v1189_v9 = vadd.s32 %v1188_v51, %v1184_v16  ;;  %v1070_v39 = vsel %vm1060_vm12, %v1056_v22, 1326507024  ;;  %v1063_v1 = vsel %vm1059_vm11, %v1047_v7, %v1062_v25  ;;  %v777_v25 = vpop.permute.xlu1 %776 }
 0x2b2   : > { %v1067_v26 = vsel %vm1059_vm11, %v1050_v23, %v1066_v11  ;;  %v1071_v48 = vsel %vm1059_vm11, %v1053_v12, %v1070_v39  ;;  %v1347_v53 = vadd.s32 1, %v5714_v13  ;;  %v8585_v7 = vand.u32 2147483647, %v5698_v17 }
 0x2b3   : > { %v1068_v10 = vsel %vm1058_vm10, %v1065_v6, %v1067_v26  ;;  %v1190_v14 = vadd.s32 536870912, %v1189_v9  ;;  %v1072_v34 = vsel %vm1058_vm10, %v1069_v43, %v1071_v48  ;;  %v1064_v13 = vsel %vm1058_vm10, %v1061_v45, %v1063_v1  ;;  %v773_v26 = vpop.permute.xlu0 %772 }
 0x2b4   : > { %v5767_v40 = vmul.u32.u64.low %v5710_v5, %v1068_v10  ;;  %v5768_v44 = vmul.u32.u64.high %v5710_v5, %v1068_v10, %v5767_v40  ;;  %v5772_v2 = vmul.u32.u64.low %v5710_v5, %v1072_v34  ;;  %v5773_v46 = vmul.u32.u64.high %v5710_v5, %v1072_v34, %v5772_v2 }
 0x2b5   : > { %v1344_v16 = vand.u32 8388607, %v8585_v7  ;;  %vm1348_vm13 = vcmp.gt.s32.totalorder %v1347_v53, 0  ;;  %v1191_v39 = vshrl.u32 %v1190_v14, 30  ;;  %v5782_v51 = vadd.f32 %v5679_v49, %v5704_v50 }
 0x2b6   : > { %v1349_v23 = vsel %vm1348_vm13, %v1347_v53, 0  ;;  %v1083_v6 = vadd.s32 1, %v5768_v44  ;;  %v1080_v34 = vmul.u32 %v5710_v5, %v1064_v13  ;;  %vm1082_vm14 = vc.u32 %v5773_v46, %v5767_v40 }
 0x2b7   : > { %v1351_v12 = vand.u32 31, %v1349_v23  ;;  %v1192_v22 = vshll.u32 %v1191_v39, 30  ;;  %v1345_v11 = vor.u32 8388608, %v1344_v16  ;;  %v5789_v1 = vmul.f32 %v5665_v41, %v5625_v21 }
 0x2b8   : > { %v1084_v50 = vsel %vm1082_vm14, %v1083_v6, %v5768_v44  ;;  %v8586_v45 = vand.u32 2147483647, %v5682_v3  ;;  %v1215_v10 = vsub.s32 4, %v1191_v39  ;;  %v5802_v53 = vmul.f32 %v5670_v42, %v777_v25 }
 0x2b9   : > { %v1352_v43 = vsub.s32 32, %v1351_v12  ;;  %v5792_v52 = vsub.s32 %v1189_v9, %v1192_v22  ;;  %v1085_v48 = vadd.s32 %v1084_v50, %v1080_v34  ;;  %v1185_v21 = vadd.s32 %v5741_v36, %v5738_v20 }
 0x2ba   : > { %vm5797_vm0 = vcmp.le.f32.partialorder %v8586_v45, 0.7853982  ;;  %v5809_v44 = vmul.f32 %v5670_v42, %v773_v26  ;;  %v5812_v16 = vshll.u32 %v1345_v11, 8  ;;  %v1236_v13 = vand.u32 2139095040, %v5782_v51 }
 0x2bb   : > { %v1195_v14 = vsub.s32 0, %v5792_v52  ;;  %v1086_v2 = vadd.s32 536870912, %v1085_v48  ;;  %v1355_v7 = vshrl.u32 %v8580_v19, %v1352_v43  ;;  %v5816_v6 = vshrl.u32 %v1349_v23, 5 }
 0x2bc   : > { %v1358_v20 = vshrl.u32 %v8581_v28, %v1352_v43  ;;  %v1361_v36 = vshrl.u32 %v8582_v18, %v1352_v43  ;;  %v5822_v25 = vsel %vm1131_vm15, %v1215_v10, %v1191_v39  ;;  %v1354_v26 = vshll.u32 %v8579_v8, %v1351_v12 }
 0x2bd   : > { %v4576_v22 = vmin.u32 %v1195_v14, %v5792_v52  ;;  %v1087_v34 = vshrl.u32 %v1086_v2, 30  ;;  %v1364_v11 = vshrl.u32 %v8583_v15, %v1352_v43  ;;  %v1357_v45 = vshll.u32 %v8580_v19, %v1351_v12 }
 0x2be   : > { %v1360_v14 = vshll.u32 %v8581_v28, %v1351_v12  ;;  %v1367_v23 = vshrl.u32 %v8584_v47, %v1352_v43  ;;  %v1356_v0 = vor.u32 %v1355_v7, %v1354_v26  ;;  %v1363_v38 = vshll.u32 %v8582_v18, %v1351_v12 }
 0x2bf   : > { %v1197_v50 = vclz %v4576_v22  ;;  %v1088_v9 = vshll.u32 %v1087_v34, 30  ;;  %v1237_v63 = vshrl.u32 %v1236_v13, 23  ;;  %v1359_v39 = vor.u32 %v1358_v20, %v1357_v45 }
 0x2c0   : > { %v1362_v10 = vor.u32 %v1361_v36, %v1360_v14  ;;  %v1366_v2 = vshll.u32 %v8583_v15, %v1351_v12  ;;  %v1218_v22 = vsel %vm5797_vm0, 0, %v5822_v25  ;;  %v1353_v37 = vshrl.u32 %v8579_v8, %v1352_v43 }
 0x2c1   : > { %v4577_v32 = vadd.s32 4294967294, %v1197_v50  ;;  %v5835_v62 = vsub.s32 %v1085_v48, %v1088_v9  ;;  %v1365_v61 = vor.u32 %v1364_v11, %v1363_v38  ;;  %v1111_v7 = vsub.s32 4, %v1087_v34 }
 0x2c2   : > { %v1368_v26 = vor.u32 %v1367_v23, %v1366_v2  ;;  %vm1369_vm3 = vcmp.lt.s32.totalorder %v5816_v6, 1  ;;  %vm1371_vm4 = vcmp.lt.s32.totalorder %v5816_v6, 3  ;;  %vm1372_vm5 = vcmp.lt.s32.totalorder %v5816_v6, 4 }
 0x2c3   : > { %vm4578_vm2 = vcmp.lt.s32.totalorder %v4577_v32, 0  ;;  %v1091_v20 = vsub.s32 0, %v5835_v62  ;;  %v8589_v48 = vand.u32 2147483647, %v5685_v4  ;;  %v1374_v38 = vsel %vm1372_vm5, %v1362_v10, 2102212464 }
 0x2c4   : > { %v1200_v13 = vsel %vm4578_vm2, 0, %v4577_v32  ;;  %v1377_v43 = vsel %vm1369_vm3, %v1356_v0, %v1359_v39  ;;  %v1378_v11 = vsel %vm1372_vm5, %v1365_v61, 920167782  ;;  %v1381_v50 = vsel %vm1369_vm3, %v1359_v39, %v1362_v10 }
 0x2c5   : > { %v1201_v12 = vsub.s32 32, %v1200_v13  ;;  %v1205_v36 = vsub.s32 4294967266, %v1200_v13  ;;  %vm5844_vm6 = vcmp.le.f32.partialorder %v8589_v48, 0.7853982  ;;  %v1202_v32 = vshll.u32 %v5792_v52, %v1200_v13 }
 0x2c6   : > { %v4572_v25 = vmin.u32 %v1091_v20, %v5835_v62  ;;  %v1379_v23 = vsel %vm1371_vm4, %v1362_v10, %v1378_v11  ;;  %v1382_v2 = vsel %vm1372_vm5, %v1368_v26, 1326507024  ;;  %vm1370_vm7 = vcmp.lt.s32.totalorder %v5816_v6, 2 }
 0x2c7   : > { %v1203_v45 = vshrl.u32 %v1185_v21, %v1201_v12  ;;  %v1206_v14 = vadd.s32 127, %v1205_v36  ;;  %v1373_v35 = vsel %vm1369_vm3, %v1353_v37, %v1356_v0  ;;  %v1375_v52 = vsel %vm1371_vm4, %v1359_v39, %v1374_v38 }
 0x2c8   : > { %v1093_v48 = vclz %v4572_v25  ;;  %v1380_v60 = vsel %vm1370_vm7, %v1377_v43, %v1379_v23  ;;  %v1383_v21 = vsel %vm1371_vm4, %v1365_v61, %v1382_v2  ;;  %v1112_v11 = vsel %vm1027_vm1, %v1111_v7, %v1087_v34 }
 0x2c9   : > { %v1204_v13 = vor.u32 %v1203_v45, %v1202_v32  ;;  %v1207_v20 = vshll.u32 %v1206_v14, 23  ;;  %v1384_v36 = vsel %vm1370_vm7, %v1381_v50, %v1383_v21  ;;  %v1081_v39 = vadd.s32 %v5767_v40, %v5773_v46 }
 0x2ca   : > { %v4573_v12 = vadd.s32 4294967294, %v1093_v48  ;;  %v5864_v10 = vmul.u32.u64.low %v5812_v16, %v1380_v60  ;;  %v5865_v26 = vmul.u32.u64.high %v5812_v16, %v1380_v60, %v5864_v10  ;;  %v1376_v6 = vsel %vm1370_vm7, %v1373_v35, %v1375_v52 }
 0x2cb   : > { %v1208_v25 = vor.u32 4788187, %v1207_v20  ;;  %v5870_v0 = vmul.u32.u64.low %v5812_v16, %v1384_v36  ;;  %v5871_v37 = vmul.u32.u64.high %v5812_v16, %v1384_v36, %v5870_v0  ;;  %v4579_v61 = vadd.s32 4294967169, %v1237_v63 }
 0x2cc   : > { %vm4574_vm8 = vcmp.lt.s32.totalorder %v4573_v12, 0  ;;  %v1211_v43 = vcvt.s32.f32 %v1204_v13  ;;  %v1222_v32 = vadd.s32 3, %v1218_v22  ;;  %v1114_v14 = vsel %vm5844_vm6, 0, %v1112_v11 }
 0x2cd   : > { %v1209_v38 = vand.u32 2147483647, %v1208_v25  ;;  %v1096_v50 = vsel %vm4574_vm8, 0, %v4573_v12  ;;  %v1395_v34 = vadd.s32 1, %v5865_v26  ;;  %v1392_v23 = vmul.u32 %v5812_v16, %v1376_v6 }
 0x2ce   : > { %v1097_v60 = vsub.s32 32, %v1096_v50  ;;  %v1101_v45 = vsub.s32 4294967266, %v1096_v50  ;;  %vm1394_vm9 = vc.u32 %v5871_v37, %v5864_v10  ;;  %v1243_v40 = vadd.s32 1, %v4579_v61 }
 0x2cf   : > { %v1212_v7 = vmul.f32 %v1211_v43, %v1209_v38  ;;  %v1098_v35 = vshll.u32 %v5835_v62, %v1096_v50  ;;  %v1396_v22 = vsel %vm1394_vm9, %v1395_v34, %v5865_v26  ;;  %v8592_v52 = vand.u32 2147483647, %v5782_v51 }
 0x2d0   : > { %v1099_v63 = vshrl.u32 %v1081_v39, %v1097_v60  ;;  %v1102_v46 = vadd.s32 127, %v1101_v45  ;;  %v1397_v48 = vadd.s32 %v1396_v22, %v1392_v23  ;;  %vm1244_vm10 = vcmp.gt.s32.totalorder %v1243_v40, 0 }
 0x2d1   : > { %v1213_v2 = vxor.u32 2147483648, %v1212_v7  ;;  %v1240_v13 = vand.u32 8388607, %v8592_v52  ;;  %v1118_v12 = vadd.s32 3, %v1114_v14  ;;  %v1245_v36 = vsel %vm1244_vm10, %v1243_v40, 0 }
 0x2d2   : > { %v1100_v20 = vor.u32 %v1099_v63, %v1098_v35  ;;  %v1103_v21 = vshll.u32 %v1102_v46, 23  ;;  %v1398_v25 = vadd.s32 536870912, %v1397_v48  ;;  %v1247_v11 = vand.u32 31, %v1245_v36 }
 0x2d3   : > { %v1214_v16 = vsel %vm1131_vm15, %v1213_v2, %v1212_v7  ;;  %v962_v62 = vadd.f32 %v5802_v53, %v5789_v1  ;;  %v717_v26 = vmul.f32 %v5665_v41, %v5588_v54  ;;  %v5893_v39 = vand.u32 3, %v1222_v32 }
 0x2d4   : > { %v1217_v0 = vsel %vm5797_vm0, %v5682_v3, %v1214_v16  ;;  %v1104_v6 = vor.u32 4788187, %v1103_v21  ;;  %v5895_v61 = vshrl.u32 %v1398_v25, 30  ;;  %v1241_v38 = vor.u32 8388608, %v1240_v13 }
 0x2d5   : > { %4953 = vcosq.f32 %v1217_v0  ;;  %v1248_v43 = vsub.s32 32, %v1247_v11  ;;  %v1107_v60 = vcvt.s32.f32 %v1100_v20  ;;  %v5897_v45 = vand.u32 3, %v1118_v12 }
 0x2d6   : > { %4955 = vsinq.f32 %v1217_v0  ;;  %v1105_v50 = vand.u32 2147483647, %v1104_v6  ;;  %v1400_v1 = vshll.u32 %v5895_v61, 30  ;;  %v5901_v54 = vadd.f32 %v5679_v49, %v962_v62 }
 0x2d7   : > { %v5904_v5 = vadd.f32 %v5809_v44, %v717_v26  ;;  %v5907_v32 = vadd.s32 %v5864_v10, %v5871_v37  ;;  %v1251_v14 = vshrl.u32 %v8580_v19, %v1248_v43  ;;  %v1254_v34 = vshrl.u32 %v8581_v28, %v1248_v43 }
 0x2d8   : > { %v1108_v53 = vmul.f32 %v1107_v60, %v1105_v50  ;;  %vm1228_vm11 = vcmp.eq.s32.totalorder %v5893_v39, 2  ;;  %v5912_v7 = vsub.s32 %v1397_v48, %v1400_v1  ;;  %v5914_v23 = vshrl.u32 %v1245_v36, 5 }
 0x2d9   : > { %v1260_v40 = vshrl.u32 %v8583_v15, %v1248_v43  ;;  %v5917_v35 = vshll.u32 %v1241_v38, 8  ;;  %vm1225_vm12 = vcmp.eq.s32.totalorder %v5893_v39, 0  ;;  %v1250_v10 = vshll.u32 %v8579_v8, %v1247_v11 }
 0x2da   : > { %v1109_v44 = vxor.u32 2147483648, %v1108_v53  ;;  %v1253_v37 = vshll.u32 %v8580_v19, %v1247_v11  ;;  %v1257_v63 = vshrl.u32 %v8582_v18, %v1248_v43  ;;  %vm1224_vm13 = vcmp.lt.s32.totalorder %v5893_v39, 2 }
 0x2db   : > { %v1403_v46 = vsub.s32 0, %v5912_v7  ;;  %v1256_v22 = vshll.u32 %v8581_v28, %v1247_v11  ;;  %v1259_v2 = vshll.u32 %v8582_v18, %v1247_v11  ;;  %v1545_v48 = vand.u32 2147483647, %v5901_v54 }
 0x2dc   : > { %vm1221_vm14 = vweird.f32 %v5682_v3  ;;  %v1110_v52 = vsel %vm1027_vm1, %v1109_v44, %v1108_v53  ;;  %v1252_v13 = vor.u32 %v1251_v14, %v1250_v10  ;;  %v1255_v20 = vor.u32 %v1254_v34, %v1253_v37 }
 0x2dd   : > { %v1263_v21 = vshrl.u32 %v8584_v47, %v1248_v43  ;;  %v1113_v12 = vsel %vm5844_vm6, %v5685_v4, %v1110_v52  ;;  %v4584_v36 = vmin.u32 %v1403_v46, %v5912_v7  ;;  %v1261_v16 = vor.u32 %v1260_v40, %v1259_v2 }
 0x2de   : > { %v1262_v25 = vshll.u32 %v8583_v15, %v1247_v11  ;;  %4957 = vcosq.f32 %v1113_v12  ;;  %v1423_v62 = vsub.s32 4, %v5895_v61  ;;  %v1249_v26 = vshrl.u32 %v8579_v8, %v1248_v43 }
 0x2df   : > { %v1258_v0 = vor.u32 %v1257_v63, %v1256_v22  ;;  %v4954_v6 = vpop.eup %4953  ;;  %4959 = vsinq.f32 %v1113_v12  ;;  %vm1339_vm15 = vcmp.lt.s32.totalorder %v5698_v17, 0  ;;  %v1405_v38 = vclz %v4584_v36 }
 0x2e0   : > { %v1264_v50 = vor.u32 %v1263_v21, %v1262_v25  ;;  %vm1265_vm0 = vcmp.lt.s32.totalorder %v5914_v23, 1  ;;  %v4956_v9 = vpop.eup %4955  ;;  %v1229_v60 = vxor.u32 2147483648, %v4954_v6  ;;  %vm1266_vm1 = vcmp.lt.s32.totalorder %v5914_v23, 2 }
 0x2e1   : > { %vm1268_vm2 = vcmp.lt.s32.totalorder %v5914_v23, 4  ;;  %v1273_v11 = vsel %vm1265_vm0, %v1252_v13, %v1255_v20  ;;  %v1226_v43 = vxor.u32 2147483648, %v4956_v9  ;;  %v4585_v1 = vadd.s32 4294967294, %v1405_v38 }
 0x2e2   : > { %vm1267_vm3 = vcmp.lt.s32.totalorder %v5914_v23, 3  ;;  %v1274_v53 = vsel %vm1268_vm2, %v1261_v16, 920167782  ;;  %v1230_v14 = vsel %vm1228_vm11, %v1229_v60, %v4956_v9  ;;  %v8593_v34 = vand.u32 2147483647, %v5698_v17 }
 0x2e3   : > { %v1270_v44 = vsel %vm1268_vm2, %v1258_v0, 2102212464  ;;  %v1275_v10 = vsel %vm1267_vm3, %v1258_v0, %v1274_v53  ;;  %v1277_v37 = vsel %vm1265_vm0, %v1255_v20, %v1258_v0  ;;  %v1227_v63 = vsel %vm1225_vm12, %v4954_v6, %v1226_v43 }
 0x2e4   : > { %vm5951_vm4 = vcmp.le.f32.partialorder %v8593_v34, 0.7853982  ;;  %vm4586_vm5 = vcmp.lt.s32.totalorder %v4585_v1, 0  ;;  %v1276_v46 = vsel %vm1266_vm1, %v1273_v11, %v1275_v10  ;;  %v1278_v22 = vsel %vm1268_vm2, %v1264_v50, 1326507024 }
 0x2e5   : > { %v1231_v2 = vsel %vm1224_vm13, %v1227_v63, %v1230_v14  ;;  %vm1120_vm6 = vcmp.lt.s32.totalorder %v5897_v45, 2  ;;  %v1408_v52 = vsel %vm4586_vm5, 0, %v4585_v1  ;;  %v1269_v21 = vsel %vm1265_vm0, %v1249_v26, %v1252_v13 }
 0x2e6   : > { %v1279_v12 = vsel %vm1267_vm3, %v1261_v16, %v1278_v22  ;;  %v1232_v36 = vsel %vm1221_vm14, nan, %v1231_v2  ;;  %vm1117_vm7 = vweird.f32 %v5685_v4  ;;  %v1409_v25 = vsub.s32 32, %v1408_v52 }
 0x2e7   : > { %v1413_v0 = vsub.s32 4294967266, %v1408_v52  ;;  %v1271_v39 = vsel %vm1267_vm3, %v1255_v20, %v1270_v44  ;;  %4354 = vst [vmem:[%s5975_s9 + $0x8] sm:$0xff] %v1232_v36  ;;  %v1410_v6 = vshll.u32 %v5912_v7, %v1408_v52  ;;  %v1280_v13 = vsel %vm1266_vm1, %v1277_v37, %v1279_v12 }
 0x2e8   : > { %v5982_v16 = vmul.u32.u64.low %v5917_v35, %v1276_v46  ;;  %v5983_v3 = vmul.u32.u64.high %v5917_v35, %v1276_v46, %v5982_v16  ;;  %v1411_v26 = vshrl.u32 %v5907_v32, %v1409_v25  ;;  %v4958_v20 = vpop.eup %4957  ;;  %vm1121_vm8 = vcmp.eq.s32.totalorder %v5897_v45, 0 }
 0x2e9   : > { %v1414_v38 = vadd.s32 127, %v1413_v0  ;;  %v5987_v50 = vmul.u32.u64.low %v5917_v35, %v1280_v13  ;;  %v5988_v9 = vmul.u32.u64.high %v5917_v35, %v1280_v13, %v5987_v50  ;;  %vm1124_vm9 = vcmp.eq.s32.totalorder %v5897_v45, 2  ;;  %v4960_v11 = vpop.eup %4959 }
 0x2ea   : > { %v1424_v7 = vsel %vm1339_vm15, %v1423_v62, %v5895_v61  ;;  %v1548_v60 = vand.u32 2139095040, %v5901_v54  ;;  %v1125_v43 = vxor.u32 2147483648, %v4958_v20  ;;  %v1412_v1 = vor.u32 %v1411_v26, %v1410_v6 }
 0x2eb   : > { %v1415_v32 = vshll.u32 %v1414_v38, 23  ;;  %v1272_v53 = vsel %vm1266_vm1, %v1269_v21, %v1271_v39  ;;  %v1122_v14 = vxor.u32 2147483648, %v4960_v11  ;;  %v1291_v34 = vadd.s32 1, %v5983_v3 }
 0x2ec   : > { %v1549_v44 = vshrl.u32 %v1548_v60, 23  ;;  %v6001_v10 = vadd.f32 %v5679_v49, %v5904_v5  ;;  %v1126_v37 = vsel %vm1124_vm9, %v1125_v43, %v4960_v11  ;;  %v1426_v62 = vsel %vm5951_vm4, 0, %v1424_v7  ;;  %v784_v11 = vpop.permute.xlu0 %783 }
 0x2ed   : > { %v1416_v61 = vor.u32 4788187, %v1415_v32  ;;  %v1552_v63 = vand.u32 8388607, %v1545_v48  ;;  %v1123_v23 = vsel %vm1121_vm8, %v4958_v20, %v1122_v14  ;;  %v1288_v46 = vmul.u32 %v5917_v35, %v1272_v53 }
 0x2ee   : > { %vm1290_vm10 = vc.u32 %v5988_v9, %v5982_v16  ;;  %v4591_v22 = vadd.s32 4294967169, %v1549_v44  ;;  %v1127_v5 = vsel %vm1120_vm6, %v1123_v23, %v1126_v37  ;;  %v1419_v52 = vcvt.s32.f32 %v1412_v1 }
 0x2ef   : > { %v1417_v2 = vand.u32 2147483647, %v1416_v61  ;;  %v1292_v21 = vsel %vm1290_vm10, %v1291_v34, %v5983_v3  ;;  %v1128_v12 = vsel %vm1117_vm7, nan, %v1127_v5  ;;  %v1430_v36 = vadd.s32 3, %v1426_v62  ;;  %v788_v3 = vpop.permute.xlu1 %787 }
 0x2f0   : > { %v1293_v25 = vadd.s32 %v1292_v21, %v1288_v46  ;;  %v1555_v0 = vadd.s32 1, %v4591_v22  ;;  %4353 = vst [vmem:[%s5975_s9] sm:$0xff] %v1128_v12  ;;  %v1553_v6 = vor.u32 8388608, %v1552_v63  ;;  %v1441_v35 = vand.u32 2147483647, %v6001_v10 }
 0x2f1   : > { %v1420_v39 = vmul.f32 %v1419_v52, %v1417_v2  ;;  %v6020_v13 = vmul.f32 %v5665_v41, %v5590_v55  ;;  %v720_v45 = vmul.f32 %v5665_v41, %v5628_v24  ;;  %vm1235_vm12 = vcmp.lt.s32.totalorder %v5782_v51, 0 }
 0x2f2   : > { %v1294_v26 = vadd.s32 536870912, %v1293_v25  ;;  %vm1556_vm11 = vcmp.gt.s32.totalorder %v1555_v0, 0  ;;  %v1444_v50 = vand.u32 2139095040, %v6001_v10  ;;  %v6026_v20 = vand.u32 3, %v1430_v36 }
 0x2f3   : > { %v1421_v4 = vxor.u32 2147483648, %v1420_v39  ;;  %v1557_v38 = vsel %vm1556_vm11, %v1555_v0, 0  ;;  %v8596_v7 = vand.u32 2147483647, %v5782_v51  ;;  %v6035_v55 = vadd.s32 %v5982_v16, %v5988_v9 }
 0x2f4   : > { %v1295_v24 = vshrl.u32 %v1294_v26, 30  ;;  %v1559_v41 = vand.u32 31, %v1557_v38  ;;  %v6039_v1 = vshll.u32 %v1553_v6, 8  ;;  %v6043_v32 = vand.u32 8388607, %v1441_v35 }
 0x2f5   : > { %vm6030_vm13 = vcmp.le.f32.partialorder %v8596_v7, 0.7853982  ;;  %v1422_v43 = vsel %vm1339_vm15, %v1421_v4, %v1420_v39  ;;  %v932_v53 = vmul.f32 %v5670_v42, %v788_v3  ;;  %v1558_v44 = vshrl.u32 %v1557_v38, 5 }
 0x2f6   : > { %v1425_v14 = vsel %vm5951_vm4, %v5698_v17, %v1422_v43  ;;  %v1296_v16 = vshll.u32 %v1295_v24, 30  ;;  %v1319_v9 = vsub.s32 4, %v1295_v24  ;;  %v1560_v34 = vsub.s32 32, %v1559_v41 }
 0x2f7   : > { %4961 = vcosq.f32 %v1425_v14  ;;  %v1445_v37 = vshrl.u32 %v1444_v50, 23  ;;  %v6050_v61 = vmul.f32 %v5670_v42, %v784_v11  ;;  %v1562_v63 = vshll.u32 %v8579_v8, %v1559_v41 }
 0x2f8   : > { %4963 = vsinq.f32 %v1425_v14  ;;  %v6052_v62 = vsub.s32 %v1293_v25, %v1296_v16  ;;  %v1565_v23 = vshll.u32 %v8580_v19, %v1559_v41  ;;  %v1563_v46 = vshrl.u32 %v8580_v19, %v1560_v34 }
 0x2f9   : > { %v1566_v40 = vshrl.u32 %v8581_v28, %v1560_v34  ;;  %v1568_v22 = vshll.u32 %v8581_v28, %v1559_v41  ;;  %v1569_v5 = vshrl.u32 %v8582_v18, %v1560_v34  ;;  %v6063_v42 = vsel %vm1235_vm12, %v1319_v9, %v1295_v24 }
 0x2fa   : > { %v1299_v2 = vsub.s32 0, %v6052_v62  ;;  %v1571_v52 = vshll.u32 %v8582_v18, %v1559_v41  ;;  %v1572_v21 = vshrl.u32 %v8583_v15, %v1560_v34  ;;  %vm1436_vm14 = vcmp.eq.s32.totalorder %v6026_v20, 2 }
 0x2fb   : > { %v1564_v12 = vor.u32 %v1563_v46, %v1562_v63  ;;  %v1567_v36 = vor.u32 %v1566_v40, %v1565_v23  ;;  %v1570_v25 = vor.u32 %v1569_v5, %v1568_v22  ;;  %v1449_v0 = vor.u32 8388608, %v6043_v32 }
 0x2fc   : > { %vm1433_vm15 = vcmp.eq.s32.totalorder %v6026_v20, 0  ;;  %v4580_v39 = vmin.u32 %v1299_v2, %v6052_v62  ;;  %v1573_v6 = vor.u32 %v1572_v21, %v1571_v52  ;;  %v1575_v26 = vshrl.u32 %v8584_v47, %v1560_v34 }
 0x2fd   : > { %v964_v3 = vadd.f32 %v932_v53, %v720_v45  ;;  %vm1432_vm0 = vcmp.lt.s32.totalorder %v6026_v20, 2  ;;  %v1322_v4 = vsel %vm6030_vm13, 0, %v6063_v42  ;;  %v1561_v38 = vshrl.u32 %v8579_v8, %v1560_v34 }
 0x2fe   : > { %v1574_v50 = vshll.u32 %v8583_v15, %v1559_v41  ;;  %v4587_v7 = vadd.s32 4294967169, %v1445_v37  ;;  %vm1429_vm1 = vweird.f32 %v5698_v17  ;;  %v1301_v24 = vclz %v4580_v39 }
 0x2ff   : > { %vm1577_vm2 = vcmp.lt.s32.totalorder %v1558_v44, 1  ;;  %vm1579_vm3 = vcmp.lt.s32.totalorder %v1558_v44, 3  ;;  %vm1580_vm4 = vcmp.lt.s32.totalorder %v1558_v44, 4  ;;  %vm1578_vm5 = vcmp.lt.s32.totalorder %v1558_v44, 2 }
 0x300   : > { %v1576_v11 = vor.u32 %v1575_v26, %v1574_v50  ;;  %v1581_v43 = vsel %vm1577_vm2, %v1561_v38, %v1564_v12  ;;  %v1582_v45 = vsel %vm1580_vm4, %v1570_v25, 2102212464  ;;  %v1585_v32 = vsel %vm1577_vm2, %v1564_v12, %v1567_v36 }
 0x301   : > { %v4581_v53 = vadd.s32 4294967294, %v1301_v24  ;;  %v1583_v14 = vsel %vm1579_vm3, %v1567_v36, %v1582_v45  ;;  %v1586_v16 = vsel %vm1580_vm4, %v1573_v6, 920167782  ;;  %v1589_v9 = vsel %vm1577_vm2, %v1567_v36, %v1570_v25  ;;  %v4962_v63 = vpop.eup %4961 }
 0x302   : > { %v1587_v41 = vsel %vm1579_vm3, %v1570_v25, %v1586_v16  ;;  %v1590_v34 = vsel %vm1580_vm4, %v1576_v11, 1326507024  ;;  %v1451_v37 = vadd.s32 1, %v4587_v7  ;;  %v4964_v23 = vpop.eup %4963  ;;  %v1437_v46 = vxor.u32 2147483648, %v4962_v63 }
 0x303   : > { %vm4582_vm6 = vcmp.lt.s32.totalorder %v4581_v53, 0  ;;  %v1584_v40 = vsel %vm1578_vm5, %v1581_v43, %v1583_v14  ;;  %v1591_v22 = vsel %vm1579_vm3, %v1573_v6, %v1590_v34  ;;  %v1434_v5 = vxor.u32 2147483648, %v4964_v23 }
 0x304   : > { %v1304_v2 = vsel %vm4582_vm6, 0, %v4581_v53  ;;  %v1588_v42 = vsel %vm1578_vm5, %v1585_v32, %v1587_v41  ;;  %v1592_v52 = vsel %vm1578_vm5, %v1589_v9, %v1591_v22  ;;  %v1438_v21 = vsel %vm1436_vm14, %v1437_v46, %v4964_v23 }
 0x305   : > { %v1305_v12 = vsub.s32 32, %v1304_v2  ;;  %v1306_v36 = vshll.u32 %v6052_v62, %v1304_v2  ;;  %v1309_v25 = vsub.s32 4294967266, %v1304_v2  ;;  %v1435_v39 = vsel %vm1433_vm15, %v4962_v63, %v1434_v5 }
 0x306   : > { %v6088_v26 = vmul.u32.u64.low %v6039_v1, %v1592_v52  ;;  %v6089_v38 = vmul.u32.u64.high %v6039_v1, %v1592_v52, %v6088_v26  ;;  %vm1452_vm7 = vcmp.gt.s32.totalorder %v1451_v37, 0  ;;  %v1439_v44 = vsel %vm1432_vm0, %v1435_v39, %v1438_v21 }
 0x307   : > { %v1307_v6 = vshrl.u32 %v6035_v55, %v1305_v12  ;;  %v1310_v50 = vadd.s32 127, %v1309_v25  ;;  %v1453_v7 = vsel %vm1452_vm7, %v1451_v37, 0  ;;  %v1440_v24 = vsel %vm1429_vm1, nan, %v1439_v44 }
 0x308   : > { %v6097_v62 = vmul.u32.u64.low %v6039_v1, %v1588_v42  ;;  %v6098_v11 = vmul.u32.u64.high %v6039_v1, %v1588_v42, %v6097_v62  ;;  %v6101_v43 = vshrl.u32 %v1453_v7, 5  ;;  %4356 = vst [vmem:[%s5975_s9 + $0x18] sm:$0xff] %v1440_v24  ;;  %v1455_v53 = vand.u32 31, %v1453_v7 }
 0x309   : > { %v1308_v45 = vor.u32 %v1307_v6, %v1306_v36  ;;  %v1311_v32 = vshll.u32 %v1310_v50, 23  ;;  %v6104_v20 = vshll.u32 %v1449_v0, 8  ;;  %v1326_v14 = vadd.s32 3, %v1322_v4 }
 0x30a   : > { %v1600_v55 = vmul.u32 %v6039_v1, %v1584_v40  ;;  %v6108_v16 = vadd.f32 %v5679_v49, %v964_v3  ;;  %v6112_v17 = vadd.f32 %v6050_v61, %v6020_v13  ;;  %vm1602_vm8 = vc.u32 %v6089_v38, %v6097_v62 }
 0x30b   : > { %v1312_v9 = vor.u32 4788187, %v1311_v32  ;;  %v1456_v63 = vsub.s32 32, %v1455_v53  ;;  %vm1473_vm9 = vcmp.lt.s32.totalorder %v6101_v43, 1  ;;  %v1315_v41 = vcvt.s32.f32 %v1308_v45 }
 0x30c   : > { %v1603_v0 = vadd.s32 1, %v6098_v11  ;;  %v1458_v4 = vshll.u32 %v8579_v8, %v1455_v53  ;;  %v1461_v1 = vshll.u32 %v8580_v19, %v1455_v53  ;;  %v1464_v61 = vshll.u32 %v8581_v28, %v1455_v53 }
 0x30d   : > { %v1313_v49 = vand.u32 2147483647, %v1312_v9  ;;  %v1459_v3 = vshrl.u32 %v8580_v19, %v1456_v63  ;;  %v1462_v13 = vshrl.u32 %v8581_v28, %v1456_v63  ;;  %v1465_v37 = vshrl.u32 %v8582_v18, %v1456_v63 }
 0x30e   : > { %v1604_v34 = vsel %vm1602_vm8, %v1603_v0, %v6098_v11  ;;  %v1467_v23 = vshll.u32 %v8582_v18, %v1455_v53  ;;  %v1468_v46 = vshrl.u32 %v8583_v15, %v1456_v63  ;;  %v1470_v21 = vshll.u32 %v8583_v15, %v1455_v53 }
 0x30f   : > { %v1316_v40 = vmul.f32 %v1315_v41, %v1313_v49  ;;  %v1605_v22 = vadd.s32 %v1604_v34, %v1600_v55  ;;  %v1460_v5 = vor.u32 %v1459_v3, %v1458_v4  ;;  %v1463_v2 = vor.u32 %v1462_v13, %v1461_v1 }
 0x310   : > { %v1466_v42 = vor.u32 %v1465_v37, %v1464_v61  ;;  %v1469_v52 = vor.u32 %v1468_v46, %v1467_v23  ;;  %v1471_v12 = vshrl.u32 %v8584_v47, %v1456_v63  ;;  %vm1474_vm10 = vcmp.lt.s32.totalorder %v6101_v43, 2 }
 0x311   : > { %v1317_v36 = vxor.u32 2147483648, %v1316_v40  ;;  %v1606_v25 = vadd.s32 536870912, %v1605_v22  ;;  %vm1476_vm11 = vcmp.lt.s32.totalorder %v6101_v43, 4  ;;  %vm1475_vm14 = vcmp.lt.s32.totalorder %v6101_v43, 3  ;;  %v6193_v43 = vld [vmem:[%s8518_s5] ss:$0 sm:$0xff] }
 0x312   : > { %v1472_v39 = vor.u32 %v1471_v12, %v1470_v21  ;;  %v1481_v26 = vsel %vm1473_vm9, %v1460_v5, %v1463_v2  ;;  %v1482_v44 = vsel %vm1476_vm11, %v1469_v52, 920167782  ;;  %v1457_v7 = vshrl.u32 %v8579_v8, %v1456_v63 }
 0x313   : > { %v1318_v6 = vsel %vm1235_vm12, %v1317_v36, %v1316_v40  ;;  %v1607_v50 = vshrl.u32 %v1606_v25, 30  ;;  %v1483_v24 = vsel %vm1475_vm14, %v1466_v42, %v1482_v44  ;;  %v1478_v45 = vsel %vm1476_vm11, %v1466_v42, 2102212464 }
 0x314   : > { %v1321_v11 = vsel %vm6030_vm13, %v5782_v51, %v1318_v6  ;;  %v1484_v32 = vsel %vm1474_vm10, %v1481_v26, %v1483_v24  ;;  %v1485_v53 = vsel %vm1473_vm9, %v1463_v2, %v1466_v42  ;;  %v1486_v63 = vsel %vm1476_vm11, %v1472_v39, 1326507024 }
 0x315   : > { %4965 = vcosq.f32 %v1321_v11  ;;  %v1608_v55 = vshll.u32 %v1607_v50, 30  ;;  %v1631_v9 = vsub.s32 4, %v1607_v50  ;;  %v1487_v60 = vsel %vm1475_vm14, %v1469_v52, %v1486_v63 }
 0x316   : > { %4967 = vsinq.f32 %v1321_v11  ;;  %v6155_v41 = vmul.u32.u64.low %v6104_v20, %v1484_v32  ;;  %v6156_v0 = vmul.u32.u64.high %v6104_v20, %v1484_v32, %v6155_v41  ;;  %v1477_v1 = vsel %vm1473_vm9, %v1457_v7, %v1460_v5 }
 0x317   : > { %v6159_v4 = vsub.s32 %v1605_v22, %v1608_v55  ;;  %v1479_v49 = vsel %vm1475_vm14, %v1463_v2, %v1478_v45  ;;  %v1488_v3 = vsel %vm1474_vm10, %v1485_v53, %v1487_v60  ;;  %v1327_v34 = vand.u32 3, %v1326_v14  ;;  %v6184_v14 = vld [vmem:[%s8518_s5 + $0x2] ss:$0 sm:$0xff] }
 0x318   : > { %v6168_v13 = vmul.u32.u64.low %v6104_v20, %v1488_v3  ;;  %v6169_v61 = vmul.u32.u64.high %v6104_v20, %v1488_v3, %v6168_v13  ;;  %vm1547_vm12 = vcmp.lt.s32.totalorder %v5901_v54, 0  ;;  %v1756_v23 = vand.u32 2139095040, %v6108_v16 }
 0x319   : > { %v1611_v37 = vsub.s32 0, %v6159_v4  ;;  %v1632_v46 = vsel %vm1547_vm12, %v1631_v9, %v1607_v50  ;;  %v1480_v40 = vsel %vm1474_vm10, %v1477_v1, %v1479_v49  ;;  %v1499_v22 = vadd.s32 1, %v6156_v0 }
 0x31a   : > { %v1753_v5 = vand.u32 2147483647, %v6108_v16  ;;  %v1757_v42 = vshrl.u32 %v1756_v23, 23  ;;  %v6188_v52 = vadd.f32 %v6184_v14, %v6112_v17  ;;  %v6197_v21 = vmul.f32 %v6193_v43, %v5592_v56 }
 0x31b   : > { %v4592_v2 = vmin.u32 %v1611_v37, %v6159_v4  ;;  %vm1325_vm13 = vweird.f32 %v5782_v51  ;;  %vm6202_vm15 = vcmp.le.f32.partialorder %v1545_v48, 0.7853982  ;;  %vm1498_vm0 = vc.u32 %v6169_v61, %v6155_v41 }
 0x31c   : > { %vm1328_vm1 = vcmp.lt.s32.totalorder %v1327_v34, 2  ;;  %v1634_v36 = vsel %vm6202_vm15, 0, %v1632_v46  ;;  %v1496_v25 = vmul.u32 %v6104_v20, %v1480_v40  ;;  %vm1329_vm2 = vcmp.eq.s32.totalorder %v1327_v34, 0 }
 0x31d   : > { %v1613_v17 = vclz %v4592_v2  ;;  %v1500_v56 = vsel %vm1498_vm0, %v1499_v22, %v6156_v0  ;;  %v4599_v39 = vadd.s32 4294967169, %v1757_v42  ;;  %v1760_v48 = vand.u32 8388607, %v1753_v5 }
 0x31e   : > { %vm1332_vm3 = vcmp.eq.s32.totalorder %v1327_v34, 2  ;;  %v1501_v6 = vadd.s32 %v1500_v56, %v1496_v25  ;;  %v1652_v50 = vand.u32 2139095040, %v6188_v52  ;;  %v1601_v11 = vadd.s32 %v6097_v62, %v6089_v38 }
 0x31f   : > { %v4966_v26 = vpop.eup %4965  ;;  %v4593_v44 = vadd.s32 4294967294, %v1613_v17  ;;  %v1638_v45 = vadd.s32 3, %v1634_v36  ;;  %v1763_v20 = vadd.s32 1, %v4599_v39  ;;  %v1761_v60 = vor.u32 8388608, %v1760_v48 }
 0x320   : > { %v4968_v7 = vpop.eup %4967  ;;  %v1333_v24 = vxor.u32 2147483648, %v4966_v26  ;;  %v1502_v53 = vadd.s32 536870912, %v1501_v6  ;;  %v1653_v55 = vshrl.u32 %v1652_v50, 23  ;;  %v1649_v3 = vand.u32 2147483647, %v6188_v52 }
 0x321   : > { %v1330_v32 = vxor.u32 2147483648, %v4968_v7  ;;  %vm4594_vm4 = vcmp.lt.s32.totalorder %v4593_v44, 0  ;;  %vm1764_vm5 = vcmp.gt.s32.totalorder %v1763_v20, 0  ;;  %v6224_v2 = vand.u32 3, %v1638_v45 }
 0x322   : > { %v1334_v9 = vsel %vm1332_vm3, %v1333_v24, %v4968_v7  ;;  %v1616_v63 = vsel %vm4594_vm4, 0, %v4593_v44  ;;  %v1503_v62 = vshrl.u32 %v1502_v53, 30  ;;  %v1765_v37 = vsel %vm1764_vm5, %v1763_v20, 0 }
 0x323   : > { %v1331_v0 = vsel %vm1329_vm2, %v4966_v26, %v1330_v32  ;;  %v1617_v1 = vsub.s32 32, %v1616_v63  ;;  %v1621_v49 = vsub.s32 4294967266, %v1616_v63  ;;  %v1618_v38 = vshll.u32 %v6159_v4, %v1616_v63 }
 0x324   : > { %v1335_v13 = vsel %vm1328_vm1, %v1331_v0, %v1334_v9  ;;  %v4595_v22 = vadd.s32 4294967169, %v1653_v55  ;;  %vm1443_vm6 = vcmp.lt.s32.totalorder %v6001_v10, 0  ;;  %v1504_v42 = vshll.u32 %v1503_v62, 30 }
 0x325   : > { %v1336_v23 = vsel %vm1325_vm13, nan, %v1335_v13  ;;  %v1619_v46 = vshrl.u32 %v1601_v11, %v1617_v1  ;;  %v1622_v40 = vadd.s32 127, %v1621_v49  ;;  %v1767_v17 = vand.u32 31, %v1765_v37 }
 0x326   : > { %4355 = vst [vmem:[%s5975_s9 + $0x10] sm:$0xff] %v1336_v23  ;;  %v1497_v4 = vadd.s32 %v6155_v41, %v6169_v61  ;;  %v6229_v25 = vshll.u32 %v1761_v60, 8  ;;  %v6231_v56 = vsub.s32 %v1501_v6, %v1504_v42  ;;  %v6233_v51 = vshrl.u32 %v1765_v37, 5 }
 0x327   : > { %v1620_v36 = vor.u32 %v1619_v46, %v1618_v38  ;;  %v1623_v34 = vshll.u32 %v1622_v40, 23  ;;  %v1768_v39 = vsub.s32 32, %v1767_v17  ;;  %v6237_v48 = vand.u32 8388607, %v1649_v3 }
 0x328   : > { %v1527_v44 = vsub.s32 4, %v1503_v62  ;;  %v1770_v50 = vshll.u32 %v8579_v8, %v1767_v17  ;;  %v1659_v7 = vadd.s32 1, %v4595_v22  ;;  %vm6242_vm7 = vcmp.le.f32.partialorder %v1441_v35, 0.7853982 }
 0x329   : > { %v1624_v26 = vor.u32 4788187, %v1623_v34  ;;  %v1627_v24 = vcvt.s32.f32 %v1620_v36  ;;  %v1507_v61 = vsub.s32 0, %v6231_v56  ;;  %v1771_v6 = vshrl.u32 %v8580_v19, %v1768_v39 }
 0x32a   : > { %v1773_v11 = vshll.u32 %v8580_v19, %v1767_v17  ;;  %v1774_v20 = vshrl.u32 %v8581_v28, %v1768_v39  ;;  %v1776_v32 = vshll.u32 %v8581_v28, %v1767_v17  ;;  %v1777_v53 = vshrl.u32 %v8582_v18, %v1768_v39 }
 0x32b   : > { %v1625_v45 = vand.u32 2147483647, %v1624_v26  ;;  %v4588_v55 = vmin.u32 %v1507_v61, %v6231_v56  ;;  %v1772_v9 = vor.u32 %v1771_v6, %v1770_v50  ;;  %v1779_v35 = vshll.u32 %v8582_v18, %v1767_v17 }
 0x32c   : > { %vm1785_vm8 = vcmp.lt.s32.totalorder %v6233_v51, 1  ;;  %v1775_v60 = vor.u32 %v1774_v20, %v1773_v11  ;;  %v1778_v0 = vor.u32 %v1777_v53, %v1776_v32  ;;  %v1780_v1 = vshrl.u32 %v8583_v15, %v1768_v39 }
 0x32d   : > { %v1628_v63 = vmul.f32 %v1627_v24, %v1625_v45  ;;  %v1509_v49 = vclz %v4588_v55  ;;  %v1528_v13 = vsel %vm1443_vm6, %v1527_v44, %v1503_v62  ;;  %v1769_v38 = vshrl.u32 %v8579_v8, %v1768_v39 }
 0x32e   : > { %vm1786_vm9 = vcmp.lt.s32.totalorder %v6233_v51, 2  ;;  %v1781_v23 = vor.u32 %v1780_v1, %v1779_v35  ;;  %v1782_v46 = vshll.u32 %v8583_v15, %v1767_v17  ;;  %v1783_v40 = vshrl.u32 %v8584_v47, %v1768_v39 }
 0x32f   : > { %v1629_v37 = vxor.u32 2147483648, %v1628_v63  ;;  %v4589_v22 = vadd.s32 4294967294, %v1509_v49  ;;  %vm1787_vm10 = vcmp.lt.s32.totalorder %v6233_v51, 3  ;;  %vm1788_vm11 = vcmp.lt.s32.totalorder %v6233_v51, 4  ;;  %v6311_v51 = vld [vmem:[%s8518_s5 + $0x1] ss:$0 sm:$0xff] }
 0x330   : > { %v1789_v42 = vsel %vm1785_vm8, %v1769_v38, %v1772_v9  ;;  %v1784_v36 = vor.u32 %v1783_v40, %v1782_v46  ;;  %v1790_v34 = vsel %vm1788_vm11, %v1778_v0, 2102212464  ;;  %v1793_v17 = vsel %vm1785_vm8, %v1772_v9, %v1775_v60 }
 0x331   : > { %v1630_v62 = vsel %vm1547_vm12, %v1629_v37, %v1628_v63  ;;  %vm4590_vm14 = vcmp.lt.s32.totalorder %v4589_v22, 0  ;;  %v1791_v26 = vsel %vm1787_vm10, %v1775_v60, %v1790_v34  ;;  %v1794_v44 = vsel %vm1788_vm11, %v1781_v23, 920167782  ;;  %v799_v63 = vpop.permute.xlu1 %798 }
 0x332   : > { %v1633_v39 = vsel %vm6202_vm15, %v5901_v54, %v1630_v62  ;;  %v1512_v50 = vsel %vm4590_vm14, 0, %v4589_v22  ;;  %v1530_v24 = vsel %vm6242_vm7, 0, %v1528_v13  ;;  %v1795_v61 = vsel %vm1787_vm10, %v1778_v0, %v1794_v44 }
 0x333   : > { %4969 = vcosq.f32 %v1633_v39  ;;  %v1513_v6 = vsub.s32 32, %v1512_v50  ;;  %v1517_v11 = vsub.s32 4294967266, %v1512_v50  ;;  %v1792_v12 = vsel %vm1786_vm9, %v1789_v42, %v1791_v26 }
 0x334   : > { %4971 = vsinq.f32 %v1633_v39  ;;  %v1514_v45 = vshll.u32 %v6231_v56, %v1512_v50  ;;  %v1796_v20 = vsel %vm1786_vm9, %v1793_v17, %v1795_v61  ;;  %v1797_v32 = vsel %vm1785_vm8, %v1775_v60, %v1778_v0 }
 0x335   : > { %v1798_v53 = vsel %vm1788_vm11, %v1784_v36, 1326507024  ;;  %v1515_v55 = vshrl.u32 %v1497_v4, %v1513_v6  ;;  %v1518_v9 = vadd.s32 127, %v1517_v11  ;;  %vm1660_vm12 = vcmp.gt.s32.totalorder %v1659_v7, 0 }
 0x336   : > { %v1799_v35 = vsel %vm1787_vm10, %v1781_v23, %v1798_v53  ;;  %v6297_v56 = vmul.u32.u64.low %v6229_v25, %v1796_v20  ;;  %v6298_v49 = vmul.u32.u64.high %v6229_v25, %v1796_v20, %v6297_v56  ;;  %v1661_v13 = vsel %vm1660_vm12, %v1659_v7, 0 }
 0x337   : > { %v1800_v1 = vsel %vm1786_vm9, %v1797_v32, %v1799_v35  ;;  %v1516_v60 = vor.u32 %v1515_v55, %v1514_v45  ;;  %v1519_v0 = vshll.u32 %v1518_v9, 23  ;;  %v722_v37 = vmul.f32 %v6193_v43, %v5632_v27 }
 0x338   : > { %v6302_v38 = vmul.u32.u64.low %v6229_v25, %v1800_v1  ;;  %v6303_v4 = vmul.u32.u64.high %v6229_v25, %v1800_v1, %v6302_v38  ;;  %vm1640_vm13 = vcmp.lt.s32.totalorder %v6224_v2, 2  ;;  %v1663_v23 = vand.u32 31, %v1661_v13 }
 0x339   : > { %v934_v46 = vmul.f32 %v6311_v51, %v799_v63  ;;  %vm1637_vm15 = vweird.f32 %v5901_v54  ;;  %vm1641_vm0 = vcmp.eq.s32.totalorder %v6224_v2, 0  ;;  %vm1644_vm1 = vcmp.eq.s32.totalorder %v6224_v2, 2 }
 0x33a   : > { %v1520_v7 = vor.u32 4788187, %v1519_v0  ;;  %v1657_v40 = vor.u32 8388608, %v6237_v48  ;;  %v1534_v27 = vadd.s32 3, %v1530_v24  ;;  %v1808_v22 = vmul.u32 %v6229_v25, %v1792_v12 }
 0x33b   : > { %v1811_v42 = vadd.s32 1, %v6298_v49  ;;  %v1664_v62 = vsub.s32 32, %v1663_v23  ;;  %v1523_v34 = vcvt.s32.f32 %v1516_v60  ;;  %vm1810_vm2 = vc.u32 %v6303_v4, %v6297_v56 }
 0x33c   : > { %v1521_v36 = vand.u32 2147483647, %v1520_v7  ;;  %v1666_v17 = vshll.u32 %v8579_v8, %v1663_v23  ;;  %v1669_v48 = vshll.u32 %v8580_v19, %v1663_v23  ;;  %v1662_v45 = vshrl.u32 %v1661_v13, 5 }
 0x33d   : > { %v4970_v39 = vpop.eup %4969  ;;  %v1812_v26 = vsel %vm1810_vm2, %v1811_v42, %v6298_v49  ;;  %v1667_v44 = vshrl.u32 %v8580_v19, %v1664_v62  ;;  %v1670_v50 = vshrl.u32 %v8581_v28, %v1664_v62  ;;  %v1673_v11 = vshrl.u32 %v8582_v18, %v1664_v62 }
 0x33e   : > { %v4972_v25 = vpop.eup %4971  ;;  %v1645_v24 = vxor.u32 2147483648, %v4970_v39  ;;  %v1524_v61 = vmul.f32 %v1523_v34, %v1521_v36  ;;  %v1813_v6 = vadd.s32 %v1812_v26, %v1808_v22  ;;  %v1672_v32 = vshll.u32 %v8581_v28, %v1663_v23 }
 0x33f   : > { %v1642_v12 = vxor.u32 2147483648, %v4972_v25  ;;  %v1668_v20 = vor.u32 %v1667_v44, %v1666_v17  ;;  %v1671_v35 = vor.u32 %v1670_v50, %v1669_v48  ;;  %v1675_v1 = vshll.u32 %v8582_v18, %v1663_v23  ;;  %v795_v50 = vpop.permute.xlu0 %794 }
 0x340   : > { %v1646_v53 = vsel %vm1644_vm1, %v1645_v24, %v4972_v25  ;;  %v1525_v55 = vxor.u32 2147483648, %v1524_v61  ;;  %v1814_v9 = vadd.s32 536870912, %v1813_v6  ;;  %v1676_v49 = vshrl.u32 %v8583_v15, %v1664_v62 }
 0x341   : > { %v1643_v63 = vsel %vm1641_vm0, %v4970_v39, %v1642_v12  ;;  %v1679_v60 = vshrl.u32 %v8584_v47, %v1664_v62  ;;  %v1674_v7 = vor.u32 %v1673_v11, %v1672_v32  ;;  %v1678_v34 = vshll.u32 %v8583_v15, %v1663_v23 }
 0x342   : > { %v1647_v13 = vsel %vm1640_vm13, %v1643_v63, %v1646_v53  ;;  %v1526_v0 = vsel %vm1443_vm6, %v1525_v55, %v1524_v61  ;;  %v1815_v38 = vshrl.u32 %v1814_v9, 30  ;;  %v1677_v36 = vor.u32 %v1676_v49, %v1675_v1 }
 0x343   : > { %v1648_v22 = vsel %vm1637_vm15, nan, %v1647_v13  ;;  %v1529_v42 = vsel %vm6242_vm7, %v6001_v10, %v1526_v0  ;;  %v6347_v17 = vand.u32 3, %v1534_v27  ;;  %v6349_v39 = vshll.u32 %v1657_v40, 8 }
 0x344   : > { %4358 = vst [vmem:[%s5975_s9 + $0x28] sm:$0xff] %v1648_v22  ;;  %4973 = vcosq.f32 %v1529_v42  ;;  %v1816_v2 = vshll.u32 %v1815_v38, 30  ;;  %v1680_v26 = vor.u32 %v1679_v60, %v1678_v34  ;;  %vm1681_vm3 = vcmp.lt.s32.totalorder %v1662_v45, 1 }
 0x345   : > { %4975 = vsinq.f32 %v1529_v42  ;;  %v966_v44 = vadd.f32 %v934_v46, %v722_v37  ;;  %v1665_v48 = vshrl.u32 %v8579_v8, %v1664_v62  ;;  %vm1684_vm4 = vcmp.lt.s32.totalorder %v1662_v45, 4 }
 0x346   : > { %v6351_v54 = vsub.s32 %v1813_v6, %v1816_v2  ;;  %v1689_v41 = vsel %vm1681_vm3, %v1668_v20, %v1671_v35  ;;  %v1839_v25 = vsub.s32 4, %v1815_v38  ;;  %vm1683_vm5 = vcmp.lt.s32.totalorder %v1662_v45, 3 }
 0x347   : > { %v1686_v23 = vsel %vm1684_vm4, %v1674_v7, 2102212464  ;;  %v1690_v24 = vsel %vm1684_vm4, %v1677_v36, 920167782  ;;  %vm1682_vm6 = vcmp.lt.s32.totalorder %v1662_v45, 2  ;;  %v1693_v61 = vsel %vm1681_vm3, %v1671_v35, %v1674_v7 }
 0x348   : > { %v1819_v27 = vsub.s32 0, %v6351_v54  ;;  %v1691_v40 = vsel %vm1683_vm5, %v1674_v7, %v1690_v24  ;;  %v1685_v11 = vsel %vm1681_vm3, %v1665_v48, %v1668_v20  ;;  %v1694_v37 = vsel %vm1684_vm4, %v1680_v26, 1326507024 }
 0x349   : > { %v1692_v12 = vsel %vm1682_vm6, %v1689_v41, %v1691_v40  ;;  %v933_v46 = vmul.f32 %v6311_v51, %v795_v50  ;;  %v1687_v6 = vsel %vm1683_vm5, %v1671_v35, %v1686_v23  ;;  %v1695_v32 = vsel %vm1683_vm5, %v1677_v36, %v1694_v37 }
 0x34a   : > { %v4600_v62 = vmin.u32 %v1819_v27, %v6351_v54  ;;  %v6359_v53 = vadd.f32 %v6184_v14, %v966_v44  ;;  %vm1533_vm7 = vweird.f32 %v6001_v10  ;;  %vm1755_vm8 = vcmp.lt.s32.totalorder %v6108_v16, 0 }
 0x34b   : > { %v1696_v55 = vsel %vm1682_vm6, %v1693_v61, %v1695_v32  ;;  %v6365_v20 = vmul.u32.u64.low %v6349_v39, %v1692_v12  ;;  %v6366_v9 = vmul.u32.u64.high %v6349_v39, %v1692_v12, %v6365_v20  ;;  %vm1536_vm9 = vcmp.lt.s32.totalorder %v6347_v17, 2 }
 0x34c   : > { %vm6371_vm10 = vcmp.le.f32.partialorder %v1753_v5, 0.7853982  ;;  %v1821_v63 = vclz %v4600_v62  ;;  %v1840_v1 = vsel %vm1755_vm8, %v1839_v25, %v1815_v38  ;;  %vm1537_vm11 = vcmp.eq.s32.totalorder %v6347_v17, 0 }
 0x34d   : > { %v1688_v49 = vsel %vm1682_vm6, %v1685_v11, %v1687_v6  ;;  %v6380_v60 = vmul.u32.u64.low %v6349_v39, %v1696_v55  ;;  %v6381_v13 = vmul.u32.u64.high %v6349_v39, %v1696_v55, %v6380_v60  ;;  %vm1540_vm14 = vcmp.eq.s32.totalorder %v6347_v17, 2 }
 0x34e   : > { %v4974_v0 = vpop.eup %4973  ;;  %v4601_v7 = vadd.s32 4294967294, %v1821_v63  ;;  %v1964_v5 = vand.u32 2139095040, %v6359_v53  ;;  %v965_v22 = vadd.f32 %v933_v46, %v6197_v21  ;;  %v1809_v38 = vadd.s32 %v6297_v56, %v6303_v4 }
 0x34f   : > { %v4976_v42 = vpop.eup %4975  ;;  %v1541_v36 = vxor.u32 2147483648, %v4974_v0  ;;  %v1842_v45 = vsel %vm6371_vm10, 0, %v1840_v1  ;;  %v1707_v34 = vadd.s32 1, %v6366_v9  ;;  %v1704_v26 = vmul.u32 %v6349_v39, %v1688_v49 }
 0x350   : > { %v1538_v2 = vxor.u32 2147483648, %v4976_v42  ;;  %vm4602_vm12 = vcmp.lt.s32.totalorder %v4601_v7, 0  ;;  %v1965_v44 = vshrl.u32 %v1964_v5, 23  ;;  %vm1706_vm13 = vc.u32 %v6381_v13, %v6365_v20 }
 0x351   : > { %v1542_v48 = vsel %vm1540_vm14, %v1541_v36, %v4976_v42  ;;  %v1824_v41 = vsel %vm4602_vm12, 0, %v4601_v7  ;;  %v1961_v21 = vand.u32 2147483647, %v6359_v53  ;;  %v6397_v25 = vadd.f32 %v6184_v14, %v965_v22 }
 0x352   : > { %v1539_v56 = vsel %vm1537_vm11, %v4974_v0, %v1538_v2  ;;  %v1825_v4 = vsub.s32 32, %v1824_v41  ;;  %v1829_v50 = vsub.s32 4294967266, %v1824_v41  ;;  %v1826_v39 = vshll.u32 %v6351_v54, %v1824_v41 }
 0x353   : > { %v1543_v23 = vsel %vm1536_vm9, %v1539_v56, %v1542_v48  ;;  %v1708_v24 = vsel %vm1706_vm13, %v1707_v34, %v6366_v9  ;;  %v4607_v27 = vadd.s32 4294967169, %v1965_v44  ;;  %v1846_v32 = vadd.s32 3, %v1842_v45 }
 0x354   : > { %v1544_v40 = vsel %vm1533_vm7, nan, %v1543_v23  ;;  %v1827_v61 = vshrl.u32 %v1809_v38, %v1825_v4  ;;  %v1830_v11 = vadd.s32 127, %v1829_v50  ;;  %v1709_v12 = vadd.s32 %v1708_v24, %v1704_v26 }
 0x355   : > { %4357 = vst [vmem:[%s5975_s9 + $0x20] sm:$0xff] %v1544_v40  ;;  %v1971_v37 = vadd.s32 1, %v4607_v27  ;;  %v1968_v17 = vand.u32 8388607, %v1961_v21  ;;  %v1860_v10 = vand.u32 2139095040, %v6397_v25  ;;  %v6413_v1 = vmul.f32 %v6193_v43, %v5594_v57 }
 0x356   : > { %v1828_v46 = vor.u32 %v1827_v61, %v1826_v39  ;;  %v1831_v62 = vshll.u32 %v1830_v11, 23  ;;  %v1710_v6 = vadd.s32 536870912, %v1709_v12  ;;  %v6418_v7 = vmul.f32 %v6193_v43, %v5635_v29 }
 0x357   : > { %vm1972_vm15 = vcmp.gt.s32.totalorder %v1971_v37, 0  ;;  %v6420_v5 = vand.u32 3, %v1846_v32  ;;  %v1969_v22 = vor.u32 8388608, %v1968_v17  ;;  %v1705_v38 = vadd.s32 %v6365_v20, %v6381_v13 }
 0x358   : > { %v1832_v54 = vor.u32 4788187, %v1831_v62  ;;  %v6408_v55 = vshrl.u32 %v1710_v6, 30  ;;  %v1973_v9 = vsel %vm1972_vm15, %v1971_v37, 0  ;;  %v1835_v60 = vcvt.s32.f32 %v1828_v46 }
 0x359   : > { %v1975_v63 = vand.u32 31, %v1973_v9  ;;  %v1861_v34 = vshrl.u32 %v1860_v10, 23  ;;  %v6425_v57 = vshrl.u32 %v1973_v9, 5  ;;  %v6444_v46 = vshll.u32 %v1969_v22, 8 }
 0x35a   : > { %v1833_v49 = vand.u32 2147483647, %v1832_v54  ;;  %v1712_v0 = vshll.u32 %v6408_v55, 30  ;;  %v1735_v6 = vsub.s32 4, %v6408_v55  ;;  %vm1651_vm0 = vcmp.lt.s32.totalorder %v6188_v52, 0 }
 0x35b   : > { %v1976_v42 = vsub.s32 32, %v1975_v63  ;;  %v1978_v2 = vshll.u32 %v8579_v8, %v1975_v63  ;;  %v1981_v41 = vshll.u32 %v8580_v19, %v1975_v63  ;;  %v1984_v20 = vshll.u32 %v8581_v28, %v1975_v63 }
 0x35c   : > { %v1836_v36 = vmul.f32 %v1835_v60, %v1833_v49  ;;  %v6423_v45 = vsub.s32 %v1709_v12, %v1712_v0  ;;  %v1987_v13 = vshll.u32 %v8582_v18, %v1975_v63  ;;  %v1990_v27 = vshll.u32 %v8583_v15, %v1975_v63 }
 0x35d   : > { %v1979_v26 = vshrl.u32 %v8580_v19, %v1976_v42  ;;  %v1982_v44 = vshrl.u32 %v8581_v28, %v1976_v42  ;;  %v1985_v56 = vshrl.u32 %v8582_v18, %v1976_v42  ;;  %v1988_v50 = vshrl.u32 %v8583_v15, %v1976_v42 }
 0x35e   : > { %v1837_v29 = vxor.u32 2147483648, %v1836_v36  ;;  %v1715_v48 = vsub.s32 0, %v6423_v45  ;;  %v1991_v12 = vshrl.u32 %v8584_v47, %v1976_v42  ;;  %v4603_v62 = vadd.s32 4294967169, %v1861_v34 }
 0x35f   : > { %v1980_v4 = vor.u32 %v1979_v26, %v1978_v2  ;;  %v1983_v24 = vor.u32 %v1982_v44, %v1981_v41  ;;  %v1986_v61 = vor.u32 %v1985_v56, %v1984_v20  ;;  %v1989_v11 = vor.u32 %v1988_v50, %v1987_v13 }
 0x360   : > { %v1838_v23 = vsel %vm1755_vm8, %v1837_v29, %v1836_v36  ;;  %v4596_v39 = vmin.u32 %v1715_v48, %v6423_v45  ;;  %v1977_v32 = vshrl.u32 %v8579_v8, %v1976_v42  ;;  %v1992_v17 = vor.u32 %v1991_v12, %v1990_v27 }
 0x361   : > { %v1841_v40 = vsel %vm6371_vm10, %v6108_v16, %v1838_v23  ;;  %vm1993_vm1 = vcmp.lt.s32.totalorder %v6425_v57, 1  ;;  %vm1995_vm2 = vcmp.lt.s32.totalorder %v6425_v57, 3  ;;  %vm1996_vm3 = vcmp.lt.s32.totalorder %v6425_v57, 4 }
 0x362   : > { %4977 = vcosq.f32 %v1841_v40  ;;  %v1717_v37 = vclz %v4596_v39  ;;  %v1998_v35 = vsel %vm1996_vm3, %v1986_v61, 2102212464  ;;  %v2001_v9 = vsel %vm1993_vm1, %v1980_v4, %v1983_v24 }
 0x363   : > { %4979 = vsinq.f32 %v1841_v40  ;;  %v2002_v10 = vsel %vm1996_vm3, %v1989_v11, 920167782  ;;  %v2005_v63 = vsel %vm1993_vm1, %v1983_v24, %v1986_v61  ;;  %vm1994_vm5 = vcmp.lt.s32.totalorder %v6425_v57, 2 }
 0x364   : > { %v4597_v54 = vadd.s32 4294967294, %v1717_v37  ;;  %v2003_v49 = vsel %vm1995_vm2, %v1986_v61, %v2002_v10  ;;  %v2006_v60 = vsel %vm1996_vm3, %v1992_v17, 1326507024  ;;  %v1997_v22 = vsel %vm1993_vm1, %v1977_v32, %v1980_v4  ;;  %v810_v4 = vpop.permute.xlu1 %809 }
 0x365   : > { %v2004_v42 = vsel %vm1994_vm5, %v2001_v9, %v2003_v49  ;;  %v2007_v36 = vsel %vm1995_vm2, %v1989_v11, %v2006_v60  ;;  %vm1848_vm6 = vcmp.lt.s32.totalorder %v6420_v5, 2  ;;  %vm6462_vm7 = vcmp.le.f32.partialorder %v1649_v3, 0.7853982 }
 0x366   : > { %vm4598_vm4 = vcmp.lt.s32.totalorder %v4597_v54, 0  ;;  %v1999_v44 = vsel %vm1995_vm2, %v1983_v24, %v1998_v35  ;;  %v2008_v29 = vsel %vm1994_vm5, %v2005_v63, %v2007_v36  ;;  %vm1845_vm8 = vweird.f32 %v6108_v16 }
 0x367   : > { %v1720_v0 = vsel %vm4598_vm4, 0, %v4597_v54  ;;  %v6472_v48 = vmul.u32.u64.low %v6444_v46, %v2008_v29  ;;  %v6473_v41 = vmul.u32.u64.high %v6444_v46, %v2008_v29, %v6472_v48  ;;  %v1867_v23 = vadd.s32 1, %v4603_v62 }
 0x368   : > { %v1721_v2 = vsub.s32 32, %v1720_v0  ;;  %v1725_v26 = vsub.s32 4294967266, %v1720_v0  ;;  %v6476_v56 = vmul.u32.u64.low %v6444_v46, %v2004_v42  ;;  %v6477_v3 = vmul.u32.u64.high %v6444_v46, %v2004_v42, %v6476_v56 }
 0x369   : > { %v1722_v20 = vshll.u32 %v6423_v45, %v1720_v0  ;;  %vm1849_vm9 = vcmp.eq.s32.totalorder %v6420_v5, 0  ;;  %vm1852_vm10 = vcmp.eq.s32.totalorder %v6420_v5, 2  ;;  %v2000_v39 = vsel %vm1994_vm5, %v1997_v22, %v1999_v44 }
 0x36a   : > { %v1723_v13 = vshrl.u32 %v1705_v38, %v1721_v2  ;;  %v1726_v50 = vadd.s32 127, %v1725_v26  ;;  %v1857_v24 = vand.u32 2147483647, %v6397_v25  ;;  %vm1868_vm11 = vcmp.gt.s32.totalorder %v1867_v23, 0 }
 0x36b   : > { %v936_v11 = vmul.f32 %v6311_v51, %v810_v4  ;;  %v1736_v38 = vsel %vm1651_vm0, %v1735_v6, %v6408_v55  ;;  %vm2018_vm14 = vc.u32 %v6473_v41, %v6476_v56  ;;  %v2019_v57 = vadd.s32 1, %v6477_v3 }
 0x36c   : > { %v4978_v27 = vpop.eup %4977  ;;  %v1724_v40 = vor.u32 %v1723_v13, %v1722_v20  ;;  %v1727_v61 = vshll.u32 %v1726_v50, 23  ;;  %v2016_v32 = vmul.u32 %v6444_v46, %v2000_v39  ;;  %v1869_v17 = vsel %vm1868_vm11, %v1867_v23, 0 }
 0x36d   : > { %v4980_v12 = vpop.eup %4979  ;;  %v1853_v45 = vxor.u32 2147483648, %v4978_v27  ;;  %v2020_v35 = vsel %vm2018_vm14, %v2019_v57, %v6477_v3  ;;  %v1864_v9 = vand.u32 8388607, %v1857_v24  ;;  %v1871_v55 = vand.u32 31, %v1869_v17 }
 0x36e   : > { %v1850_v37 = vxor.u32 2147483648, %v4980_v12  ;;  %v1728_v62 = vor.u32 4788187, %v1727_v61  ;;  %v1731_v63 = vcvt.s32.f32 %v1724_v40  ;;  %v2021_v49 = vadd.s32 %v2020_v35, %v2016_v32 }
 0x36f   : > { %v1854_v54 = vsel %vm1852_vm10, %v1853_v45, %v4980_v12  ;;  %v1738_v60 = vsel %vm6462_vm7, 0, %v1736_v38  ;;  %v1872_v0 = vsub.s32 32, %v1871_v55  ;;  %v968_v22 = vadd.f32 %v936_v11, %v6418_v7 }
 0x370   : > { %v1851_v6 = vsel %vm1849_vm9, %v4978_v27, %v1850_v37  ;;  %v1729_v10 = vand.u32 2147483647, %v1728_v62  ;;  %v2022_v2 = vadd.s32 536870912, %v2021_v49  ;;  %v1874_v26 = vshll.u32 %v8579_v8, %v1871_v55 }
 0x371   : > { %v1855_v46 = vsel %vm1848_vm6, %v1851_v6, %v1854_v54  ;;  %v1875_v44 = vshrl.u32 %v8580_v19, %v1872_v0  ;;  %v1877_v29 = vshll.u32 %v8580_v19, %v1871_v55  ;;  %v1878_v5 = vshrl.u32 %v8581_v28, %v1872_v0 }
 0x372   : > { %v1856_v42 = vsel %vm1845_vm8, nan, %v1855_v46  ;;  %v1732_v36 = vmul.f32 %v1731_v63, %v1729_v10  ;;  %v1881_v48 = vshrl.u32 %v8582_v18, %v1872_v0  ;;  %v2023_v4 = vshrl.u32 %v2022_v2, 30  ;;  %v806_v2 = vpop.permute.xlu0 %805 }
 0x373   : > { %4360 = vst [vmem:[%s5975_s9 + $0x38] sm:$0xff] %v1856_v42  ;;  %v1880_v7 = vshll.u32 %v8581_v28, %v1871_v55  ;;  %v1884_v16 = vshrl.u32 %v8583_v15, %v1872_v0  ;;  %v1742_v20 = vadd.s32 3, %v1738_v60  ;;  %v1870_v13 = vshrl.u32 %v1869_v17, 5 }
 0x374   : > { %v1733_v3 = vxor.u32 2147483648, %v1732_v36  ;;  %v1876_v50 = vor.u32 %v1875_v44, %v1874_v26  ;;  %v1883_v23 = vshll.u32 %v8582_v18, %v1871_v55  ;;  %v2024_v27 = vshll.u32 %v2023_v4, 30 }
 0x375   : > { %v1879_v40 = vor.u32 %v1878_v5, %v1877_v29  ;;  %v1882_v61 = vor.u32 %v1881_v48, %v1880_v7  ;;  %v1886_v45 = vshll.u32 %v8583_v15, %v1871_v55  ;;  %v1887_v38 = vshrl.u32 %v8584_v47, %v1872_v0 }
 0x376   : > { %v1734_v39 = vsel %vm1651_vm0, %v1733_v3, %v1732_v36  ;;  %v1885_v12 = vor.u32 %v1884_v16, %v1883_v23  ;;  %vm1963_vm12 = vcmp.lt.s32.totalorder %v6359_v53, 0  ;;  %v6525_v57 = vsub.s32 %v2021_v49, %v2024_v27 }
 0x377   : > { %v1737_v11 = vsel %vm6462_vm7, %v6188_v52, %v1734_v39  ;;  %v1865_v37 = vor.u32 8388608, %v1864_v9  ;;  %v6527_v62 = vand.u32 3, %v1742_v20  ;;  %v1888_v32 = vor.u32 %v1887_v38, %v1886_v45 }
 0x378   : > { %4981 = vcosq.f32 %v1737_v11  ;;  %v6530_v17 = vadd.f32 %v6184_v14, %v968_v22  ;;  %vm6534_vm13 = vcmp.le.f32.partialorder %v1961_v21, 0.7853982  ;;  %v2027_v54 = vsub.s32 0, %v6525_v57 }
 0x379   : > { %4983 = vsinq.f32 %v1737_v11  ;;  %v1873_v35 = vshrl.u32 %v8579_v8, %v1872_v0  ;;  %vm1889_vm15 = vcmp.lt.s32.totalorder %v1870_v13, 1  ;;  %vm1892_vm0 = vcmp.lt.s32.totalorder %v1870_v13, 4 }
 0x37a   : > { %vm1891_vm1 = vcmp.lt.s32.totalorder %v1870_v13, 3  ;;  %v1894_v9 = vsel %vm1892_vm0, %v1882_v61, 2102212464  ;;  %v1897_v55 = vsel %vm1889_vm15, %v1876_v50, %v1879_v40  ;;  %v1898_v6 = vsel %vm1892_vm0, %v1885_v12, 920167782 }
 0x37b   : > { %v4608_v10 = vmin.u32 %v2027_v54, %v6525_v57  ;;  %v2047_v63 = vsub.s32 4, %v2023_v4  ;;  %vm1890_vm2 = vcmp.lt.s32.totalorder %v1870_v13, 2  ;;  %v1899_v21 = vsel %vm1891_vm1, %v1882_v61, %v1898_v6 }
 0x37c   : > { %v1900_v49 = vsel %vm1890_vm2, %v1897_v55, %v1899_v21  ;;  %v1901_v46 = vsel %vm1889_vm15, %v1879_v40, %v1882_v61  ;;  %v1902_v60 = vsel %vm1892_vm0, %v1888_v32, 1326507024  ;;  %v1905_v22 = vshll.u32 %v1865_v37, 8 }
 0x37d   : > { %vm1744_vm3 = vcmp.lt.s32.totalorder %v6527_v62, 2  ;;  %vm1745_vm4 = vcmp.eq.s32.totalorder %v6527_v62, 0  ;;  %v2029_v0 = vclz %v4608_v10  ;;  %v1893_v42 = vsel %vm1889_vm15, %v1873_v35, %v1876_v50 }
 0x37e   : > { %v1895_v36 = vsel %vm1891_vm1, %v1879_v40, %v1894_v9  ;;  %vm1741_vm5 = vweird.f32 %v6188_v52  ;;  %vm1748_vm6 = vcmp.eq.s32.totalorder %v6527_v62, 2  ;;  %v1903_v26 = vsel %vm1891_vm1, %v1885_v12, %v1902_v60 }
 0x37f   : > { %v6552_v44 = vmul.u32.u64.low %v1905_v22, %v1900_v49  ;;  %v6553_v29 = vmul.u32.u64.high %v1905_v22, %v1900_v49, %v6552_v44  ;;  %v4609_v5 = vadd.s32 4294967294, %v2029_v0  ;;  %v2048_v48 = vsel %vm1963_vm12, %v2047_v63, %v2023_v4 }
 0x380   : > { %v1904_v3 = vsel %vm1890_vm2, %v1901_v46, %v1903_v26  ;;  %v2172_v7 = vand.u32 2139095040, %v6530_v17  ;;  %v1896_v16 = vsel %vm1890_vm2, %v1893_v42, %v1895_v36  ;;  %v935_v23 = vmul.f32 %v6311_v51, %v806_v2 }
 0x381   : > { %v6560_v20 = vmul.u32.u64.low %v1905_v22, %v1904_v3  ;;  %v6561_v50 = vmul.u32.u64.high %v1905_v22, %v1904_v3, %v6560_v20  ;;  %v2017_v27 = vadd.s32 %v6476_v56, %v6473_v41  ;;  %vm4610_vm7 = vcmp.lt.s32.totalorder %v4609_v5, 0 }
 0x382   : > { %v4982_v39 = vpop.eup %4981  ;;  %v2169_v40 = vand.u32 2147483647, %v6530_v17  ;;  %v2173_v61 = vshrl.u32 %v2172_v7, 23  ;;  %v2032_v12 = vsel %vm4610_vm7, 0, %v4609_v5  ;;  %v2050_v13 = vsel %vm6534_vm13, 0, %v2048_v48 }
 0x383   : > { %v4984_v4 = vpop.eup %4983  ;;  %v1749_v11 = vxor.u32 2147483648, %v4982_v39  ;;  %v1915_v45 = vadd.s32 1, %v6553_v29  ;;  %v2033_v37 = vsub.s32 32, %v2032_v12  ;;  %v2037_v32 = vsub.s32 4294967266, %v2032_v12 }
 0x384   : > { %v1746_v38 = vxor.u32 2147483648, %v4984_v4  ;;  %v1912_v54 = vmul.u32 %v1905_v22, %v1896_v16  ;;  %v2034_v56 = vshll.u32 %v6525_v57, %v2032_v12  ;;  %vm1914_vm8 = vc.u32 %v6561_v50, %v6552_v44 }
 0x385   : > { %v1750_v41 = vsel %vm1748_vm6, %v1749_v11, %v4984_v4  ;;  %v4615_v35 = vadd.s32 4294967169, %v2173_v61  ;;  %v2035_v55 = vshrl.u32 %v2017_v27, %v2033_v37  ;;  %v2038_v6 = vadd.s32 127, %v2037_v32 }
 0x386   : > { %v1747_v9 = vsel %vm1745_vm4, %v4982_v39, %v1746_v38  ;;  %v1916_v10 = vsel %vm1914_vm8, %v1915_v45, %v6553_v29  ;;  %v967_v46 = vadd.f32 %v935_v23, %v6413_v1  ;;  %v2054_v36 = vadd.s32 3, %v2050_v13  ;;  %v821_v1 = vpop.permute.xlu1 %820 }
 0x387   : > { %v1751_v63 = vsel %vm1744_vm3, %v1747_v9, %v1750_v41  ;;  %v1917_v21 = vadd.s32 %v1916_v10, %v1912_v54  ;;  %v2179_v49 = vadd.s32 1, %v4615_v35  ;;  %v2036_v60 = vor.u32 %v2035_v55, %v2034_v56 }
 0x388   : > { %v1752_v57 = vsel %vm1741_vm5, nan, %v1751_v63  ;;  %v2039_v22 = vshll.u32 %v2038_v6, 23  ;;  %v2176_v2 = vand.u32 8388607, %v2169_v40  ;;  %v6588_v5 = vadd.f32 %v6184_v14, %v967_v46 }
 0x389   : > { %4359 = vst [vmem:[%s5975_s9 + $0x30] sm:$0xff] %v1752_v57  ;;  %v1918_v0 = vadd.s32 536870912, %v1917_v21  ;;  %vm2180_vm9 = vcmp.gt.s32.totalorder %v2179_v49, 0  ;;  %v2043_v48 = vcvt.s32.f32 %v2036_v60  ;;  %v6592_v3 = vmul.f32 %v6193_v43, %v5639_v31 }
 0x38a   : > { %v2040_v42 = vor.u32 4788187, %v2039_v22  ;;  %v2181_v26 = vsel %vm2180_vm9, %v2179_v49, 0  ;;  %v6595_v23 = vand.u32 3, %v2054_v36  ;;  %v2177_v39 = vor.u32 8388608, %v2176_v2 }
 0x38b   : > { %v6585_v62 = vshrl.u32 %v1918_v0, 30  ;;  %v2183_v29 = vand.u32 31, %v2181_v26  ;;  %v6598_v27 = vmul.f32 %v6311_v51, %v821_v1  ;;  %v1913_v14 = vadd.s32 %v6552_v44, %v6561_v50 }
 0x38c   : > { %v2041_v52 = vand.u32 2147483647, %v2040_v42  ;;  %v2068_v11 = vand.u32 2139095040, %v6588_v5  ;;  %v2182_v32 = vshrl.u32 %v2181_v26, 5  ;;  %vm1859_vm10 = vcmp.lt.s32.totalorder %v6397_v25, 0 }
 0x38d   : > { %v1920_v7 = vshll.u32 %v6585_v62, 30  ;;  %v2184_v16 = vsub.s32 32, %v2183_v29  ;;  %v2186_v43 = vshll.u32 %v8579_v8, %v2183_v29  ;;  %v2189_v38 = vshll.u32 %v8580_v19, %v2183_v29 }
 0x38e   : > { %v2044_v20 = vmul.f32 %v2043_v48, %v2041_v52  ;;  %v2192_v37 = vshll.u32 %v8581_v28, %v2183_v29  ;;  %v2195_v41 = vshll.u32 %v8582_v18, %v2183_v29  ;;  %v2198_v10 = vshll.u32 %v8583_v15, %v2183_v29 }
 0x38f   : > { %v6601_v61 = vsub.s32 %v1917_v21, %v1920_v7  ;;  %v2187_v4 = vshrl.u32 %v8580_v19, %v2184_v16  ;;  %v2190_v12 = vshrl.u32 %v8581_v28, %v2184_v16  ;;  %v2193_v13 = vshrl.u32 %v8582_v18, %v2184_v16 }
 0x390   : > { %v2045_v31 = vxor.u32 2147483648, %v2044_v20  ;;  %v2196_v44 = vshrl.u32 %v8583_v15, %v2184_v16  ;;  %v2199_v63 = vshrl.u32 %v8584_v47, %v2184_v16  ;;  %v6622_v49 = vshll.u32 %v2177_v39, 8 }
 0x391   : > { %v1923_v45 = vsub.s32 0, %v6601_v61  ;;  %v2188_v54 = vor.u32 %v2187_v4, %v2186_v43  ;;  %v2191_v9 = vor.u32 %v2190_v12, %v2189_v38  ;;  %v2194_v55 = vor.u32 %v2193_v13, %v2192_v37 }
 0x392   : > { %v2046_v50 = vsel %vm1963_vm12, %v2045_v31, %v2044_v20  ;;  %v2197_v6 = vor.u32 %v2196_v44, %v2195_v41  ;;  %v2069_v46 = vshrl.u32 %v2068_v11, 23  ;;  %v1943_v34 = vsub.s32 4, %v6585_v62 }
 0x393   : > { %v2049_v56 = vsel %vm6534_vm13, %v6359_v53, %v2046_v50  ;;  %v4604_v35 = vmin.u32 %v1923_v45, %v6601_v61  ;;  %v2185_v57 = vshrl.u32 %v8579_v8, %v2184_v16  ;;  %v2200_v60 = vor.u32 %v2199_v63, %v2198_v10 }
 0x394   : > { %4985 = vcosq.f32 %v2049_v56  ;;  %vm2201_vm11 = vcmp.lt.s32.totalorder %v2182_v32, 1  ;;  %vm2203_vm14 = vcmp.lt.s32.totalorder %v2182_v32, 3  ;;  %vm2204_vm12 = vcmp.lt.s32.totalorder %v2182_v32, 4 }
 0x395   : > { %4987 = vsinq.f32 %v2049_v56  ;;  %v1925_v21 = vclz %v4604_v35  ;;  %v2209_v0 = vsel %vm2201_vm11, %v2188_v54, %v2191_v9  ;;  %v2206_v42 = vsel %vm2204_vm12, %v2194_v55, 2102212464 }
 0x396   : > { %v2210_v36 = vsel %vm2204_vm12, %v2197_v6, 920167782  ;;  %v2213_v2 = vsel %vm2201_vm11, %v2191_v9, %v2194_v55  ;;  %v2214_v26 = vsel %vm2204_vm12, %v2200_v60, 1326507024  ;;  %vm2057_vm13 = vcmp.eq.s32.totalorder %v6595_v23, 0 }
 0x397   : > { %v4605_v22 = vadd.s32 4294967294, %v1925_v21  ;;  %vm6631_vm15 = vcmp.le.f32.partialorder %v1857_v24, 0.7853982  ;;  %vm2202_vm1 = vcmp.lt.s32.totalorder %v2182_v32, 2  ;;  %v2211_v1 = vsel %vm2203_vm14, %v2194_v55, %v2210_v36 }
 0x398   : > { %v2215_v52 = vsel %vm2203_vm14, %v2197_v6, %v2214_v26  ;;  %vm2056_vm2 = vcmp.lt.s32.totalorder %v6595_v23, 2  ;;  %v2205_v7 = vsel %vm2201_vm11, %v2185_v57, %v2188_v54  ;;  %v2212_v16 = vsel %vm2202_vm1, %v2209_v0, %v2211_v1 }
 0x399   : > { %vm4606_vm0 = vcmp.lt.s32.totalorder %v4605_v22, 0  ;;  %v2216_v20 = vsel %vm2202_vm1, %v2213_v2, %v2215_v52  ;;  %vm2053_vm3 = vweird.f32 %v6359_v53  ;;  %v2207_v4 = vsel %vm2203_vm14, %v2191_v9, %v2206_v42  ;;  %v6679_v2 = vld [vmem:[%s8518_s5 + $0x2] ss:$0 sm:$0xff] }
 0x39a   : > { %v1928_v48 = vsel %vm4606_vm0, 0, %v4605_v22  ;;  %v4611_v11 = vadd.s32 4294967169, %v2069_v46  ;;  %v6644_v31 = vmul.u32.u64.low %v6622_v49, %v2216_v20  ;;  %v6645_v43 = vmul.u32.u64.high %v6622_v49, %v2216_v20, %v6644_v31 }
 0x39b   : > { %v1929_v24 = vsub.s32 32, %v1928_v48  ;;  %v1933_v39 = vsub.s32 4294967266, %v1928_v48  ;;  %v6648_v12 = vmul.u32.u64.low %v6622_v49, %v2212_v16  ;;  %v6649_v13 = vmul.u32.u64.high %v6622_v49, %v2212_v16, %v6648_v12 }
 0x39c   : > { %v1930_v45 = vshll.u32 %v6601_v61, %v1928_v48  ;;  %v2075_v44 = vadd.s32 1, %v4611_v11  ;;  %vm2060_vm4 = vcmp.eq.s32.totalorder %v6595_v23, 2  ;;  %v1944_v54 = vsel %vm1859_vm10, %v1943_v34, %v6585_v62 }
 0x39d   : > { %v1931_v38 = vshrl.u32 %v1913_v14, %v1929_v24  ;;  %v1934_v37 = vadd.s32 127, %v1933_v39  ;;  %v2208_v41 = vsel %vm2202_vm1, %v2205_v7, %v2207_v4  ;;  %v970_v56 = vadd.f32 %v6598_v27, %v6592_v3 }
 0x39e   : > { %v4986_v50 = vpop.eup %4985  ;;  %vm2076_vm5 = vcmp.gt.s32.totalorder %v2075_v44, 0  ;;  %vm2226_vm6 = vc.u32 %v6645_v43, %v6648_v12  ;;  %v2227_v61 = vadd.s32 1, %v6649_v13  ;;  %v2065_v10 = vand.u32 2147483647, %v6588_v5 }
 0x39f   : > { %v4988_v35 = vpop.eup %4987  ;;  %v2061_v9 = vxor.u32 2147483648, %v4986_v50  ;;  %v1932_v55 = vor.u32 %v1931_v38, %v1930_v45  ;;  %v1935_v6 = vshll.u32 %v1934_v37, 23  ;;  %v2224_v32 = vmul.u32 %v6622_v49, %v2208_v41  ;;  %v817_v37 = vpop.permute.xlu0 %816 }
 0x3a0   : > { %v2058_v14 = vxor.u32 2147483648, %v4988_v35  ;;  %v2077_v21 = vsel %vm2076_vm5, %v2075_v44, 0  ;;  %v1946_v27 = vsel %vm6631_vm15, 0, %v1944_v54  ;;  %v2228_v46 = vsel %vm2226_vm6, %v2227_v61, %v6649_v13 }
 0x3a1   : > { %v2062_v63 = vsel %vm2060_vm4, %v2061_v9, %v4988_v35  ;;  %v1936_v62 = vor.u32 4788187, %v1935_v6  ;;  %v2079_v34 = vand.u32 31, %v2077_v21  ;;  %v1939_v22 = vcvt.s32.f32 %v1932_v55 }
 0x3a2   : > { %v2059_v3 = vsel %vm2057_vm13, %v4986_v50, %v2058_v14  ;;  %v2229_v0 = vadd.s32 %v2228_v46, %v2224_v32  ;;  %v2072_v49 = vand.u32 8388607, %v2065_v10  ;;  %v6682_v26 = vadd.f32 %v6679_v2, %v970_v56 }
 0x3a3   : > { %v2063_v57 = vsel %vm2056_vm2, %v2059_v3, %v2062_v63  ;;  %v1937_v60 = vand.u32 2147483647, %v1936_v62  ;;  %v2080_v36 = vsub.s32 32, %v2079_v34  ;;  %v1950_v1 = vadd.s32 3, %v1946_v27 }
 0x3a4   : > { %v2064_v42 = vsel %vm2053_vm3, nan, %v2063_v57  ;;  %v2230_v52 = vadd.s32 536870912, %v2229_v0  ;;  %v2078_v48 = vshrl.u32 %v2077_v21, 5  ;;  %v2082_v53 = vshll.u32 %v8579_v8, %v2079_v34 }
 0x3a5   : > { %4362 = vst [vmem:[%s5975_s9 + $0x48] sm:$0xff] %v2064_v42  ;;  %v1940_v23 = vmul.f32 %v1939_v22, %v1937_v60  ;;  %v2083_v7 = vshrl.u32 %v8580_v19, %v2080_v36  ;;  %v2086_v16 = vshrl.u32 %v8581_v28, %v2080_v36  ;;  %v2089_v20 = vshrl.u32 %v8582_v18, %v2080_v36 }
 0x3a6   : > { %v2231_v39 = vshrl.u32 %v2230_v52, 30  ;;  %v2085_v4 = vshll.u32 %v8580_v19, %v2079_v34  ;;  %v2092_v11 = vshrl.u32 %v8583_v15, %v2080_v36  ;;  %v2088_v31 = vshll.u32 %v8581_v28, %v2079_v34 }
 0x3a7   : > { %v1941_v24 = vxor.u32 2147483648, %v1940_v23  ;;  %v2091_v13 = vshll.u32 %v8582_v18, %v2079_v34  ;;  %v2094_v45 = vshll.u32 %v8583_v15, %v2079_v34  ;;  %v2095_v38 = vshrl.u32 %v8584_v47, %v2080_v36 }
 0x3a8   : > { %v2232_v50 = vshll.u32 %v2231_v39, 30  ;;  %v2084_v54 = vor.u32 %v2083_v7, %v2082_v53  ;;  %v2087_v41 = vor.u32 %v2086_v16, %v2085_v4  ;;  %v2090_v35 = vor.u32 %v2089_v20, %v2088_v31 }
 0x3a9   : > { %v1942_v44 = vsel %vm1859_vm10, %v1941_v24, %v1940_v23  ;;  %v2093_v9 = vor.u32 %v2092_v11, %v2091_v13  ;;  %v2096_v55 = vor.u32 %v2095_v38, %v2094_v45  ;;  %v6700_v6 = vand.u32 3, %v1950_v1 }
 0x3aa   : > { %v1945_v56 = vsel %vm6631_vm15, %v6397_v25, %v1942_v44  ;;  %v6702_v14 = vsub.s32 %v2229_v0, %v2232_v50  ;;  %v6705_v61 = vmul.f32 %v6311_v51, %v817_v37  ;;  %v2073_v63 = vor.u32 8388608, %v2072_v49 }
 0x3ab   : > { %4989 = vcosq.f32 %v1945_v56  ;;  %vm2097_vm7 = vcmp.lt.s32.totalorder %v2078_v48, 1  ;;  %v2380_v62 = vand.u32 2139095040, %v6682_v26  ;;  %vm2099_vm8 = vcmp.lt.s32.totalorder %v2078_v48, 3 }
 0x3ac   : > { %4991 = vsinq.f32 %v1945_v56  ;;  %v2235_v32 = vsub.s32 0, %v6702_v14  ;;  %vm2100_vm9 = vcmp.lt.s32.totalorder %v2078_v48, 4  ;;  %v2105_v29 = vsel %vm2097_vm7, %v2084_v54, %v2087_v41 }
 0x3ad   : > { %v2081_v21 = vshrl.u32 %v8579_v8, %v2080_v36  ;;  %v2102_v3 = vsel %vm2100_vm9, %v2090_v35, 2102212464  ;;  %v2106_v27 = vsel %vm2100_vm9, %v2093_v9, 920167782  ;;  %v2110_v46 = vsel %vm2100_vm9, %v2096_v55, 1326507024 }
 0x3ae   : > { %v4616_v34 = vmin.u32 %v2235_v32, %v6702_v14  ;;  %vm2098_vm10 = vcmp.lt.s32.totalorder %v2078_v48, 2  ;;  %v2107_v51 = vsel %vm2099_vm8, %v2090_v35, %v2106_v27  ;;  %v2109_v57 = vsel %vm2097_vm7, %v2087_v41, %v2090_v35 }
 0x3af   : > { %vm2171_vm11 = vcmp.lt.s32.totalorder %v6530_v17, 0  ;;  %v2108_v60 = vsel %vm2098_vm10, %v2105_v29, %v2107_v51  ;;  %v2111_v22 = vsel %vm2099_vm8, %v2093_v9, %v2110_v46  ;;  %v2113_v0 = vshll.u32 %v2073_v63, 8  ;;  %v6763_v51 = vld [vmem:[%s8518_s5] ss:$0 sm:$0xff] }
 0x3b0   : > { %vm6719_vm14 = vcmp.le.f32.partialorder %v2169_v40, 0.7853982  ;;  %v2237_v49 = vclz %v4616_v34  ;;  %v2255_v36 = vsub.s32 4, %v2231_v39  ;;  %v2101_v23 = vsel %vm2097_vm7, %v2081_v21, %v2084_v54 }
 0x3b1   : > { %v2103_v1 = vsel %vm2099_vm8, %v2087_v41, %v2102_v3  ;;  %vm1949_vm12 = vweird.f32 %v6397_v25  ;;  %v2112_v52 = vsel %vm2098_vm10, %v2109_v57, %v2111_v22  ;;  %v2381_v16 = vshrl.u32 %v2380_v62, 23 }
 0x3b2   : > { %v6727_v53 = vmul.u32.u64.low %v2113_v0, %v2108_v60  ;;  %v6728_v7 = vmul.u32.u64.high %v2113_v0, %v2108_v60, %v6727_v53  ;;  %vm1952_vm13 = vcmp.lt.s32.totalorder %v6700_v6, 2  ;;  %v4617_v40 = vadd.s32 4294967294, %v2237_v49 }
 0x3b3   : > { %v6732_v20 = vmul.u32.u64.low %v2113_v0, %v2112_v52  ;;  %v6733_v24 = vmul.u32.u64.high %v2113_v0, %v2112_v52, %v6732_v20  ;;  %vm1953_vm15 = vcmp.eq.s32.totalorder %v6700_v6, 0  ;;  %vm1956_vm0 = vcmp.eq.s32.totalorder %v6700_v6, 2 }
 0x3b4   : > { %v2104_v4 = vsel %vm2098_vm10, %v2101_v23, %v2103_v1  ;;  %v4623_v11 = vadd.s32 4294967169, %v2381_v16  ;;  %v2225_v13 = vadd.s32 %v6648_v12, %v6645_v43  ;;  %vm4618_vm1 = vcmp.lt.s32.totalorder %v4617_v40, 0 }
 0x3b5   : > { %v4990_v31 = vpop.eup %4989  ;;  %v2256_v45 = vsel %vm2171_vm11, %v2255_v36, %v2231_v39  ;;  %v2377_v38 = vand.u32 2147483647, %v6682_v26  ;;  %v2240_v50 = vsel %vm4618_vm1, 0, %v4617_v40  ;;  %v2123_v54 = vadd.s32 1, %v6728_v7 }
 0x3b6   : > { %v4992_v37 = vpop.eup %4991  ;;  %v1957_v44 = vxor.u32 2147483648, %v4990_v31  ;;  %v2387_v41 = vadd.s32 1, %v4623_v11  ;;  %v2241_v48 = vsub.s32 32, %v2240_v50  ;;  %v2245_v35 = vsub.s32 4294967266, %v2240_v50 }
 0x3b7   : > { %v1954_v56 = vxor.u32 2147483648, %v4992_v37  ;;  %v2120_v9 = vmul.u32 %v2113_v0, %v2104_v4  ;;  %v2242_v43 = vshll.u32 %v6702_v14, %v2240_v50  ;;  %vm2122_vm2 = vc.u32 %v6733_v24, %v6727_v53 }
 0x3b8   : > { %v1958_v55 = vsel %vm1956_vm0, %v1957_v44, %v4992_v37  ;;  %vm2388_vm3 = vcmp.gt.s32.totalorder %v2387_v41, 0  ;;  %v2243_v39 = vshrl.u32 %v2225_v13, %v2241_v48  ;;  %v2246_v63 = vadd.s32 127, %v2245_v35 }
 0x3b9   : > { %v1955_v12 = vsel %vm1953_vm15, %v4990_v31, %v1954_v56  ;;  %v2124_v62 = vsel %vm2122_vm2, %v2123_v54, %v6728_v7  ;;  %v2258_v29 = vsel %vm6719_vm14, 0, %v2256_v45  ;;  %v2389_v14 = vsel %vm2388_vm3, %v2387_v41, 0 }
 0x3ba   : > { %v1959_v32 = vsel %vm1952_vm13, %v1955_v12, %v1958_v55  ;;  %v2125_v21 = vadd.s32 %v2124_v62, %v2120_v9  ;;  %v2244_v27 = vor.u32 %v2243_v39, %v2242_v43  ;;  %v2247_v46 = vshll.u32 %v2246_v63, 23 }
 0x3bb   : > { %v1960_v3 = vsel %vm1949_vm12, nan, %v1959_v32  ;;  %v2384_v34 = vand.u32 8388607, %v2377_v38  ;;  %v725_v6 = vmul.f32 %v6763_v51, %v5596_v58  ;;  %v2391_v60 = vand.u32 31, %v2389_v14 }
 0x3bc   : > { %4361 = vst [vmem:[%s5975_s9 + $0x40] sm:$0xff] %v1960_v3  ;;  %v2126_v57 = vadd.s32 536870912, %v2125_v21  ;;  %v6770_v25 = vmul.f32 %v6763_v51, %v5642_v33  ;;  %v2248_v22 = vor.u32 4788187, %v2247_v46  ;;  %v2262_v0 = vadd.s32 3, %v2258_v29 }
 0x3bd   : > { %v2392_v36 = vsub.s32 32, %v2391_v60  ;;  %v969_v23 = vadd.f32 %v6705_v61, %v725_v6  ;;  %v2251_v52 = vcvt.s32.f32 %v2244_v27  ;;  %v2385_v7 = vor.u32 8388608, %v2384_v34 }
 0x3be   : > { %v6772_v49 = vshrl.u32 %v2126_v57, 30  ;;  %v2249_v1 = vand.u32 2147483647, %v2248_v22  ;;  %v6775_v16 = vshrl.u32 %v2389_v14, 5  ;;  %v2394_v40 = vshll.u32 %v8579_v8, %v2391_v60 }
 0x3bf   : > { %v2395_v20 = vshrl.u32 %v8580_v19, %v2392_v36  ;;  %v2397_v33 = vshll.u32 %v8580_v19, %v2391_v60  ;;  %v2398_v11 = vshrl.u32 %v8581_v28, %v2392_v36  ;;  %v2401_v31 = vshrl.u32 %v8582_v18, %v2392_v36 }
 0x3c0   : > { %v2128_v58 = vshll.u32 %v6772_v49, 30  ;;  %v2252_v4 = vmul.f32 %v2251_v52, %v2249_v1  ;;  %v2404_v61 = vshrl.u32 %v8583_v15, %v2392_v36  ;;  %v2400_v45 = vshll.u32 %v8581_v28, %v2391_v60 }
 0x3c1   : > { %v2403_v37 = vshll.u32 %v8582_v18, %v2391_v60  ;;  %v2407_v44 = vshrl.u32 %v8584_v47, %v2392_v36  ;;  %v6789_v54 = vand.u32 3, %v2262_v0  ;;  %v2396_v41 = vor.u32 %v2395_v20, %v2394_v40  ;;  %v832_v40 = vpop.permute.xlu1 %831 }
 0x3c2   : > { %v6784_v13 = vsub.s32 %v2125_v21, %v2128_v58  ;;  %v2253_v50 = vxor.u32 2147483648, %v2252_v4  ;;  %v2399_v56 = vor.u32 %v2398_v11, %v2397_v33  ;;  %vm2067_vm4 = vcmp.lt.s32.totalorder %v6588_v5, 0 }
 0x3c3   : > { %v2402_v35 = vor.u32 %v2401_v31, %v2400_v45  ;;  %v2405_v9 = vor.u32 %v2404_v61, %v2403_v37  ;;  %v2406_v55 = vshll.u32 %v8583_v15, %v2391_v60  ;;  %vm2409_vm5 = vcmp.lt.s32.totalorder %v6775_v16, 1 }
 0x3c4   : > { %v2131_v48 = vsub.s32 0, %v6784_v13  ;;  %v2254_v43 = vsel %vm2171_vm11, %v2253_v50, %v2252_v4  ;;  %v2425_v12 = vshll.u32 %v2385_v7, 8  ;;  %v6798_v39 = vadd.f32 %v6679_v2, %v969_v23 }
 0x3c5   : > { %v2257_v63 = vsel %vm6719_vm14, %v6530_v17, %v2254_v43  ;;  %v2408_v32 = vor.u32 %v2407_v44, %v2406_v55  ;;  %vm2412_vm6 = vcmp.lt.s32.totalorder %v6775_v16, 4  ;;  %v2393_v29 = vshrl.u32 %v8579_v8, %v2392_v36 }
 0x3c6   : > { %v4612_v62 = vmin.u32 %v2131_v48, %v6784_v13  ;;  %4993 = vcosq.f32 %v2257_v63  ;;  %v2417_v21 = vsel %vm2409_vm5, %v2396_v41, %v2399_v56  ;;  %v2418_v14 = vsel %vm2412_vm6, %v2405_v9, 920167782 }
 0x3c7   : > { %4995 = vsinq.f32 %v2257_v63  ;;  %vm6812_vm7 = vcmp.le.f32.partialorder %v2065_v10, 0.7853982  ;;  %vm2411_vm8 = vcmp.lt.s32.totalorder %v6775_v16, 3  ;;  %v2414_v27 = vsel %vm2412_vm6, %v2402_v35, 2102212464 }
 0x3c8   : > { %v2133_v3 = vclz %v4612_v62  ;;  %v2151_v46 = vsub.s32 4, %v6772_v49  ;;  %vm2410_vm9 = vcmp.lt.s32.totalorder %v6775_v16, 2  ;;  %v2419_v34 = vsel %vm2411_vm8, %v2402_v35, %v2418_v14 }
 0x3c9   : > { %v2421_v6 = vsel %vm2409_vm5, %v2399_v56, %v2402_v35  ;;  %v2413_v10 = vsel %vm2409_vm5, %v2393_v29, %v2396_v41  ;;  %v2420_v60 = vsel %vm2410_vm9, %v2417_v21, %v2419_v34  ;;  %v2422_v22 = vsel %vm2412_vm6, %v2408_v32, 1326507024 }
 0x3ca   : > { %v4613_v57 = vadd.s32 4294967294, %v2133_v3  ;;  %v2415_v0 = vsel %vm2411_vm8, %v2399_v56, %v2414_v27  ;;  %v2423_v36 = vsel %vm2411_vm8, %v2405_v9, %v2422_v22  ;;  %v2121_v52 = vadd.s32 %v6727_v53, %v6733_v24 }
 0x3cb   : > { %v6829_v23 = vmul.u32.u64.low %v2425_v12, %v2420_v60  ;;  %v6830_v1 = vmul.u32.u64.high %v2425_v12, %v2420_v60, %v6829_v23  ;;  %v2424_v7 = vsel %vm2410_vm9, %v2421_v6, %v2423_v36  ;;  %v2276_v58 = vand.u32 2139095040, %v6798_v39 }
 0x3cc   : > { %vm4614_vm10 = vcmp.lt.s32.totalorder %v4613_v57, 0  ;;  %v2152_v33 = vsel %vm2067_vm4, %v2151_v46, %v6772_v49  ;;  %v6841_v4 = vmul.u32.u64.low %v2425_v12, %v2424_v7  ;;  %v6842_v11 = vmul.u32.u64.high %v2425_v12, %v2424_v7, %v6841_v4  ;;  %v6853_v49 = vld [vmem:[%s8518_s5 + $0x1] ss:$0 sm:$0xff] }
 0x3cd   : > { %v2136_v20 = vsel %vm4614_vm10, 0, %v4613_v57  ;;  %vm2261_vm11 = vweird.f32 %v6530_v17  ;;  %v2416_v53 = vsel %vm2410_vm9, %v2413_v10, %v2415_v0  ;;  %v2277_v24 = vshrl.u32 %v2276_v58, 23 }
 0x3ce   : > { %v2137_v31 = vsub.s32 32, %v2136_v20  ;;  %v2141_v61 = vsub.s32 4294967266, %v2136_v20  ;;  %vm2264_vm14 = vcmp.lt.s32.totalorder %v6789_v54, 2  ;;  %vm2268_vm12 = vcmp.eq.s32.totalorder %v6789_v54, 2 }
 0x3cf   : > { %v2435_v45 = vadd.s32 1, %v6830_v1  ;;  %v940_v37 = vmul.f32 %v6853_v49, %v832_v40  ;;  %v2138_v44 = vshll.u32 %v6784_v13, %v2136_v20  ;;  %v4619_v16 = vadd.s32 4294967169, %v2277_v24 }
 0x3d0   : > { %v2139_v50 = vshrl.u32 %v2121_v52, %v2137_v31  ;;  %v2142_v41 = vadd.s32 127, %v2141_v61  ;;  %v4994_v56 = vpop.eup %4993  ;;  %v2154_v48 = vsel %vm6812_vm7, 0, %v2152_v33  ;;  %v2432_v35 = vmul.u32 %v2425_v12, %v2416_v53  ;;  %v828_v52 = vpop.permute.xlu0 %827 }
 0x3d1   : > { %vm2434_vm13 = vc.u32 %v6842_v11, %v6829_v23  ;;  %v2273_v9 = vand.u32 2147483647, %v6798_v39  ;;  %v4996_v55 = vpop.eup %4995  ;;  %v2269_v43 = vxor.u32 2147483648, %v4994_v56  ;;  %v2283_v21 = vadd.s32 1, %v4619_v16 }
 0x3d2   : > { %v2140_v63 = vor.u32 %v2139_v50, %v2138_v44  ;;  %v2143_v62 = vshll.u32 %v2142_v41, 23  ;;  %v2436_v32 = vsel %vm2434_vm13, %v2435_v45, %v6830_v1  ;;  %v2266_v13 = vxor.u32 2147483648, %v4996_v55 }
 0x3d3   : > { %v2437_v29 = vadd.s32 %v2436_v32, %v2432_v35  ;;  %v972_v14 = vadd.f32 %v940_v37, %v6770_v25  ;;  %vm2265_vm15 = vcmp.eq.s32.totalorder %v6789_v54, 0  ;;  %v2270_v12 = vsel %vm2268_vm12, %v2269_v43, %v4996_v55 }
 0x3d4   : > { %v2144_v3 = vor.u32 4788187, %v2143_v62  ;;  %v2158_v27 = vadd.s32 3, %v2154_v48  ;;  %v2267_v46 = vsel %vm2265_vm15, %v4994_v56, %v2266_v13  ;;  %v2280_v6 = vand.u32 8388607, %v2273_v9 }
 0x3d5   : > { %v2438_v34 = vadd.s32 536870912, %v2437_v29  ;;  %vm2284_vm0 = vcmp.gt.s32.totalorder %v2283_v21, 0  ;;  %v2271_v57 = vsel %vm2264_vm14, %v2267_v46, %v2270_v12  ;;  %v2147_v60 = vcvt.s32.f32 %v2140_v63 }
 0x3d6   : > { %v2145_v10 = vand.u32 2147483647, %v2144_v3  ;;  %v2285_v25 = vsel %vm2284_vm0, %v2283_v21, 0  ;;  %v2272_v22 = vsel %vm2261_vm11, nan, %v2271_v57  ;;  %v6876_v1 = vadd.f32 %v6679_v2, %v972_v14 }
 0x3d7   : > { %v6873_v0 = vshrl.u32 %v2438_v34, 30  ;;  %v2287_v36 = vand.u32 31, %v2285_v25  ;;  %4364 = vst [vmem:[%s5975_s9 + $0x58] sm:$0xff] %v2272_v22  ;;  %v6881_v58 = vmul.f32 %v6763_v51, %v5598_v59  ;;  %v6884_v33 = vand.u32 3, %v2158_v27 }
 0x3d8   : > { %v2148_v7 = vmul.f32 %v2147_v60, %v2145_v10  ;;  %v2281_v17 = vor.u32 8388608, %v2280_v6  ;;  %v6887_v4 = vmul.f32 %v6853_v49, %v828_v52  ;;  %v2286_v61 = vshrl.u32 %v2285_v25, 5 }
 0x3d9   : > { %v2440_v54 = vshll.u32 %v6873_v0, 30  ;;  %v2288_v40 = vsub.s32 32, %v2287_v36  ;;  %v2588_v24 = vand.u32 2139095040, %v6876_v1  ;;  %v2290_v45 = vshll.u32 %v8579_v8, %v2287_v36 }
 0x3da   : > { %v2149_v20 = vxor.u32 2147483648, %v2148_v7  ;;  %v2293_v16 = vshll.u32 %v8580_v19, %v2287_v36  ;;  %v2296_v56 = vshll.u32 %v8581_v28, %v2287_v36  ;;  %v2299_v35 = vshll.u32 %v8582_v18, %v2287_v36 }
 0x3db   : > { %v6889_v31 = vsub.s32 %v2437_v29, %v2440_v54  ;;  %v2291_v53 = vshrl.u32 %v8580_v19, %v2288_v40  ;;  %v2294_v37 = vshrl.u32 %v8581_v28, %v2288_v40  ;;  %v2297_v44 = vshrl.u32 %v8582_v18, %v2288_v40 }
 0x3dc   : > { %v2150_v59 = vsel %vm2067_vm4, %v2149_v20, %v2148_v7  ;;  %v2300_v55 = vshrl.u32 %v8583_v15, %v2288_v40  ;;  %v2302_v42 = vshll.u32 %v8583_v15, %v2287_v36  ;;  %v2303_v13 = vshrl.u32 %v8584_v47, %v2288_v40 }
 0x3dd   : > { %v2153_v50 = vsel %vm6812_vm7, %v6588_v5, %v2150_v59  ;;  %v2443_v41 = vsub.s32 0, %v6889_v31  ;;  %v2292_v48 = vor.u32 %v2291_v53, %v2290_v45  ;;  %v2295_v63 = vor.u32 %v2294_v37, %v2293_v16 }
 0x3de   : > { %4997 = vcosq.f32 %v2153_v50  ;;  %v2298_v62 = vor.u32 %v2297_v44, %v2296_v56  ;;  %v2301_v32 = vor.u32 %v2300_v55, %v2299_v35  ;;  %v6909_v29 = vshll.u32 %v2281_v17, 8 }
 0x3df   : > { %4999 = vsinq.f32 %v2153_v50  ;;  %v4624_v43 = vmin.u32 %v2443_v41, %v6889_v31  ;;  %v2289_v14 = vshrl.u32 %v8579_v8, %v2288_v40  ;;  %vm2305_vm1 = vcmp.lt.s32.totalorder %v2286_v61, 1 }
 0x3e0   : > { %v2589_v12 = vshrl.u32 %v2588_v24, 23  ;;  %v2304_v3 = vor.u32 %v2303_v13, %v2302_v42  ;;  %vm2306_vm2 = vcmp.lt.s32.totalorder %v2286_v61, 2  ;;  %vm2307_vm3 = vcmp.lt.s32.totalorder %v2286_v61, 3 }
 0x3e1   : > { %v2445_v21 = vclz %v4624_v43  ;;  %vm2308_vm4 = vcmp.lt.s32.totalorder %v2286_v61, 4  ;;  %vm2161_vm5 = vcmp.eq.s32.totalorder %v6884_v33, 0  ;;  %v2313_v34 = vsel %vm2305_vm1, %v2292_v48, %v2295_v63 }
 0x3e2   : > { %v2310_v46 = vsel %vm2308_vm4, %v2298_v62, 2102212464  ;;  %v2314_v6 = vsel %vm2308_vm4, %v2301_v32, 920167782  ;;  %vm2160_vm6 = vcmp.lt.s32.totalorder %v6884_v33, 2  ;;  %v2309_v57 = vsel %vm2305_vm1, %v2289_v14, %v2292_v48 }
 0x3e3   : > { %v4625_v27 = vadd.s32 4294967294, %v2445_v21  ;;  %v2315_v10 = vsel %vm2307_vm3, %v2298_v62, %v2314_v6  ;;  %v2317_v60 = vsel %vm2305_vm1, %v2295_v63, %v2298_v62  ;;  %v2318_v25 = vsel %vm2308_vm4, %v2304_v3, 1326507024  ;;  %v843_v3 = vpop.permute.xlu1 %842 }
 0x3e4   : > { %vm2157_vm7 = vweird.f32 %v6588_v5  ;;  %vm2379_vm8 = vcmp.lt.s32.totalorder %v6682_v26, 0  ;;  %v2311_v22 = vsel %vm2307_vm3, %v2295_v63, %v2310_v46  ;;  %v2316_v36 = vsel %vm2306_vm2, %v2313_v34, %v2315_v10 }
 0x3e5   : > { %vm4626_vm9 = vcmp.lt.s32.totalorder %v4625_v27, 0  ;;  %v2319_v52 = vsel %vm2307_vm3, %v2301_v32, %v2318_v25  ;;  %v6922_v40 = vmul.u32.u64.low %v6909_v29, %v2316_v36  ;;  %v6923_v20 = vmul.u32.u64.high %v6909_v29, %v2316_v36, %v6922_v40 }
 0x3e6   : > { %v2448_v7 = vsel %vm4626_vm9, 0, %v4625_v27  ;;  %v2320_v54 = vsel %vm2306_vm2, %v2317_v60, %v2319_v52  ;;  %vm2164_vm10 = vcmp.eq.s32.totalorder %v6884_v33, 2  ;;  %v2433_v17 = vadd.s32 %v6829_v23, %v6842_v11 }
 0x3e7   : > { %v2449_v53 = vsub.s32 32, %v2448_v7  ;;  %v2453_v24 = vsub.s32 4294967266, %v2448_v7  ;;  %v2312_v45 = vsel %vm2306_vm2, %v2309_v57, %v2311_v22  ;;  %v4631_v50 = vadd.s32 4294967169, %v2589_v12 }
 0x3e8   : > { %v4998_v59 = vpop.eup %4997  ;;  %v6931_v37 = vmul.u32.u64.low %v6909_v29, %v2320_v54  ;;  %v6932_v44 = vmul.u32.u64.high %v6909_v29, %v2320_v54, %v6931_v37  ;;  %v2450_v56 = vshll.u32 %v6889_v31, %v2448_v7  ;;  %v2463_v43 = vsub.s32 4, %v6873_v0 }
 0x3e9   : > { %v5000_v41 = vpop.eup %4999  ;;  %v2165_v16 = vxor.u32 2147483648, %v4998_v59  ;;  %v2451_v48 = vshrl.u32 %v2433_v17, %v2449_v53  ;;  %v2454_v35 = vadd.s32 127, %v2453_v24  ;;  %v2331_v23 = vadd.s32 1, %v6923_v20 }
 0x3ea   : > { %v2162_v55 = vxor.u32 2147483648, %v5000_v41  ;;  %v2595_v11 = vadd.s32 1, %v4631_v50  ;;  %v2585_v32 = vand.u32 2147483647, %v6876_v1  ;;  %v2328_v31 = vmul.u32 %v6909_v29, %v2312_v45 }
 0x3eb   : > { %v2166_v61 = vsel %vm2164_vm10, %v2165_v16, %v5000_v41  ;;  %v2452_v63 = vor.u32 %v2451_v48, %v2450_v56  ;;  %v2455_v62 = vshll.u32 %v2454_v35, 23  ;;  %vm2330_vm11 = vc.u32 %v6932_v44, %v6922_v40 }
 0x3ec   : > { %v2163_v42 = vsel %vm2161_vm5, %v4998_v59, %v2162_v55  ;;  %vm2596_vm14 = vcmp.gt.s32.totalorder %v2595_v11, 0  ;;  %v2332_v14 = vsel %vm2330_vm11, %v2331_v23, %v6923_v20  ;;  %v971_v12 = vadd.f32 %v6887_v4, %v6881_v58 }
 0x3ed   : > { %v2167_v13 = vsel %vm2160_vm6, %v2163_v42, %v2166_v61  ;;  %v2456_v21 = vor.u32 4788187, %v2455_v62  ;;  %v2464_v29 = vsel %vm2379_vm8, %v2463_v43, %v6873_v0  ;;  %v2333_v46 = vadd.s32 %v2332_v14, %v2328_v31 }
 0x3ee   : > { %v2168_v27 = vsel %vm2157_vm7, nan, %v2167_v13  ;;  %v2597_v34 = vsel %vm2596_vm14, %v2595_v11, 0  ;;  %v2459_v33 = vcvt.s32.f32 %v2452_v63  ;;  %vm6958_vm12 = vcmp.le.f32.partialorder %v2377_v38, 0.7853982 }
 0x3ef   : > { %4363 = vst [vmem:[%s5975_s9 + $0x50] sm:$0xff] %v2168_v27  ;;  %v2457_v6 = vand.u32 2147483647, %v2456_v21  ;;  %v2599_v57 = vand.u32 31, %v2597_v34  ;;  %v2334_v58 = vadd.s32 536870912, %v2333_v46  ;;  %v6965_v4 = vmul.f32 %v6853_v49, %v843_v3 }
 0x3f0   : > { %v2592_v5 = vand.u32 8388607, %v2585_v32  ;;  %v2466_v60 = vsel %vm6958_vm12, 0, %v2464_v29  ;;  %v6970_v22 = vadd.f32 %v6679_v2, %v971_v12  ;;  %v2598_v38 = vshrl.u32 %v2597_v34, 5 }
 0x3f1   : > { %v2460_v0 = vmul.f32 %v2459_v33, %v2457_v6  ;;  %v2600_v25 = vsub.s32 32, %v2599_v57  ;;  %v6972_v36 = vshrl.u32 %v2334_v58, 30  ;;  %v2602_v52 = vshll.u32 %v8579_v8, %v2599_v57 }
 0x3f2   : > { %v2605_v7 = vshll.u32 %v8580_v19, %v2599_v57  ;;  %v2608_v53 = vshll.u32 %v8581_v28, %v2599_v57  ;;  %v2611_v45 = vshll.u32 %v8582_v18, %v2599_v57  ;;  %v2614_v16 = vshll.u32 %v8583_v15, %v2599_v57 }
 0x3f3   : > { %v2461_v54 = vxor.u32 2147483648, %v2460_v0  ;;  %v2603_v20 = vshrl.u32 %v8580_v19, %v2600_v25  ;;  %v2606_v17 = vshrl.u32 %v8581_v28, %v2600_v25  ;;  %v2336_v24 = vshll.u32 %v6972_v36, 30 }
 0x3f4   : > { %v2609_v59 = vshrl.u32 %v8582_v18, %v2600_v25  ;;  %v2612_v37 = vshrl.u32 %v8583_v15, %v2600_v25  ;;  %v2615_v56 = vshrl.u32 %v8584_v47, %v2600_v25  ;;  %v2470_v23 = vadd.s32 3, %v2466_v60 }
 0x3f5   : > { %v2462_v50 = vsel %vm2379_vm8, %v2461_v54, %v2460_v0  ;;  %v2604_v41 = vor.u32 %v2603_v20, %v2602_v52  ;;  %v6990_v35 = vsub.s32 %v2333_v46, %v2336_v24  ;;  %v2607_v55 = vor.u32 %v2606_v17, %v2605_v7 }
 0x3f6   : > { %v2465_v48 = vsel %vm6958_vm12, %v6682_v26, %v2462_v50  ;;  %v2610_v43 = vor.u32 %v2609_v59, %v2608_v53  ;;  %v2613_v11 = vor.u32 %v2612_v37, %v2611_v45  ;;  %v2616_v61 = vor.u32 %v2615_v56, %v2614_v16 }
 0x3f7   : > { %5001 = vcosq.f32 %v2465_v48  ;;  %v2339_v63 = vsub.s32 0, %v6990_v35  ;;  %v2593_v62 = vor.u32 8388608, %v2592_v5  ;;  %v2601_v42 = vshrl.u32 %v8579_v8, %v2600_v25 }
 0x3f8   : > { %5003 = vsinq.f32 %v2465_v48  ;;  %vm2617_vm13 = vcmp.lt.s32.totalorder %v2598_v38, 1  ;;  %vm2619_vm15 = vcmp.lt.s32.totalorder %v2598_v38, 3  ;;  %vm2620_vm0 = vcmp.lt.s32.totalorder %v2598_v38, 4 }
 0x3f9   : > { %v2484_v31 = vand.u32 2139095040, %v6970_v22  ;;  %v4620_v13 = vmin.u32 %v2339_v63, %v6990_v35  ;;  %v2621_v21 = vsel %vm2617_vm13, %v2601_v42, %v2604_v41  ;;  %v2622_v14 = vsel %vm2620_vm0, %v2610_v43, 2102212464 }
 0x3fa   : > { %v2625_v12 = vsel %vm2617_vm13, %v2604_v41, %v2607_v55  ;;  %v2623_v3 = vsel %vm2619_vm15, %v2607_v55, %v2622_v14  ;;  %v2626_v27 = vsel %vm2620_vm0, %v2613_v11, 920167782  ;;  %v2629_v29 = vsel %vm2617_vm13, %v2607_v55, %v2610_v43 }
 0x3fb   : > { %v2630_v46 = vsel %vm2620_vm0, %v2616_v61, 1326507024  ;;  %v2471_v34 = vand.u32 3, %v2470_v23  ;;  %vm2275_vm1 = vcmp.lt.s32.totalorder %v6798_v39, 0  ;;  %v2341_v6 = vclz %v4620_v13 }
 0x3fc   : > { %v2633_v33 = vshll.u32 %v2593_v62, 8  ;;  %vm2618_vm2 = vcmp.lt.s32.totalorder %v2598_v38, 2  ;;  %v2627_v57 = vsel %vm2619_vm15, %v2610_v43, %v2626_v27  ;;  %v2631_v10 = vsel %vm2619_vm15, %v2613_v11, %v2630_v46  ;;  %v839_v46 = vpop.permute.xlu0 %838 }
 0x3fd   : > { %v2485_v58 = vshrl.u32 %v2484_v31, 23  ;;  %vm2469_vm3 = vweird.f32 %v6682_v26  ;;  %v4621_v5 = vadd.s32 4294967294, %v2341_v6  ;;  %v2624_v0 = vsel %vm2618_vm2, %v2621_v21, %v2623_v3 }
 0x3fe   : > { %v2628_v60 = vsel %vm2618_vm2, %v2625_v12, %v2627_v57  ;;  %v2632_v25 = vsel %vm2618_vm2, %v2629_v29, %v2631_v10  ;;  %vm2473_vm4 = vcmp.eq.s32.totalorder %v2471_v34, 0  ;;  %vm2476_vm5 = vcmp.eq.s32.totalorder %v2471_v34, 2 }
 0x3ff   : > { %v7001_v52 = vmul.u32.u64.low %v2633_v33, %v2632_v25  ;;  %v7002_v7 = vmul.u32.u64.high %v2633_v33, %v2632_v25, %v7001_v52  ;;  %v7004_v54 = vmul.u32.u64.low %v2633_v33, %v2628_v60  ;;  %v7005_v20 = vmul.u32.u64.high %v2633_v33, %v2628_v60, %v7004_v54 }
 0x400   : > { %vm4622_vm6 = vcmp.lt.s32.totalorder %v4621_v5, 0  ;;  %v4627_v17 = vadd.s32 4294967169, %v2485_v58  ;;  %v2329_v53 = vadd.s32 %v6922_v40, %v6932_v44  ;;  %v2359_v59 = vsub.s32 4, %v6972_v36 }
 0x401   : > { %v5002_v38 = vpop.eup %5001  ;;  %v2344_v24 = vsel %vm4622_vm6, 0, %v4621_v5  ;;  %v2481_v45 = vand.u32 2147483647, %v6970_v22  ;;  %v2640_v56 = vmul.u32 %v2633_v33, %v2624_v0  ;;  %vm2642_vm7 = vc.u32 %v7002_v7, %v7004_v54 }
 0x402   : > { %v5004_v37 = vpop.eup %5003  ;;  %v2477_v50 = vxor.u32 2147483648, %v5002_v38  ;;  %v2345_v41 = vsub.s32 32, %v2344_v24  ;;  %v2349_v16 = vsub.s32 4294967266, %v2344_v24  ;;  %v2346_v55 = vshll.u32 %v6990_v35, %v2344_v24 }
 0x403   : > { %v2474_v48 = vxor.u32 2147483648, %v5004_v37  ;;  %v2643_v43 = vadd.s32 1, %v7005_v20  ;;  %v2491_v11 = vadd.s32 1, %v4627_v17  ;;  %vm2472_vm8 = vcmp.lt.s32.totalorder %v2471_v34, 2 }
 0x404   : > { %v2478_v40 = vsel %vm2476_vm5, %v2477_v50, %v5004_v37  ;;  %v2347_v44 = vshrl.u32 %v2329_v53, %v2345_v41  ;;  %v2350_v23 = vadd.s32 127, %v2349_v16  ;;  %v2360_v63 = vsel %vm2275_vm1, %v2359_v59, %v6972_v36 }
 0x405   : > { %v2475_v61 = vsel %vm2473_vm4, %v5002_v38, %v2474_v48  ;;  %v2644_v35 = vsel %vm2642_vm7, %v2643_v43, %v7005_v20  ;;  %vm7026_vm9 = vcmp.le.f32.partialorder %v2273_v9, 0.7853982  ;;  %v2488_v12 = vand.u32 8388607, %v2481_v45  ;;  %v8619_v9 = vld [vmem:[#allocation16_spill] sm:$0xff] }
 0x406   : > { %v2479_v62 = vsel %vm2472_vm8, %v2475_v61, %v2478_v40  ;;  %v2348_v42 = vor.u32 %v2347_v44, %v2346_v55  ;;  %v2351_v31 = vshll.u32 %v2350_v23, 23  ;;  %v2645_v13 = vadd.s32 %v2644_v35, %v2640_v56 }
 0x407   : > { %v2480_v21 = vsel %vm2469_vm3, nan, %v2479_v62  ;;  %vm2492_vm10 = vcmp.gt.s32.totalorder %v2491_v11, 0  ;;  %v2362_v3 = vsel %vm7026_vm9, 0, %v2360_v63  ;;  %v730_v26 = vmul.f32 %v6763_v51, %v5644_v30 }
 0x408   : > { %4366 = vst [vmem:[%s5975_s9 + $0x68] sm:$0xff] %v2480_v21  ;;  %v2352_v36 = vor.u32 4788187, %v2351_v31  ;;  %v2646_v27 = vadd.s32 536870912, %v2645_v13  ;;  %v2493_v29 = vsel %vm2492_vm10, %v2491_v11, 0  ;;  %v7039_v6 = vmul.f32 %v6763_v51, %v8619_v9 }
 0x409   : > { %v2495_v34 = vand.u32 31, %v2493_v29  ;;  %v2355_v57 = vcvt.s32.f32 %v2348_v42  ;;  %v2366_v58 = vadd.s32 3, %v2362_v3  ;;  %v974_v0 = vadd.f32 %v6965_v4, %v730_v26 }
 0x40a   : > { %v2353_v33 = vand.u32 2147483647, %v2352_v36  ;;  %v7041_v10 = vshrl.u32 %v2646_v27, 30  ;;  %v7045_v60 = vmul.f32 %v6853_v49, %v839_v46  ;;  %v2489_v30 = vor.u32 8388608, %v2488_v12 }
 0x40b   : > { %v2496_v5 = vsub.s32 32, %v2495_v34  ;;  %v2498_v20 = vshll.u32 %v8579_v8, %v2495_v34  ;;  %v2501_v17 = vshll.u32 %v8580_v19, %v2495_v34  ;;  %v2504_v4 = vshll.u32 %v8581_v28, %v2495_v34 }
 0x40c   : > { %v2356_v25 = vmul.f32 %v2355_v57, %v2353_v33  ;;  %v2648_v52 = vshll.u32 %v7041_v10, 30  ;;  %v2494_v50 = vshrl.u32 %v2493_v29, 5  ;;  %v2507_v16 = vshll.u32 %v8582_v18, %v2495_v34 }
 0x40d   : > { %v2499_v51 = vshrl.u32 %v8580_v19, %v2496_v5  ;;  %v2502_v38 = vshrl.u32 %v8581_v28, %v2496_v5  ;;  %v2505_v53 = vshrl.u32 %v8582_v18, %v2496_v5  ;;  %v2508_v37 = vshrl.u32 %v8583_v15, %v2496_v5 }
 0x40e   : > { %v2357_v24 = vxor.u32 2147483648, %v2356_v25  ;;  %v7053_v59 = vsub.s32 %v2645_v13, %v2648_v52  ;;  %v7059_v56 = vadd.f32 %v6679_v2, %v974_v0  ;;  %v2510_v11 = vshll.u32 %v8583_v15, %v2495_v34 }
 0x40f   : > { %v2500_v41 = vor.u32 %v2499_v51, %v2498_v20  ;;  %v2503_v43 = vor.u32 %v2502_v38, %v2501_v17  ;;  %v2506_v40 = vor.u32 %v2505_v53, %v2504_v4  ;;  %v2509_v23 = vor.u32 %v2508_v37, %v2507_v16 }
 0x410   : > { %v2358_v48 = vsel %vm2275_vm1, %v2357_v24, %v2356_v25  ;;  %v2651_v55 = vsub.s32 0, %v7053_v59  ;;  %v2511_v61 = vshrl.u32 %v8584_v47, %v2496_v5  ;;  %v7069_v63 = vand.u32 3, %v2366_v58 }
 0x411   : > { %v2361_v44 = vsel %vm7026_vm9, %v6798_v39, %v2358_v48  ;;  %v7072_v35 = vshll.u32 %v2489_v30, 8  ;;  %v2497_v62 = vshrl.u32 %v8579_v8, %v2496_v5  ;;  %v2796_v31 = vand.u32 2139095040, %v7059_v56 }
 0x412   : > { %5005 = vcosq.f32 %v2361_v44  ;;  %v4632_v2 = vmin.u32 %v2651_v55, %v7053_v59  ;;  %v2512_v42 = vor.u32 %v2511_v61, %v2510_v11  ;;  %vm2587_vm11 = vcmp.lt.s32.totalorder %v6876_v1, 0 }
 0x413   : > { %5007 = vsinq.f32 %v2361_v44  ;;  %vm2513_vm14 = vcmp.lt.s32.totalorder %v2494_v50, 1  ;;  %vm2514_vm12 = vcmp.lt.s32.totalorder %v2494_v50, 2  ;;  %vm2516_vm13 = vcmp.lt.s32.totalorder %v2494_v50, 4 }
 0x414   : > { %v2653_v13 = vclz %v4632_v2  ;;  %vm2515_vm15 = vcmp.lt.s32.totalorder %v2494_v50, 3  ;;  %v2518_v21 = vsel %vm2516_vm13, %v2506_v40, 2102212464  ;;  %v2521_v14 = vsel %vm2513_vm14, %v2500_v41, %v2503_v43 }
 0x415   : > { %v2522_v12 = vsel %vm2516_vm13, %v2509_v23, 920167782  ;;  %v2517_v3 = vsel %vm2513_vm14, %v2497_v62, %v2500_v41  ;;  %v2525_v29 = vsel %vm2513_vm14, %v2503_v43, %v2506_v40  ;;  %vm7079_vm0 = vcmp.le.f32.partialorder %v2585_v32, 0.7853982 }
 0x416   : > { %v4633_v36 = vadd.s32 4294967294, %v2653_v13  ;;  %v2523_v27 = vsel %vm2515_vm15, %v2506_v40, %v2522_v12  ;;  %v2519_v26 = vsel %vm2515_vm15, %v2503_v43, %v2518_v21  ;;  %v2526_v9 = vsel %vm2516_vm13, %v2512_v42, 1326507024 }
 0x417   : > { %v2524_v34 = vsel %vm2514_vm12, %v2521_v14, %v2523_v27  ;;  %v2797_v33 = vshrl.u32 %v2796_v31, 23  ;;  %vm2368_vm1 = vcmp.lt.s32.totalorder %v7069_v63, 2  ;;  %v2527_v57 = vsel %vm2515_vm15, %v2509_v23, %v2526_v9 }
 0x418   : > { %vm4634_vm2 = vcmp.lt.s32.totalorder %v4633_v36, 0  ;;  %v7086_v58 = vmul.u32.u64.low %v7072_v35, %v2524_v34  ;;  %v7087_v5 = vmul.u32.u64.high %v7072_v35, %v2524_v34, %v7086_v58  ;;  %vm2365_vm3 = vweird.f32 %v6798_v39 }
 0x419   : > { %v2656_v32 = vsel %vm4634_vm2, 0, %v4633_v36  ;;  %v2671_v0 = vsub.s32 4, %v7041_v10  ;;  %v2528_v25 = vsel %vm2514_vm12, %v2525_v29, %v2527_v57  ;;  %v4639_v52 = vadd.s32 4294967169, %v2797_v33 }
 0x41a   : > { %vm2372_vm4 = vcmp.eq.s32.totalorder %v7069_v63, 2  ;;  %v2641_v30 = vadd.s32 %v7004_v54, %v7002_v7  ;;  %v2657_v20 = vsub.s32 32, %v2656_v32  ;;  %v2661_v51 = vsub.s32 4294967266, %v2656_v32 }
 0x41b   : > { %v2520_v17 = vsel %vm2514_vm12, %v2517_v3, %v2519_v26  ;;  %v7098_v38 = vmul.u32.u64.low %v7072_v35, %v2528_v25  ;;  %v7099_v53 = vmul.u32.u64.high %v7072_v35, %v2528_v25, %v7098_v38  ;;  %v2803_v24 = vadd.s32 1, %v4639_v52 }
 0x41c   : > { %v5006_v4 = vpop.eup %5005  ;;  %v2658_v37 = vshll.u32 %v7053_v59, %v2656_v32  ;;  %v2659_v41 = vshrl.u32 %v2641_v30, %v2657_v20  ;;  %v2662_v16 = vadd.s32 127, %v2661_v51  ;;  %v2539_v48 = vadd.s32 1, %v7087_v5 }
 0x41d   : > { %v5008_v55 = vpop.eup %5007  ;;  %v2373_v43 = vxor.u32 2147483648, %v5006_v4  ;;  %v2672_v7 = vsel %vm2587_vm11, %v2671_v0, %v7041_v10  ;;  %v2793_v54 = vand.u32 2147483647, %v7059_v56  ;;  %vm2804_vm5 = vcmp.gt.s32.totalorder %v2803_v24, 0 }
 0x41e   : > { %v2370_v50 = vxor.u32 2147483648, %v5008_v55  ;;  %v2660_v40 = vor.u32 %v2659_v41, %v2658_v37  ;;  %v2663_v44 = vshll.u32 %v2662_v16, 23  ;;  %v2805_v23 = vsel %vm2804_vm5, %v2803_v24, 0 }
 0x41f   : > { %vm2369_vm6 = vcmp.eq.s32.totalorder %v7069_v63, 0  ;;  %v2374_v59 = vsel %vm2372_vm4, %v2373_v43, %v5008_v55  ;;  %v2536_v11 = vmul.u32 %v7072_v35, %v2520_v17  ;;  %vm2538_vm7 = vc.u32 %v7099_v53, %v7086_v58 }
 0x420   : > { %v2371_v61 = vsel %vm2369_vm6, %v5006_v4, %v2370_v50  ;;  %v2664_v10 = vor.u32 4788187, %v2663_v44  ;;  %v2674_v2 = vsel %vm7079_vm0, 0, %v2672_v7  ;;  %v2540_v62 = vsel %vm2538_vm7, %v2539_v48, %v7087_v5  ;;  %v7148_v48 = vld [vmem:[%s8518_s5 + $0x2] ss:$0 sm:$0xff] }
 0x421   : > { %v2375_v42 = vsel %vm2368_vm1, %v2371_v61, %v2374_v59  ;;  %v2541_v31 = vadd.s32 %v2540_v62, %v2536_v11  ;;  %v2807_v13 = vand.u32 31, %v2805_v23  ;;  %v973_v21 = vadd.f32 %v7045_v60, %v7039_v6  ;;  %v854_v59 = vpop.permute.xlu1 %853 }
 0x422   : > { %v2376_v35 = vsel %vm2365_vm3, nan, %v2375_v42  ;;  %v2665_v14 = vand.u32 2147483647, %v2664_v10  ;;  %v2667_v12 = vcvt.s32.f32 %v2660_v40  ;;  %v2800_v36 = vand.u32 8388607, %v2793_v54 }
 0x423   : > { %4365 = vst [vmem:[%s5975_s9 + $0x60] sm:$0xff] %v2376_v35  ;;  %v2678_v3 = vadd.s32 3, %v2674_v2  ;;  %v2542_v27 = vadd.s32 536870912, %v2541_v31  ;;  %v7125_v29 = vshrl.u32 %v2805_v23, 5  ;;  %v2808_v63 = vsub.s32 32, %v2807_v13 }
 0x424   : > { %v2668_v26 = vmul.f32 %v2667_v12, %v2665_v14  ;;  %v2810_v34 = vshll.u32 %v8579_v8, %v2807_v13  ;;  %v2813_v9 = vshll.u32 %v8580_v19, %v2807_v13  ;;  %v2816_v6 = vshll.u32 %v8581_v28, %v2807_v13 }
 0x425   : > { %v2543_v39 = vshrl.u32 %v2542_v27, 30  ;;  %v2811_v60 = vshrl.u32 %v8580_v19, %v2808_v63  ;;  %v2814_v33 = vshrl.u32 %v8581_v28, %v2808_v63  ;;  %v2819_v57 = vshll.u32 %v8582_v18, %v2807_v13 }
 0x426   : > { %v2669_v5 = vxor.u32 2147483648, %v2668_v26  ;;  %v2817_v32 = vshrl.u32 %v8582_v18, %v2808_v63  ;;  %v2820_v0 = vshrl.u32 %v8583_v15, %v2808_v63  ;;  %v2823_v25 = vshrl.u32 %v8584_v47, %v2808_v63 }
 0x427   : > { %v2544_v52 = vshll.u32 %v2543_v39, 30  ;;  %v2801_v30 = vor.u32 8388608, %v2800_v36  ;;  %v2812_v20 = vor.u32 %v2811_v60, %v2810_v34  ;;  %v2822_v51 = vshll.u32 %v8583_v15, %v2807_v13 }
 0x428   : > { %v2670_v17 = vsel %vm2587_vm11, %v2669_v5, %v2668_v26  ;;  %vm2483_vm8 = vcmp.lt.s32.totalorder %v6970_v22, 0  ;;  %v2815_v38 = vor.u32 %v2814_v33, %v2813_v9  ;;  %v2818_v24 = vor.u32 %v2817_v32, %v2816_v6 }
 0x429   : > { %v2821_v4 = vor.u32 %v2820_v0, %v2819_v57  ;;  %v2673_v37 = vsel %vm7079_vm0, %v6876_v1, %v2670_v17  ;;  %v7143_v41 = vsub.s32 %v2541_v31, %v2544_v52  ;;  %v2824_v16 = vor.u32 %v2823_v25, %v2822_v51 }
 0x42a   : > { %v7151_v55 = vadd.f32 %v7148_v48, %v973_v21  ;;  %5009 = vcosq.f32 %v2673_v37  ;;  %vm2825_vm9 = vcmp.lt.s32.totalorder %v7125_v29, 1  ;;  %vm2826_vm10 = vcmp.lt.s32.totalorder %v7125_v29, 2 }
 0x42b   : > { %vm2827_vm11 = vcmp.lt.s32.totalorder %v7125_v29, 3  ;;  %5011 = vsinq.f32 %v2673_v37  ;;  %vm7158_vm14 = vcmp.le.f32.partialorder %v2481_v45, 0.7853982  ;;  %v2547_v43 = vsub.s32 0, %v7143_v41 }
 0x42c   : > { %v2809_v7 = vshrl.u32 %v8579_v8, %v2808_v63  ;;  %vm2828_vm12 = vcmp.lt.s32.totalorder %v7125_v29, 4  ;;  %v2567_v50 = vsub.s32 4, %v2543_v39  ;;  %v2833_v44 = vsel %vm2825_vm9, %v2812_v20, %v2815_v38 }
 0x42d   : > { %v2830_v40 = vsel %vm2828_vm12, %v2818_v24, 2102212464  ;;  %v2834_v23 = vsel %vm2828_vm12, %v2821_v4, 920167782  ;;  %v4628_v11 = vmin.u32 %v2547_v43, %v7143_v41  ;;  %v2837_v61 = vsel %vm2825_vm9, %v2815_v38, %v2818_v24 }
 0x42e   : > { %v2835_v45 = vsel %vm2827_vm11, %v2818_v24, %v2834_v23  ;;  %v2838_v10 = vsel %vm2828_vm12, %v2824_v16, 1326507024  ;;  %v2679_v2 = vand.u32 3, %v2678_v3  ;;  %v2841_v31 = vshll.u32 %v2801_v30, 8  ;;  %v850_v23 = vpop.permute.xlu0 %849 }
 0x42f   : > { %v2836_v62 = vsel %vm2826_vm10, %v2833_v44, %v2835_v45  ;;  %v2839_v42 = vsel %vm2827_vm11, %v2821_v4, %v2838_v10  ;;  %v2549_v13 = vclz %v4628_v11  ;;  %v2829_v21 = vsel %vm2825_vm9, %v2809_v7, %v2812_v20  ;;  %v7216_v10 = vld [vmem:[%s8518_s5] ss:$0 sm:$0xff] }
 0x430   : > { %v2831_v35 = vsel %vm2827_vm11, %v2815_v38, %v2830_v40  ;;  %v944_v14 = vmul.f32 %v6853_v49, %v854_v59  ;;  %v2840_v12 = vsel %vm2826_vm10, %v2837_v61, %v2839_v42  ;;  %v2692_v27 = vand.u32 2139095040, %v7151_v55 }
 0x431   : > { %v7183_v36 = vmul.u32.u64.low %v2841_v31, %v2836_v62  ;;  %v7184_v3 = vmul.u32.u64.high %v2841_v31, %v2836_v62, %v7183_v36  ;;  %vm2677_vm13 = vweird.f32 %v6876_v1  ;;  %v4629_v63 = vadd.s32 4294967294, %v2549_v13  ;;  %v8624_v62 = vld [vmem:[#allocation23_spill] sm:$0xff] }
 0x432   : > { %v2568_v26 = vsel %vm2483_vm8, %v2567_v50, %v2543_v39  ;;  %v7191_v34 = vmul.u32.u64.low %v2841_v31, %v2840_v12  ;;  %v7192_v9 = vmul.u32.u64.high %v2841_v31, %v2840_v12, %v7191_v34  ;;  %vm2680_vm15 = vcmp.lt.s32.totalorder %v2679_v2, 2 }
 0x433   : > { %vm2681_vm0 = vcmp.eq.s32.totalorder %v2679_v2, 0  ;;  %v2832_v6 = vsel %vm2826_vm10, %v2829_v21, %v2831_v35  ;;  %v2693_v60 = vshrl.u32 %v2692_v27, 23  ;;  %vm2684_vm1 = vcmp.eq.s32.totalorder %v2679_v2, 2 }
 0x434   : > { %v2537_v33 = vadd.s32 %v7086_v58, %v7099_v53  ;;  %vm4630_vm2 = vcmp.lt.s32.totalorder %v4629_v63, 0  ;;  %v2689_v57 = vand.u32 2147483647, %v7151_v55  ;;  %v5010_v5 = vpop.eup %5009  ;;  %v2570_v39 = vsel %vm7158_vm14, 0, %v2568_v26 }
 0x435   : > { %v2552_v32 = vsel %vm4630_vm2, 0, %v4629_v63  ;;  %v2851_v0 = vadd.s32 1, %v7184_v3  ;;  %v4635_v25 = vadd.s32 4294967169, %v2693_v60  ;;  %v5012_v52 = vpop.eup %5011  ;;  %v2685_v30 = vxor.u32 2147483648, %v5010_v5 }
 0x436   : > { %v2553_v29 = vsub.s32 32, %v2552_v32  ;;  %v2557_v20 = vsub.s32 4294967266, %v2552_v32  ;;  %v2848_v51 = vmul.u32 %v2841_v31, %v2832_v6  ;;  %v2682_v17 = vxor.u32 2147483648, %v5012_v52  ;;  %v8625_v31 = vld [vmem:[#allocation17_spill] sm:$0xff] }
 0x437   : > { %v2554_v38 = vshll.u32 %v7143_v41, %v2552_v32  ;;  %vm2850_vm3 = vc.u32 %v7192_v9, %v7183_v36  ;;  %v2699_v58 = vadd.s32 1, %v4635_v25  ;;  %v2686_v53 = vsel %vm2684_vm1, %v2685_v30, %v5012_v52 }
 0x438   : > { %v2555_v24 = vshrl.u32 %v2537_v33, %v2553_v29  ;;  %v2558_v4 = vadd.s32 127, %v2557_v20  ;;  %v2852_v37 = vsel %vm2850_vm3, %v2851_v0, %v7184_v3  ;;  %v2683_v16 = vsel %vm2681_vm0, %v5010_v5, %v2682_v17 }
 0x439   : > { %v2574_v43 = vadd.s32 3, %v2570_v39  ;;  %v2853_v7 = vadd.s32 %v2852_v37, %v2848_v51  ;;  %vm2700_vm4 = vcmp.gt.s32.totalorder %v2699_v58, 0  ;;  %v2687_v50 = vsel %vm2680_vm15, %v2683_v16, %v2686_v53 }
 0x43a   : > { %v2556_v40 = vor.u32 %v2555_v24, %v2554_v38  ;;  %v2559_v41 = vshll.u32 %v2558_v4, 23  ;;  %v2701_v44 = vsel %vm2700_vm4, %v2699_v58, 0  ;;  %v2688_v59 = vsel %vm2677_vm13, nan, %v2687_v50 }
 0x43b   : > { %v2854_v11 = vadd.s32 536870912, %v2853_v7  ;;  %v2696_v45 = vand.u32 8388607, %v2689_v57  ;;  %v2703_v61 = vand.u32 31, %v2701_v44  ;;  %v732_v2 = vmul.f32 %v7216_v10, %v8624_v62  ;;  %4368 = vst [vmem:[%s5975_s9 + $0x78] sm:$0xff] %v2688_v59 }
 0x43c   : > { %v2560_v42 = vor.u32 4788187, %v2559_v41  ;;  %v7223_v13 = vmul.f32 %v7216_v10, %v8625_v31  ;;  %v7228_v35 = vmul.f32 %v6853_v49, %v850_v23  ;;  %v2563_v3 = vcvt.s32.f32 %v2556_v40 }
 0x43d   : > { %v7225_v1 = vshrl.u32 %v2854_v11, 30  ;;  %v2704_v21 = vsub.s32 32, %v2703_v61  ;;  %v7230_v27 = vand.u32 3, %v2574_v43  ;;  %v976_v63 = vadd.f32 %v944_v14, %v732_v2 }
 0x43e   : > { %v2561_v12 = vand.u32 2147483647, %v2560_v42  ;;  %v2697_v34 = vor.u32 8388608, %v2696_v45  ;;  %v2706_v6 = vshll.u32 %v8579_v8, %v2703_v61  ;;  %v2709_v0 = vshll.u32 %v8580_v19, %v2703_v61 }
 0x43f   : > { %v2856_v26 = vshll.u32 %v7225_v1, 30  ;;  %v2707_v60 = vshrl.u32 %v8580_v19, %v2704_v21  ;;  %v2710_v5 = vshrl.u32 %v8581_v28, %v2704_v21  ;;  %v2713_v32 = vshrl.u32 %v8582_v18, %v2704_v21 }
 0x440   : > { %v2564_v33 = vmul.f32 %v2563_v3, %v2561_v12  ;;  %v2716_v49 = vshrl.u32 %v8583_v15, %v2704_v21  ;;  %v2712_v14 = vshll.u32 %v8581_v28, %v2703_v61  ;;  %v2719_v25 = vshrl.u32 %v8584_v47, %v2704_v21 }
 0x441   : > { %v7238_v39 = vsub.s32 %v2853_v7, %v2856_v26  ;;  %v2702_v30 = vshrl.u32 %v2701_v44, 5  ;;  %v2715_v29 = vshll.u32 %v8582_v18, %v2703_v61  ;;  %v2718_v20 = vshll.u32 %v8583_v15, %v2703_v61 }
 0x442   : > { %v2565_v52 = vxor.u32 2147483648, %v2564_v33  ;;  %v2708_v17 = vor.u32 %v2707_v60, %v2706_v6  ;;  %v2711_v38 = vor.u32 %v2710_v5, %v2709_v0  ;;  %v2714_v58 = vor.u32 %v2713_v32, %v2712_v14 }
 0x443   : > { %v2859_v51 = vsub.s32 0, %v7238_v39  ;;  %vm2795_vm5 = vcmp.lt.s32.totalorder %v7059_v56, 0  ;;  %v2849_v24 = vadd.s32 %v7183_v36, %v7192_v9  ;;  %v2717_v4 = vor.u32 %v2716_v49, %v2715_v29 }
 0x444   : > { %v2566_v53 = vsel %vm2483_vm8, %v2565_v52, %v2564_v33  ;;  %v7252_v37 = vadd.f32 %v7148_v48, %v976_v63  ;;  %v2720_v7 = vor.u32 %v2719_v25, %v2718_v20  ;;  %v2737_v50 = vshll.u32 %v2697_v34, 8 }
 0x445   : > { %v2569_v16 = vsel %vm7158_vm14, %v6970_v22, %v2566_v53  ;;  %v4640_v43 = vmin.u32 %v2859_v51, %v7238_v39  ;;  %v2879_v40 = vsub.s32 4, %v7225_v1  ;;  %vm2721_vm6 = vcmp.lt.s32.totalorder %v2702_v30, 1 }
 0x446   : > { %5013 = vcosq.f32 %v2569_v16  ;;  %vm2724_vm7 = vcmp.lt.s32.totalorder %v2702_v30, 4  ;;  %vm7261_vm8 = vcmp.le.f32.partialorder %v2793_v54, 0.7853982  ;;  %v2729_v46 = vsel %vm2721_vm6, %v2708_v17, %v2711_v38 }
 0x447   : > { %5015 = vsinq.f32 %v2569_v16  ;;  %v2861_v9 = vclz %v4640_v43  ;;  %v2726_v41 = vsel %vm2724_vm7, %v2714_v58, 2102212464  ;;  %v2705_v44 = vshrl.u32 %v8579_v8, %v2704_v21 }
 0x448   : > { %vm2723_vm9 = vcmp.lt.s32.totalorder %v2702_v30, 3  ;;  %v2730_v23 = vsel %vm2724_vm7, %v2717_v4, 920167782  ;;  %v2733_v59 = vsel %vm2721_vm6, %v2711_v38, %v2714_v58  ;;  %vm2722_vm10 = vcmp.lt.s32.totalorder %v2702_v30, 2 }
 0x449   : > { %v4641_v11 = vadd.s32 4294967294, %v2861_v9  ;;  %v2731_v45 = vsel %vm2723_vm9, %v2714_v58, %v2730_v23  ;;  %v2734_v61 = vsel %vm2724_vm7, %v2720_v7, 1326507024  ;;  %v2725_v62 = vsel %vm2721_vm6, %v2705_v44, %v2708_v17 }
 0x44a   : > { %v2727_v2 = vsel %vm2723_vm9, %v2711_v38, %v2726_v41  ;;  %v2732_v42 = vsel %vm2722_vm10, %v2729_v46, %v2731_v45  ;;  %v2735_v54 = vsel %vm2723_vm9, %v2717_v4, %v2734_v61  ;;  %v3004_v34 = vand.u32 2139095040, %v7252_v37  ;;  %v865_v61 = vpop.permute.xlu1 %864 }
 0x44b   : > { %vm4642_vm11 = vcmp.lt.s32.totalorder %v4641_v11, 0  ;;  %v2736_v31 = vsel %vm2722_vm10, %v2733_v59, %v2735_v54  ;;  %v7268_v12 = vmul.u32.u64.low %v2737_v50, %v2732_v42  ;;  %v7269_v3 = vmul.u32.u64.high %v2737_v50, %v2732_v42, %v7268_v12 }
 0x44c   : > { %v2864_v21 = vsel %vm4642_vm11, 0, %v4641_v11  ;;  %v7272_v63 = vmul.u32.u64.low %v2737_v50, %v2736_v31  ;;  %v7273_v26 = vmul.u32.u64.high %v2737_v50, %v2736_v31, %v7272_v63  ;;  %vm2573_vm14 = vweird.f32 %v6970_v22 }
 0x44d   : > { %v2865_v6 = vsub.s32 32, %v2864_v21  ;;  %v2869_v60 = vsub.s32 4294967266, %v2864_v21  ;;  %v2880_v33 = vsel %vm2795_vm5, %v2879_v40, %v7225_v1  ;;  %v2728_v5 = vsel %vm2722_vm10, %v2725_v62, %v2727_v2  ;;  %v8628_v2 = vld [vmem:[#allocation24_spill] sm:$0xff] }
 0x44e   : > { %vm2576_vm12 = vcmp.lt.s32.totalorder %v7230_v27, 2  ;;  %vm2580_vm13 = vcmp.eq.s32.totalorder %v7230_v27, 2  ;;  %v3001_v32 = vand.u32 2147483647, %v7252_v37  ;;  %v3005_v49 = vshrl.u32 %v3004_v34, 23 }
 0x44f   : > { %v2866_v0 = vshll.u32 %v7238_v39, %v2864_v21  ;;  %v2867_v14 = vshrl.u32 %v2849_v24, %v2865_v6  ;;  %v2870_v25 = vadd.s32 127, %v2869_v60  ;;  %v2747_v52 = vadd.s32 1, %v7269_v3  ;;  %v7318_v21 = vld [vmem:[%s8518_s5 + $0x1] ss:$0 sm:$0xff] }
 0x450   : > { %v5014_v29 = vpop.eup %5013  ;;  %v2882_v20 = vsel %vm7261_vm8, 0, %v2880_v33  ;;  %v2744_v1 = vmul.u32 %v2737_v50, %v2728_v5  ;;  %vm2746_vm15 = vc.u32 %v7273_v26, %v7268_v12  ;;  %v4647_v30 = vadd.s32 4294967169, %v3005_v49 }
 0x451   : > { %v5016_v51 = vpop.eup %5015  ;;  %v2581_v17 = vxor.u32 2147483648, %v5014_v29  ;;  %v2868_v38 = vor.u32 %v2867_v14, %v2866_v0  ;;  %v2871_v58 = vshll.u32 %v2870_v25, 23  ;;  %v2748_v53 = vsel %vm2746_vm15, %v2747_v52, %v7269_v3 }
 0x452   : > { %v2578_v39 = vxor.u32 2147483648, %v5016_v51  ;;  %v2749_v24 = vadd.s32 %v2748_v53, %v2744_v1  ;;  %v3011_v4 = vadd.s32 1, %v4647_v30  ;;  %v975_v16 = vadd.f32 %v7228_v35, %v7223_v13 }
 0x453   : > { %vm2577_vm0 = vcmp.eq.s32.totalorder %v7230_v27, 0  ;;  %v2582_v43 = vsel %vm2580_vm13, %v2581_v17, %v5016_v51  ;;  %v2872_v7 = vor.u32 4788187, %v2871_v58  ;;  %v2886_v50 = vadd.s32 3, %v2882_v20 }
 0x454   : > { %v2579_v40 = vsel %vm2577_vm0, %v5014_v29, %v2578_v39  ;;  %v2750_v9 = vadd.s32 536870912, %v2749_v24  ;;  %v3008_v41 = vand.u32 8388607, %v3001_v32  ;;  %vm3012_vm1 = vcmp.gt.s32.totalorder %v3011_v4, 0 }
 0x455   : > { %v2583_v46 = vsel %vm2576_vm12, %v2579_v40, %v2582_v43  ;;  %v2873_v44 = vand.u32 2147483647, %v2872_v7  ;;  %v2875_v23 = vcvt.s32.f32 %v2868_v38  ;;  %v3013_v13 = vsel %vm3012_vm1, %v3011_v4, 0 }
 0x456   : > { %v2584_v35 = vsel %vm2573_vm14, nan, %v2583_v46  ;;  %v7302_v59 = vshrl.u32 %v2750_v9, 30  ;;  %v3015_v11 = vand.u32 31, %v3013_v13  ;;  %v7305_v45 = vadd.f32 %v7148_v48, %v975_v16 }
 0x457   : > { %4367 = vst [vmem:[%s5975_s9 + $0x70] sm:$0xff] %v2584_v35  ;;  %v2876_v62 = vmul.f32 %v2875_v23, %v2873_v44  ;;  %v7310_v42 = vmul.f32 %v7216_v10, %v8628_v2  ;;  %v7313_v3 = vand.u32 3, %v2886_v50  ;;  %v3009_v22 = vor.u32 8388608, %v3008_v41 }
 0x458   : > { %v2752_v27 = vshll.u32 %v7302_v59, 30  ;;  %v3016_v54 = vsub.s32 32, %v3015_v11  ;;  %v7321_v63 = vmul.f32 %v7318_v21, %v865_v61  ;;  %v3014_v6 = vshrl.u32 %v3013_v13, 5 }
 0x459   : > { %v2877_v31 = vxor.u32 2147483648, %v2876_v62  ;;  %v2900_v33 = vand.u32 2139095040, %v7305_v45  ;;  %v3018_v49 = vshll.u32 %v8579_v8, %v3015_v11  ;;  %v3021_v29 = vshll.u32 %v8580_v19, %v3015_v11 }
 0x45a   : > { %v7323_v34 = vsub.s32 %v2749_v24, %v2752_v27  ;;  %v3019_v60 = vshrl.u32 %v8580_v19, %v3016_v54  ;;  %v3022_v0 = vshrl.u32 %v8581_v28, %v3016_v54  ;;  %v3025_v14 = vshrl.u32 %v8582_v18, %v3016_v54 }
 0x45b   : > { %v2878_v5 = vsel %vm2795_vm5, %v2877_v31, %v2876_v62  ;;  %v3024_v20 = vshll.u32 %v8581_v28, %v3015_v11  ;;  %v3027_v30 = vshll.u32 %v8582_v18, %v3015_v11  ;;  %v3028_v51 = vshrl.u32 %v8583_v15, %v3016_v54 }
 0x45c   : > { %v2881_v25 = vsel %vm7261_vm8, %v7059_v56, %v2878_v5  ;;  %v2755_v52 = vsub.s32 0, %v7323_v34  ;;  %v3020_v1 = vor.u32 %v3019_v60, %v3018_v49  ;;  %v3023_v38 = vor.u32 %v3022_v0, %v3021_v29 }
 0x45d   : > { %5017 = vcosq.f32 %v2881_v25  ;;  %v3026_v58 = vor.u32 %v3025_v14, %v3024_v20  ;;  %v3029_v53 = vor.u32 %v3028_v51, %v3027_v30  ;;  %v3030_v36 = vshll.u32 %v8583_v15, %v3015_v11 }
 0x45e   : > { %5019 = vsinq.f32 %v2881_v25  ;;  %v4636_v17 = vmin.u32 %v2755_v52, %v7323_v34  ;;  %v3031_v39 = vshrl.u32 %v8584_v47, %v3016_v54  ;;  %v7343_v24 = vshll.u32 %v3009_v22, 8 }
 0x45f   : > { %v3017_v16 = vshrl.u32 %v8579_v8, %v3016_v54  ;;  %vm3033_vm2 = vcmp.lt.s32.totalorder %v3014_v6, 1  ;;  %v2901_v43 = vshrl.u32 %v2900_v33, 23  ;;  %vm2892_vm3 = vcmp.eq.s32.totalorder %v7313_v3, 2 }
 0x460   : > { %v2757_v4 = vclz %v4636_v17  ;;  %vm2691_vm4 = vcmp.lt.s32.totalorder %v7151_v55, 0  ;;  %v3032_v7 = vor.u32 %v3031_v39, %v3030_v36  ;;  %vm3034_vm5 = vcmp.lt.s32.totalorder %v3014_v6, 2 }
 0x461   : > { %vm3035_vm6 = vcmp.lt.s32.totalorder %v3014_v6, 3  ;;  %vm3036_vm7 = vcmp.lt.s32.totalorder %v3014_v6, 4  ;;  %vm2889_vm8 = vcmp.eq.s32.totalorder %v7313_v3, 0  ;;  %v3041_v9 = vsel %vm3033_vm2, %v3020_v1, %v3023_v38 }
 0x462   : > { %v4637_v50 = vadd.s32 4294967294, %v2757_v4  ;;  %v3038_v40 = vsel %vm3036_vm7, %v3026_v58, 2102212464  ;;  %v3042_v41 = vsel %vm3036_vm7, %v3029_v53, 920167782  ;;  %vm2888_vm9 = vcmp.lt.s32.totalorder %v7313_v3, 2 }
 0x463   : > { %v3037_v46 = vsel %vm3033_vm2, %v3017_v16, %v3020_v1  ;;  %v3043_v44 = vsel %vm3035_vm6, %v3026_v58, %v3042_v41  ;;  %v3045_v23 = vsel %vm3033_vm2, %v3023_v38, %v3026_v58  ;;  %v3046_v13 = vsel %vm3036_vm7, %v3032_v7, 1326507024  ;;  %v861_v7 = vpop.permute.xlu0 %860 }
 0x464   : > { %vm2885_vm10 = vweird.f32 %v7059_v56  ;;  %vm7357_vm11 = vcmp.le.f32.partialorder %v2689_v57, 0.7853982  ;;  %vm4638_vm14 = vcmp.lt.s32.totalorder %v4637_v50, 0  ;;  %v3039_v11 = vsel %vm3035_vm6, %v3023_v38, %v3038_v40 }
 0x465   : > { %v3044_v61 = vsel %vm3034_vm5, %v3041_v9, %v3043_v44  ;;  %v3047_v62 = vsel %vm3035_vm6, %v3029_v53, %v3046_v13  ;;  %v2760_v2 = vsel %vm4638_vm14, 0, %v4637_v50  ;;  %v2745_v57 = vadd.s32 %v7268_v12, %v7273_v26 }
 0x466   : > { %v3048_v27 = vsel %vm3034_vm5, %v3045_v23, %v3047_v62  ;;  %v7366_v54 = vmul.u32.u64.low %v7343_v24, %v3044_v61  ;;  %v7367_v31 = vmul.u32.u64.high %v7343_v24, %v3044_v61, %v7366_v54  ;;  %v2761_v22 = vsub.s32 32, %v2760_v2 }
 0x467   : > { %v2765_v60 = vsub.s32 4294967266, %v2760_v2  ;;  %v2775_v33 = vsub.s32 4, %v7302_v59  ;;  %v5018_v5 = vpop.eup %5017  ;;  %v3040_v49 = vsel %vm3034_vm5, %v3037_v46, %v3039_v11  ;;  %v4643_v25 = vadd.s32 4294967169, %v2901_v43  ;;  %v8631_v46 = vld [vmem:[#allocation18_spill] sm:$0xff] }
 0x468   : > { %v7375_v0 = vmul.u32.u64.low %v7343_v24, %v3048_v27  ;;  %v7376_v14 = vmul.u32.u64.high %v7343_v24, %v3048_v27, %v7375_v0  ;;  %v5020_v52 = vpop.eup %5019  ;;  %v2893_v29 = vxor.u32 2147483648, %v5018_v5  ;;  %v2762_v20 = vshll.u32 %v7323_v34, %v2760_v2 }
 0x469   : > { %v2763_v1 = vshrl.u32 %v2745_v57, %v2761_v22  ;;  %v2766_v30 = vadd.s32 127, %v2765_v60  ;;  %v2890_v51 = vxor.u32 2147483648, %v5020_v52  ;;  %v3059_v12 = vadd.s32 1, %v7367_v31 }
 0x46a   : > { %v2897_v26 = vand.u32 2147483647, %v7305_v45  ;;  %v2907_v17 = vadd.s32 1, %v4643_v25  ;;  %v2894_v6 = vsel %vm2892_vm3, %v2893_v29, %v5020_v52  ;;  %v2776_v53 = vsel %vm2691_vm4, %v2775_v33, %v7302_v59 }
 0x46b   : > { %v2764_v38 = vor.u32 %v2763_v1, %v2762_v20  ;;  %v2767_v58 = vshll.u32 %v2766_v30, 23  ;;  %v2891_v34 = vsel %vm2889_vm8, %v5018_v5, %v2890_v51  ;;  %v3056_v36 = vmul.u32 %v7343_v24, %v3040_v49 }
 0x46c   : > { %vm3058_vm12 = vc.u32 %v7376_v14, %v7366_v54  ;;  %vm2908_vm13 = vcmp.gt.s32.totalorder %v2907_v17, 0  ;;  %v2895_v39 = vsel %vm2888_vm9, %v2891_v34, %v2894_v6  ;;  %v978_v43 = vadd.f32 %v7321_v63, %v7310_v42 }
 0x46d   : > { %v2768_v4 = vor.u32 4788187, %v2767_v58  ;;  %v3060_v16 = vsel %vm3058_vm12, %v3059_v12, %v7367_v31  ;;  %v2896_v59 = vsel %vm2885_vm10, nan, %v2895_v39  ;;  %v2778_v24 = vsel %vm7357_vm11, 0, %v2776_v53 }
 0x46e   : > { %v3061_v50 = vadd.s32 %v3060_v16, %v3056_v36  ;;  %v2909_v40 = vsel %vm2908_vm13, %v2907_v17, 0  ;;  %4370 = vst [vmem:[%s5975_s9 + $0x88] sm:$0xff] %v2896_v59  ;;  %v2771_v41 = vcvt.s32.f32 %v2764_v38  ;;  %v7403_v44 = vmul.f32 %v7216_v10, %v8631_v46 }
 0x46f   : > { %v2769_v9 = vand.u32 2147483647, %v2768_v4  ;;  %v2911_v3 = vand.u32 31, %v2909_v40  ;;  %v2904_v42 = vand.u32 8388607, %v2897_v26  ;;  %v7408_v56 = vmul.f32 %v7318_v21, %v861_v7 }
 0x470   : > { %v3062_v23 = vadd.s32 536870912, %v3061_v50  ;;  %v2782_v13 = vadd.s32 3, %v2778_v24  ;;  %v7411_v61 = vadd.f32 %v7148_v48, %v978_v43  ;;  %v2910_v2 = vshrl.u32 %v2909_v40, 5 }
 0x471   : > { %v2772_v63 = vmul.f32 %v2771_v41, %v2769_v9  ;;  %v2912_v11 = vsub.s32 32, %v2911_v3  ;;  %v2914_v27 = vshll.u32 %v8579_v8, %v2911_v3  ;;  %v2917_v31 = vshll.u32 %v8580_v19, %v2911_v3 }
 0x472   : > { %v3063_v62 = vshrl.u32 %v3062_v23, 30  ;;  %vm3003_vm15 = vcmp.lt.s32.totalorder %v7252_v37, 0  ;;  %v2920_v33 = vshll.u32 %v8581_v28, %v2911_v3  ;;  %v2923_v0 = vshll.u32 %v8582_v18, %v2911_v3 }
 0x473   : > { %v2773_v57 = vxor.u32 2147483648, %v2772_v63  ;;  %v2915_v22 = vshrl.u32 %v8580_v19, %v2912_v11  ;;  %v2918_v60 = vshrl.u32 %v8581_v28, %v2912_v11  ;;  %v2921_v49 = vshrl.u32 %v8582_v18, %v2912_v11 }
 0x474   : > { %v3064_v5 = vshll.u32 %v3063_v62, 30  ;;  %v2924_v25 = vshrl.u32 %v8583_v15, %v2912_v11  ;;  %v2926_v20 = vshll.u32 %v8583_v15, %v2911_v3  ;;  %v2927_v1 = vshrl.u32 %v8584_v47, %v2912_v11 }
 0x475   : > { %v2774_v52 = vsel %vm2691_vm4, %v2773_v57, %v2772_v63  ;;  %v2916_v29 = vor.u32 %v2915_v22, %v2914_v27  ;;  %v2919_v12 = vor.u32 %v2918_v60, %v2917_v31  ;;  %v2922_v17 = vor.u32 %v2921_v49, %v2920_v33 }
 0x476   : > { %v2777_v30 = vsel %vm7357_vm11, %v7151_v55, %v2774_v52  ;;  %v7429_v51 = vsub.s32 %v3061_v50, %v3064_v5  ;;  %v2905_v6 = vor.u32 8388608, %v2904_v42  ;;  %v2925_v38 = vor.u32 %v2924_v25, %v2923_v0 }
 0x477   : > { %5021 = vcosq.f32 %v2777_v30  ;;  %v2928_v58 = vor.u32 %v2927_v1, %v2926_v20  ;;  %vm7433_vm0 = vcmp.le.f32.partialorder %v3001_v32, 0.7853982  ;;  %v3087_v36 = vsub.s32 4, %v3063_v62 }
 0x478   : > { %5023 = vsinq.f32 %v2777_v30  ;;  %v3067_v34 = vsub.s32 0, %v7429_v51  ;;  %v2913_v35 = vshrl.u32 %v8579_v8, %v2912_v11  ;;  %vm2929_vm1 = vcmp.lt.s32.totalorder %v2910_v2, 1 }
 0x479   : > { %vm2931_vm2 = vcmp.lt.s32.totalorder %v2910_v2, 3  ;;  %vm2932_vm3 = vcmp.lt.s32.totalorder %v2910_v2, 4  ;;  %v3212_v39 = vand.u32 2139095040, %v7411_v61  ;;  %v2937_v7 = vsel %vm2929_vm1, %v2916_v29, %v2919_v12 }
 0x47a   : > { %v4648_v4 = vmin.u32 %v3067_v34, %v7429_v51  ;;  %v2933_v16 = vsel %vm2929_vm1, %v2913_v35, %v2916_v29  ;;  %v2934_v43 = vsel %vm2932_vm3, %v2922_v17, 2102212464  ;;  %v2938_v59 = vsel %vm2932_vm3, %v2925_v38, 920167782 }
 0x47b   : > { %v2935_v32 = vsel %vm2931_vm2, %v2919_v12, %v2934_v43  ;;  %v2941_v24 = vsel %vm2929_vm1, %v2919_v12, %v2922_v17  ;;  %v2942_v50 = vsel %vm2932_vm3, %v2928_v58, 1326507024  ;;  %v2783_v40 = vand.u32 3, %v2782_v13 }
 0x47c   : > { %v3069_v9 = vclz %v4648_v4  ;;  %v3088_v41 = vsel %vm3003_vm15, %v3087_v36, %v3063_v62  ;;  %v2945_v3 = vshll.u32 %v2905_v6, 8  ;;  %vm2930_vm4 = vcmp.lt.s32.totalorder %v2910_v2, 2 }
 0x47d   : > { %v2939_v46 = vsel %vm2931_vm2, %v2922_v17, %v2938_v59  ;;  %v2943_v23 = vsel %vm2931_vm2, %v2925_v38, %v2942_v50  ;;  %v3213_v42 = vshrl.u32 %v3212_v39, 23  ;;  %v2936_v11 = vsel %vm2930_vm4, %v2933_v16, %v2935_v32  ;;  %v8634_v50 = vld [vmem:[#allocation25_spill] sm:$0xff] }
 0x47e   : > { %v4649_v63 = vadd.s32 4294967294, %v3069_v9  ;;  %v2940_v27 = vsel %vm2930_vm4, %v2937_v7, %v2939_v46  ;;  %v2944_v31 = vsel %vm2930_vm4, %v2941_v24, %v2943_v23  ;;  %vm2785_vm5 = vcmp.eq.s32.totalorder %v2783_v40, 0 }
 0x47f   : > { %v7446_v57 = vmul.u32.u64.low %v2945_v3, %v2944_v31  ;;  %v7447_v22 = vmul.u32.u64.high %v2945_v3, %v2944_v31, %v7446_v57  ;;  %v7449_v60 = vmul.u32.u64.low %v2945_v3, %v2940_v27  ;;  %v7450_v13 = vmul.u32.u64.high %v2945_v3, %v2940_v27, %v7449_v60 }
 0x480   : > { %vm2788_vm6 = vcmp.eq.s32.totalorder %v2783_v40, 2  ;;  %vm4650_vm7 = vcmp.lt.s32.totalorder %v4649_v63, 0  ;;  %v4655_v62 = vadd.s32 4294967169, %v3213_v42  ;;  %v3057_v2 = vadd.s32 %v7366_v54, %v7376_v14 }
 0x481   : > { %v5022_v33 = vpop.eup %5021  ;;  %v3072_v5 = vsel %vm4650_vm7, 0, %v4649_v63  ;;  %v3090_v49 = vsel %vm7433_vm0, 0, %v3088_v41  ;;  %v3209_v0 = vand.u32 2147483647, %v7411_v61  ;;  %v2952_v1 = vmul.u32 %v2945_v3, %v2936_v11 }
 0x482   : > { %v5024_v25 = vpop.eup %5023  ;;  %v2789_v52 = vxor.u32 2147483648, %v5022_v33  ;;  %v3073_v29 = vsub.s32 32, %v3072_v5  ;;  %v3077_v20 = vsub.s32 4294967266, %v3072_v5  ;;  %v3074_v12 = vshll.u32 %v7429_v51, %v3072_v5 }
 0x483   : > { %v2786_v30 = vxor.u32 2147483648, %v5024_v25  ;;  %vm2954_vm8 = vc.u32 %v7447_v22, %v7449_v60  ;;  %v2955_v17 = vadd.s32 1, %v7450_v13  ;;  %v3219_v38 = vadd.s32 1, %v4655_v62 }
 0x484   : > { %v2790_v54 = vsel %vm2788_vm6, %v2789_v52, %v5024_v25  ;;  %v3075_v14 = vshrl.u32 %v3057_v2, %v3073_v29  ;;  %v3078_v6 = vadd.s32 127, %v3077_v20  ;;  %vm2781_vm9 = vweird.f32 %v7151_v55 }
 0x485   : > { %vm2784_vm10 = vcmp.lt.s32.totalorder %v2783_v40, 2  ;;  %v2787_v58 = vsel %vm2785_vm5, %v5022_v33, %v2786_v30  ;;  %v2956_v34 = vsel %vm2954_vm8, %v2955_v17, %v7450_v13  ;;  %v3094_v16 = vadd.s32 3, %v3090_v49 }
 0x486   : > { %v2791_v36 = vsel %vm2784_vm10, %v2787_v58, %v2790_v54  ;;  %v3076_v51 = vor.u32 %v3075_v14, %v3074_v12  ;;  %v3079_v35 = vshll.u32 %v3078_v6, 23  ;;  %v2957_v39 = vadd.s32 %v2956_v34, %v2952_v1 }
 0x487   : > { %v2792_v4 = vsel %vm2781_vm9, nan, %v2791_v36  ;;  %v3216_v43 = vand.u32 8388607, %v3209_v0  ;;  %vm3220_vm11 = vcmp.gt.s32.totalorder %v3219_v38, 0  ;;  %v977_v55 = vadd.f32 %v7408_v56, %v7403_v44 }
 0x488   : > { %4369 = vst [vmem:[%s5975_s9 + $0x80] sm:$0xff] %v2792_v4  ;;  %v3080_v7 = vor.u32 4788187, %v3079_v35  ;;  %v2958_v32 = vadd.s32 536870912, %v2957_v39  ;;  %v3221_v59 = vsel %vm3220_vm11, %v3219_v38, 0  ;;  %v7473_v40 = vmul.f32 %v7216_v10, %v8634_v50 }
 0x489   : > { %v3223_v24 = vand.u32 31, %v3221_v59  ;;  %v3083_v41 = vcvt.s32.f32 %v3076_v51  ;;  %v7475_v46 = vand.u32 3, %v3094_v16  ;;  %vm2899_vm14 = vcmp.lt.s32.totalorder %v7305_v45, 0 }
 0x48a   : > { %v3081_v9 = vand.u32 2147483647, %v3080_v7  ;;  %v2959_v3 = vshrl.u32 %v2958_v32, 30  ;;  %v3217_v23 = vor.u32 8388608, %v3216_v43  ;;  %v7480_v44 = vadd.f32 %v7148_v48, %v977_v55 }
 0x48b   : > { %v3224_v42 = vsub.s32 32, %v3223_v24  ;;  %v3226_v27 = vshll.u32 %v8579_v8, %v3223_v24  ;;  %v3229_v31 = vshll.u32 %v8580_v19, %v3223_v24  ;;  %v3232_v2 = vshll.u32 %v8581_v28, %v3223_v24 }
 0x48c   : > { %v3084_v63 = vmul.f32 %v3083_v41, %v3081_v9  ;;  %v2960_v11 = vshll.u32 %v2959_v3, 30  ;;  %v2983_v49 = vsub.s32 4, %v2959_v3  ;;  %v3222_v25 = vshrl.u32 %v3221_v59, 5 }
 0x48d   : > { %v3227_v56 = vshrl.u32 %v8580_v19, %v3224_v42  ;;  %v3230_v57 = vshrl.u32 %v8581_v28, %v3224_v42  ;;  %v3233_v13 = vshrl.u32 %v8582_v18, %v3224_v42  ;;  %v3236_v5 = vshrl.u32 %v8583_v15, %v3224_v42 }
 0x48e   : > { %v3085_v62 = vxor.u32 2147483648, %v3084_v63  ;;  %v7486_v33 = vsub.s32 %v2957_v39, %v2960_v11  ;;  %v3235_v48 = vshll.u32 %v8582_v18, %v3223_v24  ;;  %vm7499_vm12 = vcmp.le.f32.partialorder %v2897_v26, 0.7853982 }
 0x48f   : > { %v3228_v52 = vor.u32 %v3227_v56, %v3226_v27  ;;  %v3231_v1 = vor.u32 %v3230_v57, %v3229_v31  ;;  %v3234_v30 = vor.u32 %v3233_v13, %v3232_v2  ;;  %v3238_v14 = vshll.u32 %v8583_v15, %v3223_v24 }
 0x490   : > { %v3086_v29 = vsel %vm3003_vm15, %v3085_v62, %v3084_v63  ;;  %v2963_v20 = vsub.s32 0, %v7486_v33  ;;  %v3237_v54 = vor.u32 %v3236_v5, %v3235_v48  ;;  %v3239_v6 = vshrl.u32 %v8584_v47, %v3224_v42 }
 0x491   : > { %v3089_v12 = vsel %vm7433_vm0, %v7252_v37, %v3086_v29  ;;  %v7506_v58 = vshll.u32 %v3217_v23, 8  ;;  %v3108_v34 = vand.u32 2139095040, %v7480_v44  ;;  %v2984_v53 = vsel %vm2899_vm14, %v2983_v49, %v2959_v3 }
 0x492   : > { %5025 = vcosq.f32 %v3089_v12  ;;  %v4644_v38 = vmin.u32 %v2963_v20, %v7486_v33  ;;  %v3225_v26 = vshrl.u32 %v8579_v8, %v3224_v42  ;;  %v3240_v36 = vor.u32 %v3239_v6, %v3238_v14 }
 0x493   : > { %5027 = vsinq.f32 %v3089_v12  ;;  %vm3241_vm13 = vcmp.lt.s32.totalorder %v3222_v25, 1  ;;  %vm3242_vm15 = vcmp.lt.s32.totalorder %v3222_v25, 2  ;;  %vm3244_vm0 = vcmp.lt.s32.totalorder %v3222_v25, 4 }
 0x494   : > { %v2965_v51 = vclz %v4644_v38  ;;  %vm3243_vm1 = vcmp.lt.s32.totalorder %v3222_v25, 3  ;;  %v3246_v35 = vsel %vm3244_vm0, %v3234_v30, 2102212464  ;;  %v3249_v39 = vsel %vm3241_vm13, %v3228_v52, %v3231_v1 }
 0x495   : > { %v3250_v4 = vsel %vm3244_vm0, %v3237_v54, 920167782  ;;  %vm3100_vm2 = vcmp.eq.s32.totalorder %v7475_v46, 2  ;;  %v3245_v43 = vsel %vm3241_vm13, %v3225_v26, %v3228_v52  ;;  %v3253_v32 = vsel %vm3241_vm13, %v3231_v1, %v3234_v30 }
 0x496   : > { %v4645_v16 = vadd.s32 4294967294, %v2965_v51  ;;  %v3251_v7 = vsel %vm3243_vm1, %v3234_v30, %v3250_v4  ;;  %vm3097_vm3 = vcmp.eq.s32.totalorder %v7475_v46, 0  ;;  %v3247_v59 = vsel %vm3243_vm1, %v3231_v1, %v3246_v35 }
 0x497   : > { %v3252_v55 = vsel %vm3242_vm15, %v3249_v39, %v3251_v7  ;;  %v3254_v24 = vsel %vm3244_vm0, %v3240_v36, 1326507024  ;;  %v3109_v50 = vshrl.u32 %v3108_v34, 23  ;;  %vm3093_vm5 = vweird.f32 %v7252_v37 }
 0x498   : > { %vm4646_vm4 = vcmp.lt.s32.totalorder %v4645_v16, 0  ;;  %v3255_v9 = vsel %vm3243_vm1, %v3237_v54, %v3254_v24  ;;  %v7516_v41 = vmul.u32.u64.low %v7506_v58, %v3252_v55  ;;  %v7517_v3 = vmul.u32.u64.high %v7506_v58, %v3252_v55, %v7516_v41 }
 0x499   : > { %v2968_v23 = vsel %vm4646_vm4, 0, %v4645_v16  ;;  %v3256_v42 = vsel %vm3242_vm15, %v3253_v32, %v3255_v9  ;;  %v3105_v63 = vand.u32 2147483647, %v7480_v44  ;;  %v4651_v11 = vadd.s32 4294967169, %v3109_v50 }
 0x49a   : > { %v2953_v27 = vadd.s32 %v7449_v60, %v7447_v22  ;;  %v2969_v56 = vsub.s32 32, %v2968_v23  ;;  %v2973_v31 = vsub.s32 4294967266, %v2968_v23  ;;  %v2986_v57 = vsel %vm7499_vm12, 0, %v2984_v53  ;;  %v876_v22 = vpop.permute.xlu1 %875 }
 0x49b   : > { %v3248_v13 = vsel %vm3242_vm15, %v3245_v43, %v3247_v59  ;;  %v7529_v62 = vmul.u32.u64.low %v7506_v58, %v3256_v42  ;;  %v7530_v2 = vmul.u32.u64.high %v7506_v58, %v3256_v42, %v7529_v62  ;;  %v3115_v5 = vadd.s32 1, %v4651_v11 }
 0x49c   : > { %v5026_v49 = vpop.eup %5025  ;;  %v2970_v52 = vshll.u32 %v7486_v33, %v2968_v23  ;;  %v2971_v48 = vshrl.u32 %v2953_v27, %v2969_v56  ;;  %v2974_v29 = vadd.s32 127, %v2973_v31  ;;  %v3267_v20 = vadd.s32 1, %v7517_v3 }
 0x49d   : > { %v5028_v60 = vpop.eup %5027  ;;  %v3101_v1 = vxor.u32 2147483648, %v5026_v49  ;;  %v2990_v30 = vadd.s32 3, %v2986_v57  ;;  %v3112_v25 = vand.u32 8388607, %v3105_v63  ;;  %vm3116_vm6 = vcmp.gt.s32.totalorder %v3115_v5, 0 }
 0x49e   : > { %v3098_v12 = vxor.u32 2147483648, %v5028_v60  ;;  %v2972_v54 = vor.u32 %v2971_v48, %v2970_v52  ;;  %v2975_v14 = vshll.u32 %v2974_v29, 23  ;;  %v3117_v6 = vsel %vm3116_vm6, %v3115_v5, 0 }
 0x49f   : > { %v3102_v38 = vsel %vm3100_vm2, %v3101_v1, %v5028_v60  ;;  %v3264_v33 = vmul.u32 %v7506_v58, %v3248_v13  ;;  %vm3266_vm7 = vc.u32 %v7530_v2, %v7516_v41  ;;  %v948_v34 = vmul.f32 %v7318_v21, %v876_v22  ;;  %v7574_v1 = vld [vmem:[%s8518_s5 + $0x2] ss:$0 sm:$0xff] }
 0x4a0   : > { %vm3096_vm8 = vcmp.lt.s32.totalorder %v7475_v46, 2  ;;  %v3099_v53 = vsel %vm3097_vm3, %v5026_v49, %v3098_v12  ;;  %v2976_v26 = vor.u32 4788187, %v2975_v14  ;;  %v3268_v36 = vsel %vm3266_vm7, %v3267_v20, %v7517_v3 }
 0x4a1   : > { %v3103_v51 = vsel %vm3096_vm8, %v3099_v53, %v3102_v38  ;;  %v7546_v35 = vand.u32 3, %v2990_v30  ;;  %v3269_v39 = vadd.s32 %v3268_v36, %v3264_v33  ;;  %v3119_v4 = vand.u32 31, %v3117_v6 }
 0x4a2   : > { %v3104_v58 = vsel %vm3093_vm5, nan, %v3103_v51  ;;  %v2977_v16 = vand.u32 2147483647, %v2976_v26  ;;  %v2979_v43 = vcvt.s32.f32 %v2972_v54  ;;  %v3113_v7 = vor.u32 8388608, %v3112_v25 }
 0x4a3   : > { %4372 = vst [vmem:[%s5975_s9 + $0x98] sm:$0xff] %v3104_v58  ;;  %v3270_v32 = vadd.s32 536870912, %v3269_v39  ;;  %v3118_v59 = vshrl.u32 %v3117_v6, 5  ;;  %v3120_v55 = vsub.s32 32, %v3119_v4  ;;  %v980_v46 = vadd.f32 %v948_v34, %v7473_v40 }
 0x4a4   : > { %v2980_v24 = vmul.f32 %v2979_v43, %v2977_v16  ;;  %v3122_v50 = vshll.u32 %v8579_v8, %v3119_v4  ;;  %v3125_v9 = vshll.u32 %v8580_v19, %v3119_v4  ;;  %v3128_v3 = vshll.u32 %v8581_v28, %v3119_v4  ;;  %v872_v43 = vpop.permute.xlu0 %871 }
 0x4a5   : > { %v3271_v23 = vshrl.u32 %v3270_v32, 30  ;;  %v3123_v37 = vshrl.u32 %v8580_v19, %v3120_v55  ;;  %v3126_v42 = vshrl.u32 %v8581_v28, %v3120_v55  ;;  %v3131_v11 = vshll.u32 %v8582_v18, %v3119_v4 }
 0x4a6   : > { %v2981_v27 = vxor.u32 2147483648, %v2980_v24  ;;  %v3129_v56 = vshrl.u32 %v8582_v18, %v3120_v55  ;;  %v3132_v31 = vshrl.u32 %v8583_v15, %v3120_v55  ;;  %v3135_v40 = vshrl.u32 %v8584_v47, %v3120_v55 }
 0x4a7   : > { %v3272_v57 = vshll.u32 %v3271_v23, 30  ;;  %v3124_v13 = vor.u32 %v3123_v37, %v3122_v50  ;;  %v3134_v62 = vshll.u32 %v8583_v15, %v3119_v4  ;;  %v7562_v5 = vshll.u32 %v3113_v7, 8  ;;  %v8637_v4 = vld [vmem:[#allocation19_spill] sm:$0xff] }
 0x4a8   : > { %v2982_v49 = vsel %vm2899_vm14, %v2981_v27, %v2980_v24  ;;  %v3127_v52 = vor.u32 %v3126_v42, %v3125_v9  ;;  %v3130_v48 = vor.u32 %v3129_v56, %v3128_v3  ;;  %v3133_v29 = vor.u32 %v3132_v31, %v3131_v11 }
 0x4a9   : > { %v2985_v20 = vsel %vm7499_vm12, %v7305_v45, %v2982_v49  ;;  %v7569_v22 = vsub.s32 %v3269_v39, %v3272_v57  ;;  %v3136_v60 = vor.u32 %v3135_v40, %v3134_v62  ;;  %v7577_v30 = vadd.f32 %v7574_v1, %v980_v46 }
 0x4aa   : > { %5029 = vcosq.f32 %v2985_v20  ;;  %vm3137_vm9 = vcmp.lt.s32.totalorder %v3118_v59, 1  ;;  %vm3138_vm10 = vcmp.lt.s32.totalorder %v3118_v59, 2  ;;  %vm3140_vm11 = vcmp.lt.s32.totalorder %v3118_v59, 4 }
 0x4ab   : > { %5031 = vsinq.f32 %v2985_v20  ;;  %v3275_v25 = vsub.s32 0, %v7569_v22  ;;  %vm3139_vm14 = vcmp.lt.s32.totalorder %v3118_v59, 3  ;;  %v3142_v17 = vsel %vm3140_vm11, %v3130_v48, 2102212464 }
 0x4ac   : > { %v3295_v12 = vsub.s32 4, %v3271_v23  ;;  %v3121_v54 = vshrl.u32 %v8579_v8, %v3120_v55  ;;  %v3145_v14 = vsel %vm3137_vm9, %v3124_v13, %v3127_v52  ;;  %v3146_v6 = vsel %vm3140_vm11, %v3133_v29, 920167782 }
 0x4ad   : > { %v4656_v38 = vmin.u32 %v3275_v25, %v7569_v22  ;;  %v3147_v33 = vsel %vm3139_vm14, %v3130_v48, %v3146_v6  ;;  %v3149_v34 = vsel %vm3137_vm9, %v3127_v52, %v3130_v48  ;;  %v3150_v53 = vsel %vm3140_vm11, %v3136_v60, 1326507024  ;;  %v887_v48 = vpop.permute.xlu1 %886 }
 0x4ae   : > { %v3141_v26 = vsel %vm3137_vm9, %v3121_v54, %v3124_v13  ;;  %v3143_v36 = vsel %vm3139_vm14, %v3127_v52, %v3142_v17  ;;  %v3148_v51 = vsel %vm3138_vm10, %v3145_v14, %v3147_v33  ;;  %v3151_v39 = vsel %vm3139_vm14, %v3133_v29, %v3150_v53 }
 0x4af   : > { %v735_v58 = vmul.f32 %v7216_v10, %v8637_v4  ;;  %vm3211_vm12 = vcmp.lt.s32.totalorder %v7411_v61, 0  ;;  %v3277_v16 = vclz %v4656_v38  ;;  %v3152_v32 = vsel %vm3138_vm10, %v3149_v34, %v3151_v39  ;;  %v7635_v4 = vld [vmem:[%s8518_s5] ss:$0 sm:$0xff] }
 0x4b0   : > { %v3296_v7 = vsel %vm3211_vm12, %v3295_v12, %v3271_v23  ;;  %v7590_v55 = vmul.u32.u64.low %v7562_v5, %v3148_v51  ;;  %v7591_v46 = vmul.u32.u64.high %v7562_v5, %v3148_v51, %v7590_v55  ;;  %vm2989_vm13 = vweird.f32 %v7305_v45 }
 0x4b1   : > { %v4657_v24 = vadd.s32 4294967294, %v3277_v16  ;;  %v3144_v50 = vsel %vm3138_vm10, %v3141_v26, %v3143_v36  ;;  %v7597_v10 = vmul.u32.u64.low %v7562_v5, %v3152_v32  ;;  %v7598_v9 = vmul.u32.u64.high %v7562_v5, %v3152_v32, %v7597_v10 }
 0x4b2   : > { %vm2993_vm15 = vcmp.eq.s32.totalorder %v7546_v35, 0  ;;  %vm7603_vm0 = vcmp.le.f32.partialorder %v3209_v0, 0.7853982  ;;  %v3420_v23 = vand.u32 2139095040, %v7577_v30  ;;  %v947_v37 = vmul.f32 %v7318_v21, %v872_v43 }
 0x4b3   : > { %vm2996_vm1 = vcmp.eq.s32.totalorder %v7546_v35, 2  ;;  %v3265_v59 = vadd.s32 %v7516_v41, %v7530_v2  ;;  %vm4658_vm2 = vcmp.lt.s32.totalorder %v4657_v24, 0  ;;  %v3298_v42 = vsel %vm7603_vm0, 0, %v3296_v7 }
 0x4b4   : > { %v5030_v11 = vpop.eup %5029  ;;  %v3280_v27 = vsel %vm4658_vm2, 0, %v4657_v24  ;;  %v3160_v0 = vmul.u32 %v7562_v5, %v3144_v50  ;;  %v3163_v56 = vadd.s32 1, %v7591_v46  ;;  %v3421_v31 = vshrl.u32 %v3420_v23, 23 }
 0x4b5   : > { %v5032_v40 = vpop.eup %5031  ;;  %v2997_v57 = vxor.u32 2147483648, %v5030_v11  ;;  %v3281_v13 = vsub.s32 32, %v3280_v27  ;;  %v3285_v62 = vsub.s32 4294967266, %v3280_v27  ;;  %v3417_v49 = vand.u32 2147483647, %v7577_v30 }
 0x4b6   : > { %v2994_v52 = vxor.u32 2147483648, %v5032_v40  ;;  %v3282_v41 = vshll.u32 %v7569_v22, %v3280_v27  ;;  %vm3162_vm3 = vc.u32 %v7598_v9, %v7590_v55  ;;  %v4663_v2 = vadd.s32 4294967169, %v3421_v31 }
 0x4b7   : > { %v2998_v5 = vsel %vm2996_vm1, %v2997_v57, %v5032_v40  ;;  %v3283_v29 = vshrl.u32 %v3265_v59, %v3281_v13  ;;  %v3286_v20 = vadd.s32 127, %v3285_v62  ;;  %v3164_v60 = vsel %vm3162_vm3, %v3163_v56, %v7591_v46 }
 0x4b8   : > { %vm2992_vm4 = vcmp.lt.s32.totalorder %v7546_v35, 2  ;;  %v2995_v25 = vsel %vm2993_vm15, %v5030_v11, %v2994_v52  ;;  %v3165_v17 = vadd.s32 %v3164_v60, %v3160_v0  ;;  %v3427_v22 = vadd.s32 1, %v4663_v2 }
 0x4b9   : > { %v2999_v12 = vsel %vm2992_vm4, %v2995_v25, %v2998_v5  ;;  %v3284_v54 = vor.u32 %v3283_v29, %v3282_v41  ;;  %v3287_v14 = vshll.u32 %v3286_v20, 23  ;;  %v950_v6 = vmul.f32 %v7318_v21, %v887_v48  ;;  %v8640_v21 = vld [vmem:[#allocation26_spill] sm:$0xff] }
 0x4ba   : > { %v3000_v38 = vsel %vm2989_vm13, nan, %v2999_v12  ;;  %v3302_v33 = vadd.s32 3, %v3298_v42  ;;  %v3166_v34 = vadd.s32 536870912, %v3165_v17  ;;  %vm3428_vm5 = vcmp.gt.s32.totalorder %v3427_v22, 0 }
 0x4bb   : > { %4371 = vst [vmem:[%s5975_s9 + $0x90] sm:$0xff] %v3000_v38  ;;  %v3288_v53 = vor.u32 4788187, %v3287_v14  ;;  %v3424_v26 = vand.u32 8388607, %v3417_v49  ;;  %v3429_v35 = vsel %vm3428_vm5, %v3427_v22, 0  ;;  %v979_v36 = vadd.f32 %v947_v37, %v735_v58 }
 0x4bc   : > { %v3167_v51 = vshrl.u32 %v3166_v34, 30  ;;  %v3431_v39 = vand.u32 31, %v3429_v35  ;;  %v738_v45 = vmul.f32 %v7635_v4, %v8640_v21  ;;  %v3291_v43 = vcvt.s32.f32 %v3284_v54 }
 0x4bd   : > { %v3289_v16 = vand.u32 2147483647, %v3288_v53  ;;  %v7639_v7 = vand.u32 3, %v3302_v33  ;;  %vm3107_vm6 = vcmp.lt.s32.totalorder %v7480_v44, 0  ;;  %v3425_v58 = vor.u32 8388608, %v3424_v26 }
 0x4be   : > { %v3168_v32 = vshll.u32 %v3167_v51, 30  ;;  %v3432_v46 = vsub.s32 32, %v3431_v39  ;;  %v7643_v50 = vadd.f32 %v7574_v1, %v979_v36  ;;  %v7645_v10 = vadd.f32 %v950_v6, %v738_v45 }
 0x4bf   : > { %v3292_v24 = vmul.f32 %v3291_v43, %v3289_v16  ;;  %v3161_v23 = vadd.s32 %v7590_v55, %v7598_v9  ;;  %v7651_v59 = vshrl.u32 %v3429_v35, 5  ;;  %v3434_v27 = vshll.u32 %v8579_v8, %v3431_v39 }
 0x4c0   : > { %v7649_v37 = vsub.s32 %v3165_v17, %v3168_v32  ;;  %v3435_v42 = vshrl.u32 %v8580_v19, %v3432_v46  ;;  %v3438_v0 = vshrl.u32 %v8581_v28, %v3432_v46  ;;  %v3441_v56 = vshrl.u32 %v8582_v18, %v3432_v46 }
 0x4c1   : > { %v3293_v11 = vxor.u32 2147483648, %v3292_v24  ;;  %v3437_v40 = vshll.u32 %v8580_v19, %v3431_v39  ;;  %v3440_v57 = vshll.u32 %v8581_v28, %v3431_v39  ;;  %v3444_v55 = vshrl.u32 %v8583_v15, %v3432_v46 }
 0x4c2   : > { %v3171_v31 = vsub.s32 0, %v7649_v37  ;;  %v3191_v13 = vsub.s32 4, %v3167_v51  ;;  %v3436_v62 = vor.u32 %v3435_v42, %v3434_v27  ;;  %v3443_v52 = vshll.u32 %v8582_v18, %v3431_v39 }
 0x4c3   : > { %v3294_v9 = vsel %vm3211_vm12, %v3293_v11, %v3292_v24  ;;  %v3439_v48 = vor.u32 %v3438_v0, %v3437_v40  ;;  %v3442_v5 = vor.u32 %v3441_v56, %v3440_v57  ;;  %v3446_v20 = vshll.u32 %v8583_v15, %v3431_v39 }
 0x4c4   : > { %v3297_v41 = vsel %vm7603_vm0, %v7411_v61, %v3294_v9  ;;  %v4652_v2 = vmin.u32 %v3171_v31, %v7649_v37  ;;  %v3445_v29 = vor.u32 %v3444_v55, %v3443_v52  ;;  %v3447_v60 = vshrl.u32 %v8584_v47, %v3432_v46 }
 0x4c5   : > { %5033 = vcosq.f32 %v3297_v41  ;;  %vm7672_vm7 = vcmp.le.f32.partialorder %v3105_v63, 0.7853982  ;;  %v7676_v3 = vshll.u32 %v3425_v58, 8  ;;  %v3316_v22 = vand.u32 2139095040, %v7643_v50 }
 0x4c6   : > { %5035 = vsinq.f32 %v3297_v41  ;;  %v3173_v17 = vclz %v4652_v2  ;;  %v3192_v12 = vsel %vm3107_vm6, %v3191_v13, %v3167_v51  ;;  %v3433_v54 = vshrl.u32 %v8579_v8, %v3432_v46 }
 0x4c7   : > { %v3448_v14 = vor.u32 %v3447_v60, %v3446_v20  ;;  %vm3449_vm8 = vcmp.lt.s32.totalorder %v7651_v59, 1  ;;  %vm3451_vm9 = vcmp.lt.s32.totalorder %v7651_v59, 3  ;;  %vm3452_vm10 = vcmp.lt.s32.totalorder %v7651_v59, 4 }
 0x4c8   : > { %v4653_v6 = vadd.s32 4294967294, %v3173_v17  ;;  %v3457_v63 = vsel %vm3449_vm8, %v3436_v62, %v3439_v48  ;;  %v3454_v38 = vsel %vm3452_vm10, %v3442_v5, 2102212464  ;;  %v3458_v33 = vsel %vm3452_vm10, %v3445_v29, 920167782 }
 0x4c9   : > { %v3461_v34 = vsel %vm3449_vm8, %v3439_v48, %v3442_v5  ;;  %v3462_v53 = vsel %vm3452_vm10, %v3448_v14, 1326507024  ;;  %vm3305_vm11 = vcmp.eq.s32.totalorder %v7639_v7, 0  ;;  %vm3450_vm12 = vcmp.lt.s32.totalorder %v7651_v59, 2 }
 0x4ca   : > { %vm4654_vm14 = vcmp.lt.s32.totalorder %v4653_v6, 0  ;;  %v3459_v26 = vsel %vm3451_vm9, %v3442_v5, %v3458_v33  ;;  %v3463_v35 = vsel %vm3451_vm9, %v3445_v29, %v3462_v53  ;;  %vm3304_vm13 = vcmp.lt.s32.totalorder %v7639_v7, 2 }
 0x4cb   : > { %v3176_v36 = vsel %vm4654_vm14, 0, %v4653_v6  ;;  %v3453_v51 = vsel %vm3449_vm8, %v3433_v54, %v3436_v62  ;;  %v3460_v39 = vsel %vm3450_vm12, %v3457_v63, %v3459_v26  ;;  %v3464_v21 = vsel %vm3450_vm12, %v3461_v34, %v3463_v35  ;;  %v7742_v34 = vld [vmem:[%s8518_s5 + $0x1] ss:$0 sm:$0xff] }
 0x4cc   : > { %vm3301_vm15 = vweird.f32 %v7411_v61  ;;  %v3177_v45 = vsub.s32 32, %v3176_v36  ;;  %v3181_v16 = vsub.s32 4294967266, %v3176_v36  ;;  %v3455_v43 = vsel %vm3451_vm9, %v3439_v48, %v3454_v38 }
 0x4cd   : > { %v3317_v32 = vshrl.u32 %v3316_v22, 23  ;;  %v7706_v46 = vmul.u32.u64.low %v7676_v3, %v3464_v21  ;;  %v7707_v24 = vmul.u32.u64.high %v7676_v3, %v3464_v21, %v7706_v46  ;;  %v3178_v11 = vshll.u32 %v7649_v37, %v3176_v36  ;;  %v883_v22 = vpop.permute.xlu0 %882 }
 0x4ce   : > { %v7710_v58 = vmul.u32.u64.low %v7676_v3, %v3460_v39  ;;  %v7711_v42 = vmul.u32.u64.high %v7676_v3, %v3460_v39, %v7710_v58  ;;  %v3179_v27 = vshrl.u32 %v3161_v23, %v3177_v45  ;;  %v3182_v0 = vadd.s32 127, %v3181_v16 }
 0x4cf   : > { %v4659_v56 = vadd.s32 4294967169, %v3317_v32  ;;  %v5034_v31 = vpop.eup %5033  ;;  %vm3308_vm0 = vcmp.eq.s32.totalorder %v7639_v7, 2  ;;  %v3194_v40 = vsel %vm7672_vm7, 0, %v3192_v12  ;;  %v3456_v57 = vsel %vm3450_vm12, %v3453_v51, %v3455_v43 }
 0x4d0   : > { %v3313_v55 = vand.u32 2147483647, %v7643_v50  ;;  %v5036_v9 = vpop.eup %5035  ;;  %v3309_v13 = vxor.u32 2147483648, %v5034_v31  ;;  %v3180_v62 = vor.u32 %v3179_v27, %v3178_v11  ;;  %v3183_v52 = vshll.u32 %v3182_v0, 23 }
 0x4d1   : > { %v3323_v41 = vadd.s32 1, %v4659_v56  ;;  %v3306_v37 = vxor.u32 2147483648, %v5036_v9  ;;  %vm3474_vm1 = vc.u32 %v7707_v24, %v7710_v58  ;;  %v3475_v23 = vadd.s32 1, %v7711_v42 }
 0x4d2   : > { %v7726_v2 = vadd.f32 %v7574_v1, %v7645_v10  ;;  %v3310_v59 = vsel %vm3308_vm0, %v3309_v13, %v5036_v9  ;;  %v3184_v48 = vor.u32 4788187, %v3183_v52  ;;  %v3472_v5 = vmul.u32 %v7676_v3, %v3456_v57 }
 0x4d3   : > { %vm3324_vm2 = vcmp.gt.s32.totalorder %v3323_v41, 0  ;;  %v3307_v29 = vsel %vm3305_vm11, %v5034_v31, %v3306_v37  ;;  %v3198_v20 = vadd.s32 3, %v3194_v40  ;;  %v3476_v60 = vsel %vm3474_vm1, %v3475_v23, %v7711_v42 }
 0x4d4   : > { %v3325_v17 = vsel %vm3324_vm2, %v3323_v41, 0  ;;  %v3311_v12 = vsel %vm3304_vm13, %v3307_v29, %v3310_v59  ;;  %v3185_v54 = vand.u32 2147483647, %v3184_v48  ;;  %v3187_v10 = vcvt.s32.f32 %v3180_v62 }
 0x4d5   : > { %v3477_v14 = vadd.s32 %v3476_v60, %v3472_v5  ;;  %v3312_v6 = vsel %vm3301_vm15, nan, %v3311_v12  ;;  %v3327_v63 = vand.u32 31, %v3325_v17  ;;  %v3320_v33 = vand.u32 8388607, %v3313_v55 }
 0x4d6   : > { %4374 = vst [vmem:[%s5975_s9 + $0xa8] sm:$0xff] %v3312_v6  ;;  %v3188_v3 = vmul.f32 %v3187_v10, %v3185_v54  ;;  %v7745_v7 = vmul.f32 %v7742_v34, %v883_v22  ;;  %v7747_v53 = vand.u32 3, %v3198_v20  ;;  %v3326_v26 = vshrl.u32 %v3325_v17, 5 }
 0x4d7   : > { %v3478_v38 = vadd.s32 536870912, %v3477_v14  ;;  %v3328_v61 = vsub.s32 32, %v3327_v63  ;;  %v3628_v35 = vand.u32 2139095040, %v7726_v2  ;;  %v3330_v39 = vshll.u32 %v8579_v8, %v3327_v63 }
 0x4d8   : > { %v3189_v36 = vxor.u32 2147483648, %v3188_v3  ;;  %v3333_v21 = vshll.u32 %v8580_v19, %v3327_v63  ;;  %v3336_v43 = vshll.u32 %v8581_v28, %v3327_v63  ;;  %v3339_v11 = vshll.u32 %v8582_v18, %v3327_v63 }
 0x4d9   : > { %v7750_v51 = vshrl.u32 %v3478_v38, 30  ;;  %v3331_v45 = vshrl.u32 %v8580_v19, %v3328_v61  ;;  %v3334_v16 = vshrl.u32 %v8581_v28, %v3328_v61  ;;  %v3337_v32 = vshrl.u32 %v8582_v18, %v3328_v61 }
 0x4da   : > { %v3190_v46 = vsel %vm3107_vm6, %v3189_v36, %v3188_v3  ;;  %v3340_v27 = vshrl.u32 %v8583_v15, %v3328_v61  ;;  %v3321_v9 = vor.u32 8388608, %v3320_v33  ;;  %v3342_v62 = vshll.u32 %v8583_v15, %v3327_v63 }
 0x4db   : > { %v3480_v42 = vshll.u32 %v7750_v51, 30  ;;  %v3193_v0 = vsel %vm7672_vm7, %v7480_v44, %v3190_v46  ;;  %v3332_v56 = vor.u32 %v3331_v45, %v3330_v39  ;;  %v3335_v31 = vor.u32 %v3334_v16, %v3333_v21 }
 0x4dc   : > { %v3338_v40 = vor.u32 %v3337_v32, %v3336_v43  ;;  %5037 = vcosq.f32 %v3193_v0  ;;  %v3341_v13 = vor.u32 %v3340_v27, %v3339_v11  ;;  %v3343_v52 = vshrl.u32 %v8584_v47, %v3328_v61 }
 0x4dd   : > { %v7766_v57 = vsub.s32 %v3477_v14, %v3480_v42  ;;  %5039 = vsinq.f32 %v3193_v0  ;;  %v3629_v41 = vshrl.u32 %v3628_v35, 23  ;;  %vm3419_vm3 = vcmp.lt.s32.totalorder %v7577_v30, 0 }
 0x4de   : > { %vm3345_vm4 = vcmp.lt.s32.totalorder %v3326_v26, 1  ;;  %vm3347_vm5 = vcmp.lt.s32.totalorder %v3326_v26, 3  ;;  %vm3348_vm6 = vcmp.lt.s32.totalorder %v3326_v26, 4  ;;  %v3344_v25 = vor.u32 %v3343_v52, %v3342_v62 }
 0x4df   : > { %v3483_v37 = vsub.s32 0, %v7766_v57  ;;  %v3350_v23 = vsel %vm3348_vm6, %v3338_v40, 2102212464  ;;  %v3353_v59 = vsel %vm3345_vm4, %v3332_v56, %v3335_v31  ;;  %v3354_v48 = vsel %vm3348_vm6, %v3341_v13, 920167782 }
 0x4e0   : > { %v3329_v29 = vshrl.u32 %v8579_v8, %v3328_v61  ;;  %vm3346_vm7 = vcmp.lt.s32.totalorder %v3326_v26, 2  ;;  %v3355_v20 = vsel %vm3347_vm5, %v3338_v40, %v3354_v48  ;;  %v3357_v17 = vsel %vm3345_vm4, %v3335_v31, %v3338_v40 }
 0x4e1   : > { %v4664_v5 = vmin.u32 %v3483_v37, %v7766_v57  ;;  %v3356_v60 = vsel %vm3346_vm7, %v3353_v59, %v3355_v20  ;;  %v3358_v22 = vsel %vm3348_vm6, %v3344_v25, 1326507024  ;;  %v3361_v12 = vshll.u32 %v3321_v9, 8  ;;  %v898_v25 = vpop.permute.xlu1 %897 }
 0x4e2   : > { %vm3200_vm8 = vcmp.lt.s32.totalorder %v7747_v53, 2  ;;  %vm7781_vm9 = vcmp.le.f32.partialorder %v3417_v49, 0.7853982  ;;  %v3349_v14 = vsel %vm3345_vm4, %v3329_v29, %v3332_v56  ;;  %v3351_v6 = vsel %vm3347_vm5, %v3335_v31, %v3350_v23  ;;  %v8645_v29 = vld [vmem:[#allocation20_spill] sm:$0xff] }
 0x4e3   : > { %v3485_v10 = vclz %v4664_v5  ;;  %vm3197_vm10 = vweird.f32 %v7480_v44  ;;  %v3503_v63 = vsub.s32 4, %v7750_v51  ;;  %v3359_v3 = vsel %vm3347_vm5, %v3341_v13, %v3358_v22 }
 0x4e4   : > { %v7790_v38 = vmul.u32.u64.low %v3361_v12, %v3356_v60  ;;  %v7791_v33 = vmul.u32.u64.high %v3361_v12, %v3356_v60, %v7790_v38  ;;  %vm3201_vm11 = vcmp.eq.s32.totalorder %v7747_v53, 0  ;;  %v3360_v61 = vsel %vm3346_vm7, %v3357_v17, %v3359_v3  ;;  %v8646_v17 = vld [vmem:[#allocation27_spill] sm:$0xff] }
 0x4e5   : > { %v4665_v49 = vadd.s32 4294967294, %v3485_v10  ;;  %v4671_v35 = vadd.s32 4294967169, %v3629_v41  ;;  %vm3204_vm14 = vcmp.eq.s32.totalorder %v7747_v53, 2  ;;  %v3352_v36 = vsel %vm3346_vm7, %v3349_v14, %v3351_v6 }
 0x4e6   : > { %v7798_v39 = vmul.u32.u64.low %v3361_v12, %v3360_v61  ;;  %v7799_v21 = vmul.u32.u64.high %v3361_v12, %v3360_v61, %v7798_v39  ;;  %v5038_v45 = vpop.eup %5037  ;;  %v3473_v16 = vadd.s32 %v7710_v58, %v7707_v24  ;;  %v3625_v43 = vand.u32 2147483647, %v7726_v2 }
 0x4e7   : > { %vm4666_vm12 = vcmp.lt.s32.totalorder %v4665_v49, 0  ;;  %v3635_v32 = vadd.s32 1, %v4671_v35  ;;  %v5040_v46 = vpop.eup %5039  ;;  %v3205_v42 = vxor.u32 2147483648, %v5038_v45  ;;  %v3504_v27 = vsel %vm3419_vm3, %v3503_v63, %v7750_v51 }
 0x4e8   : > { %v3488_v11 = vsel %vm4666_vm12, 0, %v4665_v49  ;;  %v3371_v26 = vadd.s32 1, %v7791_v33  ;;  %v3202_v0 = vxor.u32 2147483648, %v5040_v46  ;;  %v3368_v40 = vmul.u32 %v3361_v12, %v3352_v36 }
 0x4e9   : > { %v3489_v56 = vsub.s32 32, %v3488_v11  ;;  %v3493_v31 = vsub.s32 4294967266, %v3488_v11  ;;  %v3206_v24 = vsel %vm3204_vm14, %v3205_v42, %v5040_v46  ;;  %v3490_v58 = vshll.u32 %v7766_v57, %v3488_v11 }
 0x4ea   : > { %vm3370_vm13 = vc.u32 %v7799_v21, %v7790_v38  ;;  %vm3636_vm15 = vcmp.gt.s32.totalorder %v3635_v32, 0  ;;  %v3203_v9 = vsel %vm3201_vm11, %v5038_v45, %v3202_v0  ;;  %v3506_v41 = vsel %vm7781_vm9, 0, %v3504_v27 }
 0x4eb   : > { %v3491_v51 = vshrl.u32 %v3473_v16, %v3489_v56  ;;  %v3494_v13 = vadd.s32 127, %v3493_v31  ;;  %v3372_v62 = vsel %vm3370_vm13, %v3371_v26, %v7791_v33  ;;  %v3207_v52 = vsel %vm3200_vm8, %v3203_v9, %v3206_v24 }
 0x4ec   : > { %v3373_v37 = vadd.s32 %v3372_v62, %v3368_v40  ;;  %v3637_v57 = vsel %vm3636_vm15, %v3635_v32, 0  ;;  %v3208_v23 = vsel %vm3197_vm10, nan, %v3207_v52  ;;  %v3632_v5 = vand.u32 8388607, %v3625_v43 }
 0x4ed   : > { %v3492_v59 = vor.u32 %v3491_v51, %v3490_v58  ;;  %v3495_v48 = vshll.u32 %v3494_v13, 23  ;;  %v737_v20 = vmul.f32 %v7635_v4, %v8645_v29  ;;  %4373 = vst [vmem:[%s5975_s9 + $0xa0] sm:$0xff] %v3208_v23  ;;  %v3639_v60 = vand.u32 31, %v3637_v57 }
 0x4ee   : > { %v3374_v53 = vadd.s32 536870912, %v3373_v37  ;;  %v7829_v22 = vmul.f32 %v7635_v4, %v8646_v17  ;;  %v7832_v10 = vmul.f32 %v7742_v34, %v898_v25  ;;  %v3510_v44 = vadd.s32 3, %v3506_v41 }
 0x4ef   : > { %v3496_v12 = vor.u32 4788187, %v3495_v48  ;;  %v3640_v6 = vsub.s32 32, %v3639_v60  ;;  %v981_v63 = vadd.f32 %v7745_v7, %v737_v20  ;;  %v3499_v33 = vcvt.s32.f32 %v3492_v59 }
 0x4f0   : > { %v3375_v14 = vshrl.u32 %v3374_v53, 30  ;;  %v3633_v49 = vor.u32 8388608, %v3632_v5  ;;  %v3638_v61 = vshrl.u32 %v3637_v57, 5  ;;  %v3642_v36 = vshll.u32 %v8579_v8, %v3639_v60 }
 0x4f1   : > { %v3497_v3 = vand.u32 2147483647, %v3496_v12  ;;  %v3643_v39 = vshrl.u32 %v8580_v19, %v3640_v6  ;;  %v3645_v45 = vshll.u32 %v8580_v19, %v3639_v60  ;;  %v3646_v32 = vshrl.u32 %v8581_v28, %v3640_v6 }
 0x4f2   : > { %v3376_v35 = vshll.u32 %v3375_v14, 30  ;;  %v3649_v46 = vshrl.u32 %v8582_v18, %v3640_v6  ;;  %v3652_v42 = vshrl.u32 %v8583_v15, %v3640_v6  ;;  %v3648_v7 = vshll.u32 %v8581_v28, %v3639_v60 }
 0x4f3   : > { %v3500_v16 = vmul.f32 %v3499_v33, %v3497_v3  ;;  %v3651_v27 = vshll.u32 %v8582_v18, %v3639_v60  ;;  %v3655_v26 = vshrl.u32 %v8584_v47, %v3640_v6  ;;  %v7846_v56 = vand.u32 3, %v3510_v44 }
 0x4f4   : > { %v7841_v11 = vsub.s32 %v3373_v37, %v3376_v35  ;;  %v3644_v31 = vor.u32 %v3643_v39, %v3642_v36  ;;  %v3647_v40 = vor.u32 %v3646_v32, %v3645_v45  ;;  %vm3315_vm0 = vcmp.lt.s32.totalorder %v7643_v50, 0 }
 0x4f5   : > { %v3501_v0 = vxor.u32 2147483648, %v3500_v16  ;;  %v3650_v58 = vor.u32 %v3649_v46, %v3648_v7  ;;  %v3653_v9 = vor.u32 %v3652_v42, %v3651_v27  ;;  %v3654_v51 = vshll.u32 %v8583_v15, %v3639_v60 }
 0x4f6   : > { %v3379_v24 = vsub.s32 0, %v7841_v11  ;;  %vm3657_vm1 = vcmp.lt.s32.totalorder %v3638_v61, 1  ;;  %v3673_v62 = vshll.u32 %v3633_v49, 8  ;;  %v7854_v52 = vadd.f32 %v7574_v1, %v981_v63 }
 0x4f7   : > { %v3502_v13 = vsel %vm3419_vm3, %v3501_v0, %v3500_v16  ;;  %v3656_v57 = vor.u32 %v3655_v26, %v3654_v51  ;;  %vm3660_vm2 = vcmp.lt.s32.totalorder %v3638_v61, 4  ;;  %v3641_v25 = vshrl.u32 %v8579_v8, %v3640_v6 }
 0x4f8   : > { %v3505_v41 = vsel %vm7781_vm9, %v7577_v30, %v3502_v13  ;;  %v4660_v37 = vmin.u32 %v3379_v24, %v7841_v11  ;;  %v3665_v23 = vsel %vm3657_vm1, %v3644_v31, %v3647_v40  ;;  %v3666_v59 = vsel %vm3660_vm2, %v3653_v9, 920167782 }
 0x4f9   : > { %5041 = vcosq.f32 %v3505_v41  ;;  %vm3659_vm3 = vcmp.lt.s32.totalorder %v3638_v61, 3  ;;  %v3662_v5 = vsel %vm3660_vm2, %v3650_v58, 2102212464  ;;  %v3399_v29 = vsub.s32 4, %v3375_v14 }
 0x4fa   : > { %5043 = vsinq.f32 %v3505_v41  ;;  %v3381_v48 = vclz %v4660_v37  ;;  %vm3658_vm4 = vcmp.lt.s32.totalorder %v3638_v61, 2  ;;  %v3667_v54 = vsel %vm3659_vm3, %v3650_v58, %v3666_v59 }
 0x4fb   : > { %v3669_v20 = vsel %vm3657_vm1, %v3647_v40, %v3650_v58  ;;  %v3661_v60 = vsel %vm3657_vm1, %v3641_v25, %v3644_v31  ;;  %v3668_v17 = vsel %vm3658_vm4, %v3665_v23, %v3667_v54  ;;  %v3670_v12 = vsel %vm3660_vm2, %v3656_v57, 1326507024 }
 0x4fc   : > { %v4661_v53 = vadd.s32 4294967294, %v3381_v48  ;;  %v3663_v44 = vsel %vm3659_vm3, %v3647_v40, %v3662_v5  ;;  %v3671_v6 = vsel %vm3659_vm3, %v3653_v9, %v3670_v12  ;;  %v3369_v33 = vadd.s32 %v7790_v38, %v7799_v21  ;;  %v894_v12 = vpop.permute.xlu0 %893 }
 0x4fd   : > { %v7868_v63 = vmul.u32.u64.low %v3673_v62, %v3668_v17  ;;  %v7869_v3 = vmul.u32.u64.high %v3673_v62, %v3668_v17, %v7868_v63  ;;  %v3672_v49 = vsel %vm3658_vm4, %v3669_v20, %v3671_v6  ;;  %v3524_v35 = vand.u32 2139095040, %v7854_v52  ;;  %v8649_v6 = vld [vmem:[#allocation21_spill] sm:$0xff] }
 0x4fe   : > { %vm4662_vm5 = vcmp.lt.s32.totalorder %v4661_v53, 0  ;;  %v3400_v39 = vsel %vm3315_vm0, %v3399_v29, %v3375_v14  ;;  %v7878_v45 = vmul.u32.u64.low %v3673_v62, %v3672_v49  ;;  %v7879_v16 = vmul.u32.u64.high %v3673_v62, %v3672_v49, %v7878_v45 }
 0x4ff   : > { %v3384_v36 = vsel %vm4662_vm5, 0, %v4661_v53  ;;  %vm3509_vm6 = vweird.f32 %v7577_v30  ;;  %v3664_v42 = vsel %vm3658_vm4, %v3661_v60, %v3663_v44  ;;  %v3525_v7 = vshrl.u32 %v3524_v35, 23 }
 0x500   : > { %v3385_v32 = vsub.s32 32, %v3384_v36  ;;  %v3389_v46 = vsub.s32 4294967266, %v3384_v36  ;;  %vm3512_vm7 = vcmp.lt.s32.totalorder %v7846_v56, 2  ;;  %vm3516_vm8 = vcmp.eq.s32.totalorder %v7846_v56, 2 }
 0x501   : > { %vm7887_vm9 = vcmp.le.f32.partialorder %v3313_v55, 0.7853982  ;;  %v3683_v21 = vadd.s32 1, %v7869_v3  ;;  %v3386_v14 = vshll.u32 %v7841_v11, %v3384_v36  ;;  %v4667_v0 = vadd.s32 4294967169, %v3525_v7 }
 0x502   : > { %v3387_v27 = vshrl.u32 %v3369_v33, %v3385_v32  ;;  %v3390_v26 = vadd.s32 127, %v3389_v46  ;;  %v3402_v31 = vsel %vm7887_vm9, 0, %v3400_v39  ;;  %v3680_v40 = vmul.u32 %v3673_v62, %v3664_v42 }
 0x503   : > { %v5042_v61 = vpop.eup %5041  ;;  %vm3682_vm10 = vc.u32 %v7879_v16, %v7868_v63  ;;  %v3521_v55 = vand.u32 2147483647, %v7854_v52  ;;  %v3531_v37 = vadd.s32 1, %v4667_v0  ;;  %v984_v57 = vadd.f32 %v7832_v10, %v7829_v22 }
 0x504   : > { %v5044_v24 = vpop.eup %5043  ;;  %v3517_v58 = vxor.u32 2147483648, %v5042_v61  ;;  %v3388_v9 = vor.u32 %v3387_v27, %v3386_v14  ;;  %v3391_v51 = vshll.u32 %v3390_v26, 23  ;;  %v3684_v13 = vsel %vm3682_vm10, %v3683_v21, %v7869_v3 }
 0x505   : > { %v3514_v11 = vxor.u32 2147483648, %v5044_v24  ;;  %v3685_v41 = vadd.s32 %v3684_v13, %v3680_v40  ;;  %vm3513_vm11 = vcmp.eq.s32.totalorder %v7846_v56, 0  ;;  %v3406_v23 = vadd.s32 3, %v3402_v31 }
 0x506   : > { %v3518_v62 = vsel %vm3516_vm8, %v3517_v58, %v5044_v24  ;;  %v3392_v25 = vor.u32 4788187, %v3391_v51  ;;  %v3528_v5 = vand.u32 8388607, %v3521_v55  ;;  %vm3532_vm14 = vcmp.gt.s32.totalorder %v3531_v37, 0 }
 0x507   : > { %v3515_v59 = vsel %vm3513_vm11, %v5042_v61, %v3514_v11  ;;  %v3686_v48 = vadd.s32 536870912, %v3685_v41  ;;  %v3395_v20 = vcvt.s32.f32 %v3388_v9  ;;  %v3533_v22 = vsel %vm3532_vm14, %v3531_v37, 0 }
 0x508   : > { %v3519_v29 = vsel %vm3512_vm7, %v3515_v59, %v3518_v62  ;;  %v3393_v54 = vand.u32 2147483647, %v3392_v25  ;;  %v3535_v60 = vand.u32 31, %v3533_v22  ;;  %v7913_v17 = vadd.f32 %v7574_v1, %v984_v57 }
 0x509   : > { %v3520_v10 = vsel %vm3509_vm6, nan, %v3519_v29  ;;  %v7910_v53 = vshrl.u32 %v3686_v48, 30  ;;  %v7918_v3 = vmul.f32 %v7635_v4, %v8649_v6  ;;  %v7921_v35 = vand.u32 3, %v3406_v23 }
 0x50a   : > { %4376 = vst [vmem:[%s5975_s9 + $0xb8] sm:$0xff] %v3520_v10  ;;  %v3396_v44 = vmul.f32 %v3395_v20, %v3393_v54  ;;  %v3536_v33 = vsub.s32 32, %v3535_v60  ;;  %v3529_v30 = vor.u32 8388608, %v3528_v5  ;;  %v7924_v36 = vmul.f32 %v7742_v34, %v894_v12 }
 0x50b   : > { %v3688_v56 = vshll.u32 %v7910_v53, 30  ;;  %v3534_v45 = vshrl.u32 %v3533_v22, 5  ;;  %v3836_v46 = vand.u32 2139095040, %v7913_v17  ;;  %v3538_v42 = vshll.u32 %v8579_v8, %v3535_v60 }
 0x50c   : > { %v3397_v49 = vxor.u32 2147483648, %v3396_v44  ;;  %v3539_v32 = vshrl.u32 %v8580_v19, %v3536_v33  ;;  %v3542_v7 = vshrl.u32 %v8581_v28, %v3536_v33  ;;  %v3545_v21 = vshrl.u32 %v8582_v18, %v3536_v33 }
 0x50d   : > { %v7926_v39 = vsub.s32 %v3685_v41, %v3688_v56  ;;  %v3541_v26 = vshll.u32 %v8580_v19, %v3535_v60  ;;  %v3544_v0 = vshll.u32 %v8581_v28, %v3535_v60  ;;  %v3547_v31 = vshll.u32 %v8582_v18, %v3535_v60 }
 0x50e   : > { %v3398_v4 = vsel %vm3315_vm0, %v3397_v49, %v3396_v44  ;;  %v3540_v61 = vor.u32 %v3539_v32, %v3538_v42  ;;  %v3548_v40 = vshrl.u32 %v8583_v15, %v3536_v33  ;;  %v3550_v38 = vshll.u32 %v8583_v15, %v3535_v60 }
 0x50f   : > { %v3401_v14 = vsel %vm7887_vm9, %v7643_v50, %v3398_v4  ;;  %v3691_v27 = vsub.s32 0, %v7926_v39  ;;  %v3543_v58 = vor.u32 %v3542_v7, %v3541_v26  ;;  %v3546_v9 = vor.u32 %v3545_v21, %v3544_v0 }
 0x510   : > { %5045 = vcosq.f32 %v3401_v14  ;;  %v3549_v51 = vor.u32 %v3548_v40, %v3547_v31  ;;  %v3551_v13 = vshrl.u32 %v8584_v47, %v3536_v33  ;;  %v3569_v11 = vshll.u32 %v3529_v30, 8 }
 0x511   : > { %5047 = vsinq.f32 %v3401_v14  ;;  %v4672_v24 = vmin.u32 %v3691_v27, %v7926_v39  ;;  %v3537_v37 = vshrl.u32 %v8579_v8, %v3536_v33  ;;  %vm3553_vm12 = vcmp.lt.s32.totalorder %v3534_v45, 1 }
 0x512   : > { %v3837_v57 = vshrl.u32 %v3836_v46, 23  ;;  %v3552_v62 = vor.u32 %v3551_v13, %v3550_v38  ;;  %vm3554_vm13 = vcmp.lt.s32.totalorder %v3534_v45, 2  ;;  %vm3555_vm15 = vcmp.lt.s32.totalorder %v3534_v45, 3 }
 0x513   : > { %v3693_v41 = vclz %v4672_v24  ;;  %vm3556_vm0 = vcmp.lt.s32.totalorder %v3534_v45, 4  ;;  %vm3409_vm1 = vcmp.eq.s32.totalorder %v7921_v35, 0  ;;  %v3561_v59 = vsel %vm3553_vm12, %v3540_v61, %v3543_v58 }
 0x514   : > { %v3558_v23 = vsel %vm3556_vm0, %v3546_v9, 2102212464  ;;  %v3562_v48 = vsel %vm3556_vm0, %v3549_v51, 920167782  ;;  %vm3408_vm2 = vcmp.lt.s32.totalorder %v7921_v35, 2  ;;  %v3557_v5 = vsel %vm3553_vm12, %v3537_v37, %v3540_v61 }
 0x515   : > { %v4673_v25 = vadd.s32 4294967294, %v3693_v41  ;;  %v3563_v29 = vsel %vm3555_vm15, %v3546_v9, %v3562_v48  ;;  %v3565_v54 = vsel %vm3553_vm12, %v3543_v58, %v3546_v9  ;;  %v3566_v20 = vsel %vm3556_vm0, %v3552_v62, 1326507024 }
 0x516   : > { %vm3405_vm3 = vweird.f32 %v7643_v50  ;;  %vm3627_vm4 = vcmp.lt.s32.totalorder %v7726_v2, 0  ;;  %v3559_v22 = vsel %vm3555_vm15, %v3543_v58, %v3558_v23  ;;  %v3564_v10 = vsel %vm3554_vm13, %v3561_v59, %v3563_v29 }
 0x517   : > { %vm4674_vm5 = vcmp.lt.s32.totalorder %v4673_v25, 0  ;;  %v3567_v60 = vsel %vm3555_vm15, %v3549_v51, %v3566_v20  ;;  %v7956_v6 = vmul.u32.u64.low %v3569_v11, %v3564_v10  ;;  %v7957_v56 = vmul.u32.u64.high %v3569_v11, %v3564_v10, %v7956_v6 }
 0x518   : > { %v3696_v12 = vsel %vm4674_vm5, 0, %v4673_v25  ;;  %v3568_v44 = vsel %vm3554_vm13, %v3565_v54, %v3567_v60  ;;  %vm3412_vm6 = vcmp.eq.s32.totalorder %v7921_v35, 2  ;;  %v3681_v33 = vadd.s32 %v7868_v63, %v7879_v16 }
 0x519   : > { %v3697_v49 = vsub.s32 32, %v3696_v12  ;;  %v3701_v30 = vsub.s32 4294967266, %v3696_v12  ;;  %v3560_v46 = vsel %vm3554_vm13, %v3557_v5, %v3559_v22  ;;  %v4679_v7 = vadd.s32 4294967169, %v3837_v57 }
 0x51a   : > { %v5046_v32 = vpop.eup %5045  ;;  %v7964_v4 = vmul.u32.u64.low %v3569_v11, %v3568_v44  ;;  %v7965_v42 = vmul.u32.u64.high %v3569_v11, %v3568_v44, %v7964_v4  ;;  %v3698_v27 = vshll.u32 %v7926_v39, %v3696_v12  ;;  %v3711_v31 = vsub.s32 4, %v7910_v53 }
 0x51b   : > { %v5048_v21 = vpop.eup %5047  ;;  %v3413_v14 = vxor.u32 2147483648, %v5046_v32  ;;  %v3699_v26 = vshrl.u32 %v3681_v33, %v3697_v49  ;;  %v3702_v0 = vadd.s32 127, %v3701_v30  ;;  %v3579_v63 = vadd.s32 1, %v7957_v56 }
 0x51c   : > { %v3410_v61 = vxor.u32 2147483648, %v5048_v21  ;;  %v3843_v16 = vadd.s32 1, %v4679_v7  ;;  %v3833_v58 = vand.u32 2147483647, %v7913_v17  ;;  %v3576_v39 = vmul.u32 %v3569_v11, %v3560_v46 }
 0x51d   : > { %v3414_v45 = vsel %vm3412_vm6, %v3413_v14, %v5048_v21  ;;  %v3700_v40 = vor.u32 %v3699_v26, %v3698_v27  ;;  %v3703_v24 = vshll.u32 %v3702_v0, 23  ;;  %vm3578_vm7 = vc.u32 %v7965_v42, %v7956_v6 }
 0x51e   : > { %v3411_v9 = vsel %vm3409_vm1, %v5046_v32, %v3410_v61  ;;  %vm3844_vm8 = vcmp.gt.s32.totalorder %v3843_v16, 0  ;;  %v3580_v13 = vsel %vm3578_vm7, %v3579_v63, %v7957_v56  ;;  %v983_v41 = vadd.f32 %v7924_v36, %v7918_v3 }
 0x51f   : > { %v3415_v51 = vsel %vm3408_vm2, %v3411_v9, %v3414_v45  ;;  %v3704_v38 = vor.u32 4788187, %v3703_v24  ;;  %v3712_v11 = vsel %vm3627_vm4, %v3711_v31, %v7910_v53  ;;  %v3581_v57 = vadd.s32 %v3580_v13, %v3576_v39 }
 0x520   : > { %v3416_v37 = vsel %vm3405_vm3, nan, %v3415_v51  ;;  %v3845_v62 = vsel %vm3844_vm8, %v3843_v16, 0  ;;  %v3707_v23 = vcvt.s32.f32 %v3700_v40  ;;  %vm7990_vm9 = vcmp.le.f32.partialorder %v3625_v43, 0.7853982 }
 0x521   : > { %4375 = vst [vmem:[%s5975_s9 + $0xb0] sm:$0xff] %v3416_v37  ;;  %v3705_v25 = vand.u32 2147483647, %v3704_v38  ;;  %v3847_v35 = vand.u32 31, %v3845_v62  ;;  %v3582_v3 = vadd.s32 536870912, %v3581_v57  ;;  %v3714_v53 = vsel %vm7990_vm9, 0, %v3712_v11 }
 0x522   : > { %v3840_v50 = vand.u32 8388607, %v3833_v58  ;;  %v7999_v5 = vadd.f32 %v7574_v1, %v983_v41  ;;  %v3846_v54 = vshrl.u32 %v3845_v62, 5  ;;  %v3718_v61 = vadd.s32 3, %v3714_v53 }
 0x523   : > { %v3708_v36 = vmul.f32 %v3707_v23, %v3705_v25  ;;  %v3848_v48 = vsub.s32 32, %v3847_v35  ;;  %v8001_v29 = vshrl.u32 %v3582_v3, 30  ;;  %v3850_v43 = vshll.u32 %v8579_v8, %v3847_v35 }
 0x524   : > { %v3853_v20 = vshll.u32 %v8580_v19, %v3847_v35  ;;  %v3856_v12 = vshll.u32 %v8581_v28, %v3847_v35  ;;  %v3859_v1 = vshll.u32 %v8582_v18, %v3847_v35  ;;  %v3862_v32 = vshll.u32 %v8583_v15, %v3847_v35 }
 0x525   : > { %v3709_v22 = vxor.u32 2147483648, %v3708_v36  ;;  %v3851_v10 = vshrl.u32 %v8580_v19, %v3848_v48  ;;  %v3854_v60 = vshrl.u32 %v8581_v28, %v3848_v48  ;;  %v3584_v44 = vshll.u32 %v8001_v29, 30 }
 0x526   : > { %v3857_v56 = vshrl.u32 %v8582_v18, %v3848_v48  ;;  %v3860_v33 = vshrl.u32 %v8583_v15, %v3848_v48  ;;  %v3863_v46 = vshrl.u32 %v8584_v47, %v3848_v48  ;;  %v3841_v27 = vor.u32 8388608, %v3840_v50 }
 0x527   : > { %v3710_v49 = vsel %vm3627_vm4, %v3709_v22, %v3708_v36  ;;  %v3852_v30 = vor.u32 %v3851_v10, %v3850_v43  ;;  %v8019_v7 = vsub.s32 %v3581_v57, %v3584_v44  ;;  %v3855_v21 = vor.u32 %v3854_v60, %v3853_v20 }
 0x528   : > { %v3713_v4 = vsel %vm7990_vm9, %v7726_v2, %v3710_v49  ;;  %v3858_v14 = vor.u32 %v3857_v56, %v3856_v12  ;;  %v3861_v26 = vor.u32 %v3860_v33, %v3859_v1  ;;  %v3864_v0 = vor.u32 %v3863_v46, %v3862_v32 }
 0x529   : > { %5049 = vcosq.f32 %v3713_v4  ;;  %v3587_v31 = vsub.s32 0, %v8019_v7  ;;  %v3849_v63 = vshrl.u32 %v8579_v8, %v3848_v48  ;;  %vm3865_vm10 = vcmp.lt.s32.totalorder %v3846_v54, 1 }
 0x52a   : > { %5051 = vsinq.f32 %v3713_v4  ;;  %vm3867_vm11 = vcmp.lt.s32.totalorder %v3846_v54, 3  ;;  %vm3868_vm14 = vcmp.lt.s32.totalorder %v3846_v54, 4  ;;  %v3732_v16 = vand.u32 2139095040, %v7999_v5 }
 0x52b   : > { %v4668_v45 = vmin.u32 %v3587_v31, %v8019_v7  ;;  %v3869_v40 = vsel %vm3865_vm10, %v3849_v63, %v3852_v30  ;;  %v3870_v24 = vsel %vm3868_vm14, %v3858_v14, 2102212464  ;;  %v3873_v9 = vsel %vm3865_vm10, %v3852_v30, %v3855_v21 }
 0x52c   : > { %v3871_v39 = vsel %vm3867_vm11, %v3855_v21, %v3870_v24  ;;  %v3874_v51 = vsel %vm3868_vm14, %v3861_v26, 920167782  ;;  %v3877_v38 = vsel %vm3865_vm10, %v3855_v21, %v3858_v14  ;;  %v3878_v13 = vsel %vm3868_vm14, %v3864_v0, 1326507024  ;;  %v909_v21 = vpop.permute.xlu1 %908 }
 0x52d   : > { %v3719_v41 = vand.u32 3, %v3718_v61  ;;  %vm3523_vm12 = vcmp.lt.s32.totalorder %v7854_v52, 0  ;;  %v3589_v37 = vclz %v4668_v45  ;;  %v3881_v11 = vshll.u32 %v3841_v27, 8 }
 0x52e   : > { %vm3866_vm13 = vcmp.lt.s32.totalorder %v3846_v54, 2  ;;  %v3875_v57 = vsel %vm3867_vm11, %v3858_v14, %v3874_v51  ;;  %v3879_v62 = vsel %vm3867_vm11, %v3861_v26, %v3878_v13  ;;  %v3733_v25 = vshrl.u32 %v3732_v16, 23 }
 0x52f   : > { %vm3717_vm15 = vweird.f32 %v7726_v2  ;;  %v4669_v23 = vadd.s32 4294967294, %v3589_v37  ;;  %v3872_v35 = vsel %vm3866_vm13, %v3869_v40, %v3871_v39  ;;  %v3876_v59 = vsel %vm3866_vm13, %v3873_v9, %v3875_v57  ;;  %v8068_v39 = vld [vmem:[%s8518_s5] ss:$0 sm:$0xff]  ;;  %v8654_v2 = vld [vmem:[#allocation28_spill] sm:$0xff] }
 0x530   : > { %v3880_v3 = vsel %vm3866_vm13, %v3877_v38, %v3879_v62  ;;  %vm8032_vm0 = vcmp.le.f32.partialorder %v3521_v55, 0.7853982  ;;  %v8039_v48 = vmul.u32.u64.low %v3881_v11, %v3876_v59  ;;  %v8040_v43 = vmul.u32.u64.high %v3881_v11, %v3876_v59, %v8039_v48 }
 0x531   : > { %v8036_v36 = vmul.u32.u64.low %v3881_v11, %v3880_v3  ;;  %v8037_v53 = vmul.u32.u64.high %v3881_v11, %v3880_v3, %v8036_v36  ;;  %vm3721_vm1 = vcmp.eq.s32.totalorder %v3719_v41, 0  ;;  %vm3724_vm2 = vcmp.eq.s32.totalorder %v3719_v41, 2 }
 0x532   : > { %vm4670_vm3 = vcmp.lt.s32.totalorder %v4669_v23, 0  ;;  %v4675_v54 = vadd.s32 4294967169, %v3733_v25  ;;  %v3577_v22 = vadd.s32 %v7956_v6, %v7965_v42  ;;  %v3607_v55 = vsub.s32 4, %v8001_v29 }
 0x533   : > { %v5050_v20 = vpop.eup %5049  ;;  %v3592_v10 = vsel %vm4670_vm3, 0, %v4669_v23  ;;  %v3729_v60 = vand.u32 2147483647, %v7999_v5  ;;  %v3888_v33 = vmul.u32 %v3881_v11, %v3872_v35  ;;  %vm3890_vm4 = vc.u32 %v8037_v53, %v8039_v48  ;;  %v8655_v11 = vld [vmem:[#allocation22_spill] sm:$0xff] }
 0x534   : > { %v5052_v12 = vpop.eup %5051  ;;  %v3725_v44 = vxor.u32 2147483648, %v5050_v20  ;;  %v3593_v56 = vsub.s32 32, %v3592_v10  ;;  %v3597_v1 = vsub.s32 4294967266, %v3592_v10  ;;  %v3594_v30 = vshll.u32 %v8019_v7, %v3592_v10 }
 0x535   : > { %v3722_v49 = vxor.u32 2147483648, %v5052_v12  ;;  %v3891_v32 = vadd.s32 1, %v8040_v43  ;;  %v3739_v4 = vadd.s32 1, %v4675_v54  ;;  %vm3720_vm5 = vcmp.lt.s32.totalorder %v3719_v41, 2 }
 0x536   : > { %v3726_v6 = vsel %vm3724_vm2, %v3725_v44, %v5052_v12  ;;  %v3595_v42 = vshrl.u32 %v3577_v22, %v3593_v56  ;;  %v3598_v46 = vadd.s32 127, %v3597_v1  ;;  %v3608_v27 = vsel %vm3523_vm12, %v3607_v55, %v8001_v29 }
 0x537   : > { %v3723_v14 = vsel %vm3721_vm1, %v5050_v20, %v3722_v49  ;;  %v3892_v7 = vsel %vm3890_vm4, %v3891_v32, %v8040_v43  ;;  %v3736_v16 = vand.u32 8388607, %v3729_v60  ;;  %vm3740_vm6 = vcmp.gt.s32.totalorder %v3739_v4, 0  ;;  %v8092_v49 = vld [vmem:[%s8518_s5 + $0x2] ss:$0 sm:$0xff] }
 0x538   : > { %v3727_v26 = vsel %vm3720_vm5, %v3723_v14, %v3726_v6  ;;  %v3596_v0 = vor.u32 %v3595_v42, %v3594_v30  ;;  %v3599_v61 = vshll.u32 %v3598_v46, 23  ;;  %v3893_v31 = vadd.s32 %v3892_v7, %v3888_v33 }
 0x539   : > { %v3728_v63 = vsel %vm3717_vm15, nan, %v3727_v26  ;;  %v954_v45 = vmul.f32 %v7742_v34, %v909_v21  ;;  %v3610_v29 = vsel %vm8032_vm0, 0, %v3608_v27  ;;  %v3741_v9 = vsel %vm3740_vm6, %v3739_v4, 0 }
 0x53a   : > { %4378 = vst [vmem:[%s5975_s9 + $0xc8] sm:$0xff] %v3728_v63  ;;  %v3600_v40 = vor.u32 4788187, %v3599_v61  ;;  %v3894_v24 = vadd.s32 536870912, %v3893_v31  ;;  %v742_v51 = vmul.f32 %v8068_v39, %v8654_v2  ;;  %v3743_v38 = vand.u32 31, %v3741_v9 }
 0x53b   : > { %v3603_v41 = vcvt.s32.f32 %v3596_v0  ;;  %v8076_v57 = vmul.f32 %v8068_v39, %v8655_v11  ;;  %v3614_v62 = vadd.s32 3, %v3610_v29  ;;  %v3737_v3 = vor.u32 8388608, %v3736_v16 }
 0x53c   : > { %v3601_v13 = vand.u32 2147483647, %v3600_v40  ;;  %v8072_v37 = vshrl.u32 %v3894_v24, 30  ;;  %v3744_v25 = vsub.s32 32, %v3743_v38  ;;  %v986_v23 = vadd.f32 %v954_v45, %v742_v51 }
 0x53d   : > { %v3746_v36 = vshll.u32 %v8579_v8, %v3743_v38  ;;  %v3749_v54 = vshll.u32 %v8580_v19, %v3743_v38  ;;  %v3752_v12 = vshll.u32 %v8581_v28, %v3743_v38  ;;  %v3742_v56 = vshrl.u32 %v3741_v9, 5 }
 0x53e   : > { %v3604_v35 = vmul.f32 %v3603_v41, %v3601_v13  ;;  %v3896_v59 = vshll.u32 %v8072_v37, 30  ;;  %v3747_v43 = vshrl.u32 %v8580_v19, %v3744_v25  ;;  %v3750_v20 = vshrl.u32 %v8581_v28, %v3744_v25 }
 0x53f   : > { %v3753_v22 = vshrl.u32 %v8582_v18, %v3744_v25  ;;  %v3756_v44 = vshrl.u32 %v8583_v15, %v3744_v25  ;;  %v3755_v33 = vshll.u32 %v8582_v18, %v3743_v38  ;;  %v8095_v30 = vadd.f32 %v8092_v49, %v986_v23 }
 0x540   : > { %v3605_v10 = vxor.u32 2147483648, %v3604_v35  ;;  %v8084_v55 = vsub.s32 %v3893_v31, %v3896_v59  ;;  %v3748_v1 = vor.u32 %v3747_v43, %v3746_v36  ;;  %v3751_v42 = vor.u32 %v3750_v20, %v3749_v54 }
 0x541   : > { %v3754_v46 = vor.u32 %v3753_v22, %v3752_v12  ;;  %v3757_v21 = vor.u32 %v3756_v44, %v3755_v33  ;;  %v3758_v14 = vshll.u32 %v8583_v15, %v3743_v38  ;;  %v3759_v27 = vshrl.u32 %v8584_v47, %v3744_v25 }
 0x542   : > { %v3606_v32 = vsel %vm3523_vm12, %v3605_v10, %v3604_v35  ;;  %v3899_v6 = vsub.s32 0, %v8084_v55  ;;  %v8105_v7 = vand.u32 3, %v3614_v62  ;;  %v8108_v0 = vshll.u32 %v3737_v3, 8  ;;  %v905_v62 = vpop.permute.xlu0 %904 }
 0x543   : > { %v3609_v4 = vsel %vm8032_vm0, %v7854_v52, %v3606_v32  ;;  %v3745_v61 = vshrl.u32 %v8579_v8, %v3744_v25  ;;  %v3760_v31 = vor.u32 %v3759_v27, %v3758_v14  ;;  %v4044_v63 = vand.u32 2139095040, %v8095_v30 }
 0x544   : > { %5053 = vcosq.f32 %v3609_v4  ;;  %v4680_v26 = vmin.u32 %v3899_v6, %v8084_v55  ;;  %vm3835_vm7 = vcmp.lt.s32.totalorder %v7913_v17, 0  ;;  %vm3761_vm8 = vcmp.lt.s32.totalorder %v3742_v56, 1 }
 0x545   : > { %5055 = vsinq.f32 %v3609_v4  ;;  %vm3762_vm9 = vcmp.lt.s32.totalorder %v3742_v56, 2  ;;  %vm3764_vm10 = vcmp.lt.s32.totalorder %v3742_v56, 4  ;;  %vm3763_vm11 = vcmp.lt.s32.totalorder %v3742_v56, 3 }
 0x546   : > { %v3901_v50 = vclz %v4680_v26  ;;  %v3766_v16 = vsel %vm3764_vm10, %v3754_v46, 2102212464  ;;  %v3769_v45 = vsel %vm3761_vm8, %v3748_v1, %v3751_v42  ;;  %v3770_v40 = vsel %vm3764_vm10, %v3757_v21, 920167782 }
 0x547   : > { %vm3620_vm14 = vcmp.eq.s32.totalorder %v8105_v7, 2  ;;  %v3765_v24 = vsel %vm3761_vm8, %v3745_v61, %v3748_v1  ;;  %v3771_v9 = vsel %vm3763_vm11, %v3754_v46, %v3770_v40  ;;  %v3773_v2 = vsel %vm3761_vm8, %v3751_v42, %v3754_v46 }
 0x548   : > { %v4681_v29 = vadd.s32 4294967294, %v3901_v50  ;;  %vm8117_vm12 = vcmp.le.f32.partialorder %v3833_v58, 0.7853982  ;;  %v3767_v38 = vsel %vm3763_vm11, %v3751_v42, %v3766_v16  ;;  %v3772_v13 = vsel %vm3762_vm9, %v3769_v45, %v3771_v9 }
 0x549   : > { %v3774_v41 = vsel %vm3764_vm10, %v3760_v31, 1326507024  ;;  %v4045_v11 = vshrl.u32 %v4044_v63, 23  ;;  %vm3616_vm13 = vcmp.lt.s32.totalorder %v8105_v7, 2  ;;  %vm3613_vm0 = vweird.f32 %v7854_v52 }
 0x54a   : > { %vm4682_vm15 = vcmp.lt.s32.totalorder %v4681_v29, 0  ;;  %v3775_v25 = vsel %vm3763_vm11, %v3757_v21, %v3774_v41  ;;  %v8126_v23 = vmul.u32.u64.low %v8108_v0, %v3772_v13  ;;  %v8127_v35 = vmul.u32.u64.high %v8108_v0, %v3772_v13, %v8126_v23 }
 0x54b   : > { %v3904_v58 = vsel %vm4682_vm15, 0, %v4681_v29  ;;  %v3919_v59 = vsub.s32 4, %v8072_v37  ;;  %v3776_v3 = vsel %vm3762_vm9, %v3773_v2, %v3775_v25  ;;  %v4687_v36 = vadd.s32 4294967169, %v4045_v11 }
 0x54c   : > { %v3889_v43 = vadd.s32 %v8039_v48, %v8037_v53  ;;  %v3905_v54 = vsub.s32 32, %v3904_v58  ;;  %v3909_v20 = vsub.s32 4294967266, %v3904_v58  ;;  %v953_v22 = vmul.f32 %v7742_v34, %v905_v62 }
 0x54d   : > { %v3768_v10 = vsel %vm3762_vm9, %v3765_v24, %v3767_v38  ;;  %v8138_v12 = vmul.u32.u64.low %v8108_v0, %v3776_v3  ;;  %v8139_v44 = vmul.u32.u64.high %v8108_v0, %v3776_v3, %v8138_v12  ;;  %v4051_v1 = vadd.s32 1, %v4687_v36 }
 0x54e   : > { %v5054_v33 = vpop.eup %5053  ;;  %v3906_v32 = vshll.u32 %v8084_v55, %v3904_v58  ;;  %v3907_v6 = vshrl.u32 %v3889_v43, %v3905_v54  ;;  %v3910_v42 = vadd.s32 127, %v3909_v20  ;;  %v3787_v46 = vadd.s32 1, %v8127_v35 }
 0x54f   : > { %v5056_v4 = vpop.eup %5055  ;;  %v3621_v53 = vxor.u32 2147483648, %v5054_v33  ;;  %v3920_v34 = vsel %vm3835_vm7, %v3919_v59, %v8072_v37  ;;  %v4041_v48 = vand.u32 2147483647, %v8095_v30  ;;  %vm4052_vm1 = vcmp.gt.s32.totalorder %v4051_v1, 0 }
 0x550   : > { %v3618_v56 = vxor.u32 2147483648, %v5056_v4  ;;  %v3908_v21 = vor.u32 %v3907_v6, %v3906_v32  ;;  %v3911_v14 = vshll.u32 %v3910_v42, 23  ;;  %v4053_v27 = vsel %vm4052_vm1, %v4051_v1, 0 }
 0x551   : > { %vm3617_vm2 = vcmp.eq.s32.totalorder %v8105_v7, 0  ;;  %v3622_v55 = vsel %vm3620_vm14, %v3621_v53, %v5056_v4  ;;  %v3784_v26 = vmul.u32 %v8108_v0, %v3768_v10  ;;  %vm3786_vm3 = vc.u32 %v8139_v44, %v8126_v23 }
 0x552   : > { %v3619_v61 = vsel %vm3617_vm2, %v5054_v33, %v3618_v56  ;;  %v3912_v37 = vor.u32 4788187, %v3911_v14  ;;  %v3922_v31 = vsel %vm8117_vm12, 0, %v3920_v34  ;;  %v3788_v63 = vsel %vm3786_vm3, %v3787_v46, %v8127_v35 }
 0x553   : > { %v3623_v50 = vsel %vm3616_vm13, %v3619_v61, %v3622_v55  ;;  %v3789_v16 = vadd.s32 %v3788_v63, %v3784_v26  ;;  %v4048_v45 = vand.u32 8388607, %v4041_v48  ;;  %v4055_v40 = vand.u32 31, %v4053_v27  ;;  %v920_v55 = vpop.permute.xlu1 %919 }
 0x554   : > { %v3624_v0 = vsel %vm3613_vm0, nan, %v3623_v50  ;;  %v3913_v29 = vand.u32 2147483647, %v3912_v37  ;;  %v3915_v24 = vcvt.s32.f32 %v3908_v21  ;;  %v985_v9 = vadd.f32 %v953_v22, %v8076_v57 }
 0x555   : > { %4377 = vst [vmem:[%s5975_s9 + $0xc0] sm:$0xff] %v3624_v0  ;;  %v3926_v2 = vadd.s32 3, %v3922_v31  ;;  %v3790_v38 = vadd.s32 536870912, %v3789_v16  ;;  %v8164_v13 = vshrl.u32 %v4053_v27, 5  ;;  %v4056_v41 = vsub.s32 32, %v4055_v40 }
 0x556   : > { %v3916_v7 = vmul.f32 %v3915_v24, %v3913_v29  ;;  %v4058_v11 = vshll.u32 %v8579_v8, %v4055_v40  ;;  %v4061_v62 = vshll.u32 %v8580_v19, %v4055_v40  ;;  %v4064_v25 = vshll.u32 %v8581_v28, %v4055_v40  ;;  %v5095_v29 = vld [vmem:[%s8518_s5 + $0x1] ss:$0 sm:$0xff] }
 0x557   : > { %v3791_v35 = vshrl.u32 %v3790_v38, 30  ;;  %v4059_v52 = vshrl.u32 %v8580_v19, %v4056_v41  ;;  %v4062_v58 = vshrl.u32 %v8581_v28, %v4056_v41  ;;  %v4067_v57 = vshll.u32 %v8582_v18, %v4055_v40 }
 0x558   : > { %v3917_v59 = vxor.u32 2147483648, %v3916_v7  ;;  %v4065_v3 = vshrl.u32 %v8582_v18, %v4056_v41  ;;  %v4068_v36 = vshrl.u32 %v8583_v15, %v4056_v41  ;;  %v4071_v43 = vshrl.u32 %v8584_v47, %v4056_v41 }
 0x559   : > { %v3792_v54 = vshll.u32 %v3791_v35, 30  ;;  %v4049_v20 = vor.u32 8388608, %v4048_v45  ;;  %v4060_v22 = vor.u32 %v4059_v52, %v4058_v11  ;;  %v4070_v10 = vshll.u32 %v8583_v15, %v4055_v40 }
 0x55a   : > { %v3918_v12 = vsel %vm3835_vm7, %v3917_v59, %v3916_v7  ;;  %vm3731_vm4 = vcmp.lt.s32.totalorder %v7999_v5, 0  ;;  %v4063_v1 = vor.u32 %v4062_v58, %v4061_v62  ;;  %v4066_v33 = vor.u32 %v4065_v3, %v4064_v25 }
 0x55b   : > { %v4069_v32 = vor.u32 %v4068_v36, %v4067_v57  ;;  %v3921_v6 = vsel %vm8117_vm12, %v7913_v17, %v3918_v12  ;;  %v8182_v42 = vsub.s32 %v3789_v16, %v3792_v54  ;;  %v4072_v46 = vor.u32 %v4071_v43, %v4070_v10 }
 0x55c   : > { %v8185_v4 = vadd.f32 %v8092_v49, %v985_v9  ;;  %5057 = vcosq.f32 %v3921_v6  ;;  %vm4073_vm5 = vcmp.lt.s32.totalorder %v8164_v13, 1  ;;  %vm4074_vm6 = vcmp.lt.s32.totalorder %v8164_v13, 2 }
 0x55d   : > { %vm4075_vm7 = vcmp.lt.s32.totalorder %v8164_v13, 3  ;;  %5059 = vsinq.f32 %v3921_v6  ;;  %vm8192_vm8 = vcmp.le.f32.partialorder %v3729_v60, 0.7853982  ;;  %v3795_v51 = vsub.s32 0, %v8182_v42 }
 0x55e   : > { %v4057_v34 = vshrl.u32 %v8579_v8, %v4056_v41  ;;  %vm4076_vm9 = vcmp.lt.s32.totalorder %v8164_v13, 4  ;;  %v3815_v56 = vsub.s32 4, %v3791_v35  ;;  %v4081_v14 = vsel %vm4073_vm5, %v4060_v22, %v4063_v1 }
 0x55f   : > { %v4078_v21 = vsel %vm4076_vm9, %v4066_v33, 2102212464  ;;  %v4082_v27 = vsel %vm4076_vm9, %v4069_v32, 920167782  ;;  %v4676_v26 = vmin.u32 %v3795_v51, %v8182_v42  ;;  %v4085_v61 = vsel %vm4073_vm5, %v4063_v1, %v4066_v33 }
 0x560   : > { %v4083_v60 = vsel %vm4075_vm7, %v4066_v33, %v4082_v27  ;;  %v4086_v37 = vsel %vm4076_vm9, %v4072_v46, 1326507024  ;;  %v3927_v31 = vand.u32 3, %v3926_v2  ;;  %v4089_v16 = vshll.u32 %v4049_v20, 8 }
 0x561   : > { %v4084_v63 = vsel %vm4074_vm6, %v4081_v14, %v4083_v60  ;;  %v4087_v50 = vsel %vm4075_vm7, %v4069_v32, %v4086_v37  ;;  %v3797_v45 = vclz %v4676_v26  ;;  %v4077_v40 = vsel %vm4073_vm5, %v4057_v34, %v4060_v22 }
 0x562   : > { %v4079_v0 = vsel %vm4075_vm7, %v4063_v1, %v4078_v21  ;;  %v956_v24 = vmul.f32 %v5095_v29, %v920_v55  ;;  %v4088_v9 = vsel %vm4074_vm6, %v4085_v61, %v4087_v50  ;;  %v3940_v41 = vand.u32 2139095040, %v8185_v4  ;;  %v916_v55 = vpop.permute.xlu0 %915 }
 0x563   : > { %v8219_v2 = vmul.u32.u64.low %v4089_v16, %v4084_v63  ;;  %v8220_v38 = vmul.u32.u64.high %v4089_v16, %v4084_v63, %v8219_v2  ;;  %vm3925_vm10 = vweird.f32 %v7913_v17  ;;  %v4677_v7 = vadd.s32 4294967294, %v3797_v45  ;;  %v8660_v63 = vld [vmem:[#allocation29_spill] sm:$0xff]  ;;  %v8661_v45 = vld [vmem:[#allocation30_spill] sm:$0xff] }
 0x564   : > { %v3816_v11 = vsel %vm3731_vm4, %v3815_v56, %v3791_v35  ;;  %v8227_v62 = vmul.u32.u64.low %v4089_v16, %v4088_v9  ;;  %v8228_v25 = vmul.u32.u64.high %v4089_v16, %v4088_v9, %v8227_v62  ;;  %vm3928_vm11 = vcmp.lt.s32.totalorder %v3927_v31, 2 }
 0x565   : > { %vm3929_vm14 = vcmp.eq.s32.totalorder %v3927_v31, 0  ;;  %v4080_v52 = vsel %vm4074_vm6, %v4077_v40, %v4079_v0  ;;  %v3941_v58 = vshrl.u32 %v3940_v41, 23  ;;  %vm3932_vm12 = vcmp.eq.s32.totalorder %v3927_v31, 2 }
 0x566   : > { %v3785_v57 = vadd.s32 %v8126_v23, %v8139_v44  ;;  %vm4678_vm13 = vcmp.lt.s32.totalorder %v4677_v7, 0  ;;  %v3937_v59 = vand.u32 2147483647, %v8185_v4  ;;  %v5058_v3 = vpop.eup %5057  ;;  %v3818_v35 = vsel %vm8192_vm8, 0, %v3816_v11 }
 0x567   : > { %v3800_v36 = vsel %vm4678_vm13, 0, %v4677_v7  ;;  %v4099_v43 = vadd.s32 1, %v8220_v38  ;;  %v4683_v54 = vadd.s32 4294967169, %v3941_v58  ;;  %v5060_v20 = vpop.eup %5059  ;;  %v3933_v22 = vxor.u32 2147483648, %v5058_v3 }
 0x568   : > { %v3801_v13 = vsub.s32 32, %v3800_v36  ;;  %v3805_v10 = vsub.s32 4294967266, %v3800_v36  ;;  %v4096_v12 = vmul.u32 %v4089_v16, %v4080_v52  ;;  %v3930_v1 = vxor.u32 2147483648, %v5060_v20 }
 0x569   : > { %v3802_v33 = vshll.u32 %v8182_v42, %v3800_v36  ;;  %vm4098_vm15 = vc.u32 %v8228_v25, %v8219_v2  ;;  %v3947_v23 = vadd.s32 1, %v4683_v54  ;;  %v3934_v44 = vsel %vm3932_vm12, %v3933_v22, %v5060_v20 }
 0x56a   : > { %v3803_v32 = vshrl.u32 %v3785_v57, %v3801_v13  ;;  %v3806_v6 = vadd.s32 127, %v3805_v10  ;;  %v4100_v46 = vsel %vm4098_vm15, %v4099_v43, %v8220_v38  ;;  %v3931_v51 = vsel %vm3929_vm14, %v5058_v3, %v3930_v1 }
 0x56b   : > { %v3822_v34 = vadd.s32 3, %v3818_v35  ;;  %v4101_v56 = vadd.s32 %v4100_v46, %v4096_v12  ;;  %vm3948_vm0 = vcmp.gt.s32.totalorder %v3947_v23, 0  ;;  %v3935_v21 = vsel %vm3928_vm11, %v3931_v51, %v3934_v44 }
 0x56c   : > { %v3804_v14 = vor.u32 %v3803_v32, %v3802_v33  ;;  %v3807_v42 = vshll.u32 %v3806_v6, 23  ;;  %v3949_v27 = vsel %vm3948_vm0, %v3947_v23, 0  ;;  %v3936_v26 = vsel %vm3925_vm10, nan, %v3935_v21 }
 0x56d   : > { %v4102_v60 = vadd.s32 536870912, %v4101_v56  ;;  %v3944_v61 = vand.u32 8388607, %v3937_v59  ;;  %v3951_v37 = vand.u32 31, %v3949_v27  ;;  %v744_v50 = vmul.f32 %v8068_v39, %v8660_v63  ;;  %4380 = vst [vmem:[%s5975_s9 + $0xd8] sm:$0xff] %v3936_v26 }
 0x56e   : > { %v3808_v16 = vor.u32 4788187, %v3807_v42  ;;  %v8254_v31 = vmul.f32 %v8068_v39, %v8661_v45  ;;  %v8258_v9 = vmul.f32 %v5095_v29, %v916_v55  ;;  %v3811_v38 = vcvt.s32.f32 %v3804_v14 }
 0x56f   : > { %v8256_v40 = vshrl.u32 %v4102_v60, 30  ;;  %v3952_v0 = vsub.s32 32, %v3951_v37  ;;  %v8260_v41 = vand.u32 3, %v3822_v34  ;;  %v988_v7 = vadd.f32 %v956_v24, %v744_v50 }
 0x570   : > { %v3809_v17 = vand.u32 2147483647, %v3808_v16  ;;  %v3945_v62 = vor.u32 8388608, %v3944_v61  ;;  %v3954_v52 = vshll.u32 %v8579_v8, %v3951_v37  ;;  %v3957_v35 = vshll.u32 %v8580_v19, %v3951_v37 }
 0x571   : > { %v4104_v11 = vshll.u32 %v8256_v40, 30  ;;  %v3955_v58 = vshrl.u32 %v8580_v19, %v3952_v0  ;;  %v3958_v39 = vshrl.u32 %v8581_v28, %v3952_v0  ;;  %v3961_v3 = vshrl.u32 %v8582_v18, %v3952_v0 }
 0x572   : > { %v3812_v57 = vmul.f32 %v3811_v38, %v3809_v17  ;;  %v3964_v29 = vshrl.u32 %v8583_v15, %v3952_v0  ;;  %v3960_v24 = vshll.u32 %v8581_v28, %v3951_v37  ;;  %v3967_v43 = vshrl.u32 %v8584_v47, %v3952_v0 }
 0x573   : > { %v8268_v36 = vsub.s32 %v4101_v56, %v4104_v11  ;;  %v3950_v20 = vshrl.u32 %v3949_v27, 5  ;;  %v3963_v22 = vshll.u32 %v8582_v18, %v3951_v37  ;;  %v3966_v13 = vshll.u32 %v8583_v15, %v3951_v37 }
 0x574   : > { %v3813_v54 = vxor.u32 2147483648, %v3812_v57  ;;  %v3956_v12 = vor.u32 %v3955_v58, %v3954_v52  ;;  %v3959_v1 = vor.u32 %v3958_v39, %v3957_v35  ;;  %v3962_v33 = vor.u32 %v3961_v3, %v3960_v24 }
 0x575   : > { %v4107_v10 = vsub.s32 0, %v8268_v36  ;;  %vm4043_vm1 = vcmp.lt.s32.totalorder %v8095_v30, 0  ;;  %v4097_v44 = vadd.s32 %v8219_v2, %v8228_v25  ;;  %v3965_v32 = vor.u32 %v3964_v29, %v3963_v22 }
 0x576   : > { %v3814_v23 = vsel %vm3731_vm4, %v3813_v54, %v3812_v57  ;;  %v8282_v6 = vadd.f32 %v8092_v49, %v988_v7  ;;  %v3968_v34 = vor.u32 %v3967_v43, %v3966_v13  ;;  %v3985_v56 = vshll.u32 %v3945_v62, 8 }
 0x577   : > { %v3817_v46 = vsel %vm8192_vm8, %v7999_v5, %v3814_v23  ;;  %v4688_v51 = vmin.u32 %v4107_v10, %v8268_v36  ;;  %v4127_v21 = vsub.s32 4, %v8256_v40  ;;  %vm3969_vm2 = vcmp.lt.s32.totalorder %v3950_v20, 1 }
 0x578   : > { %5061 = vcosq.f32 %v3817_v46  ;;  %vm3972_vm3 = vcmp.lt.s32.totalorder %v3950_v20, 4  ;;  %vm8291_vm4 = vcmp.le.f32.partialorder %v4041_v48, 0.7853982  ;;  %v3977_v53 = vsel %vm3969_vm2, %v3956_v12, %v3959_v1 }
 0x579   : > { %5063 = vsinq.f32 %v3817_v46  ;;  %v4109_v25 = vclz %v4688_v51  ;;  %v3974_v14 = vsel %vm3972_vm3, %v3962_v33, 2102212464  ;;  %v3953_v42 = vshrl.u32 %v8579_v8, %v3952_v0 }
 0x57a   : > { %vm3971_vm5 = vcmp.lt.s32.totalorder %v3950_v20, 3  ;;  %v3978_v27 = vsel %vm3972_vm3, %v3965_v32, 920167782  ;;  %v3981_v55 = vsel %vm3969_vm2, %v3959_v1, %v3962_v33  ;;  %vm3970_vm6 = vcmp.lt.s32.totalorder %v3950_v20, 2 }
 0x57b   : > { %v4689_v26 = vadd.s32 4294967294, %v4109_v25  ;;  %v3979_v60 = vsel %vm3971_vm5, %v3962_v33, %v3978_v27  ;;  %v3982_v61 = vsel %vm3972_vm3, %v3968_v34, 1326507024  ;;  %v3973_v37 = vsel %vm3969_vm2, %v3953_v42, %v3956_v12 }
 0x57c   : > { %v3975_v63 = vsel %vm3971_vm5, %v3959_v1, %v3974_v14  ;;  %v3980_v50 = vsel %vm3970_vm6, %v3977_v53, %v3979_v60  ;;  %v3983_v48 = vsel %vm3971_vm5, %v3965_v32, %v3982_v61  ;;  %v4252_v11 = vand.u32 2139095040, %v8282_v6 }
 0x57d   : > { %vm4690_vm7 = vcmp.lt.s32.totalorder %v4689_v26, 0  ;;  %v3984_v16 = vsel %vm3970_vm6, %v3981_v55, %v3983_v48  ;;  %v8298_v45 = vmul.u32.u64.low %v3985_v56, %v3980_v50  ;;  %v8299_v17 = vmul.u32.u64.high %v3985_v56, %v3980_v50, %v8298_v45 }
 0x57e   : > { %v4112_v0 = vsel %vm4690_vm7, 0, %v4689_v26  ;;  %v8302_v38 = vmul.u32.u64.low %v3985_v56, %v3984_v16  ;;  %v8303_v7 = vmul.u32.u64.high %v3985_v56, %v3984_v16, %v8302_v38  ;;  %vm3821_vm8 = vweird.f32 %v7999_v5 }
 0x57f   : > { %v4113_v62 = vsub.s32 32, %v4112_v0  ;;  %v4117_v52 = vsub.s32 4294967266, %v4112_v0  ;;  %v4128_v58 = vsel %vm4043_vm1, %v4127_v21, %v8256_v40  ;;  %v3976_v57 = vsel %vm3970_vm6, %v3973_v37, %v3975_v63 }
 0x580   : > { %vm3824_vm9 = vcmp.lt.s32.totalorder %v8260_v41, 2  ;;  %vm3828_vm10 = vcmp.eq.s32.totalorder %v8260_v41, 2  ;;  %v4249_v39 = vand.u32 2147483647, %v8282_v6  ;;  %v4253_v3 = vshrl.u32 %v4252_v11, 23 }
 0x581   : > { %v4114_v29 = vshll.u32 %v8268_v36, %v4112_v0  ;;  %v4115_v35 = vshrl.u32 %v4097_v44, %v4113_v62  ;;  %v4118_v24 = vadd.s32 127, %v4117_v52  ;;  %v3995_v43 = vadd.s32 1, %v8299_v17 }
 0x582   : > { %v5062_v54 = vpop.eup %5061  ;;  %v4130_v22 = vsel %vm8291_vm4, 0, %v4128_v58  ;;  %v3992_v40 = vmul.u32 %v3985_v56, %v3976_v57  ;;  %vm3994_vm11 = vc.u32 %v8303_v7, %v8298_v45  ;;  %v4695_v20 = vadd.s32 4294967169, %v4253_v3 }
 0x583   : > { %v5064_v13 = vpop.eup %5063  ;;  %v3829_v10 = vxor.u32 2147483648, %v5062_v54  ;;  %v4116_v12 = vor.u32 %v4115_v35, %v4114_v29  ;;  %v4119_v1 = vshll.u32 %v4118_v24, 23  ;;  %v3996_v33 = vsel %vm3994_vm11, %v3995_v43, %v8299_v17 }
 0x584   : > { %v3826_v36 = vxor.u32 2147483648, %v5064_v13  ;;  %v3997_v23 = vadd.s32 %v3996_v33, %v3992_v40  ;;  %v4259_v44 = vadd.s32 1, %v4695_v20  ;;  %v987_v32 = vadd.f32 %v8258_v9, %v8254_v31 }
 0x585   : > { %vm3825_vm14 = vcmp.eq.s32.totalorder %v8260_v41, 0  ;;  %v3830_v46 = vsel %vm3828_vm10, %v3829_v10, %v5064_v13  ;;  %v4120_v51 = vor.u32 4788187, %v4119_v1  ;;  %v4134_v34 = vadd.s32 3, %v4130_v22 }
 0x586   : > { %v3827_v56 = vsel %vm3825_vm14, %v5062_v54, %v3826_v36  ;;  %v3998_v21 = vadd.s32 536870912, %v3997_v23  ;;  %v4256_v25 = vand.u32 8388607, %v4249_v39  ;;  %vm4260_vm12 = vcmp.gt.s32.totalorder %v4259_v44, 0 }
 0x587   : > { %v3831_v14 = vsel %vm3824_vm9, %v3827_v56, %v3830_v46  ;;  %v4121_v53 = vand.u32 2147483647, %v4120_v51  ;;  %v4123_v42 = vcvt.s32.f32 %v4116_v12  ;;  %v4261_v31 = vsel %vm4260_vm12, %v4259_v44, 0 }
 0x588   : > { %v3832_v9 = vsel %vm3821_vm8, nan, %v3831_v14  ;;  %v8332_v27 = vshrl.u32 %v3998_v21, 30  ;;  %v4263_v55 = vand.u32 31, %v4261_v31  ;;  %v8335_v26 = vadd.f32 %v8092_v49, %v987_v32 }
 0x589   : > { %4379 = vst [vmem:[%s5975_s9 + $0xd0] sm:$0xff] %v3832_v9  ;;  %v4124_v60 = vmul.f32 %v4123_v42, %v4121_v53  ;;  %v8339_v41 = vand.u32 3, %v4134_v34  ;;  %v4257_v50 = vor.u32 8388608, %v4256_v25  ;;  %v4262_v16 = vshrl.u32 %v4261_v31, 5 }
 0x58a   : > { %v4000_v61 = vshll.u32 %v8332_v27, 30  ;;  %v4264_v37 = vsub.s32 32, %v4263_v55  ;;  %v4148_v17 = vand.u32 2139095040, %v8335_v26  ;;  %v4266_v0 = vshll.u32 %v8579_v8, %v4263_v55 }
 0x58b   : > { %v4125_v63 = vxor.u32 2147483648, %v4124_v60  ;;  %v4269_v58 = vshll.u32 %v8580_v19, %v4263_v55  ;;  %v4272_v57 = vshll.u32 %v8581_v28, %v4263_v55  ;;  %v4275_v29 = vshll.u32 %v8582_v18, %v4263_v55 }
 0x58c   : > { %v8341_v48 = vsub.s32 %v3997_v23, %v4000_v61  ;;  %v4267_v5 = vshrl.u32 %v8580_v19, %v4264_v37  ;;  %v4270_v38 = vshrl.u32 %v8581_v28, %v4264_v37  ;;  %v4273_v11 = vshrl.u32 %v8582_v18, %v4264_v37 }
 0x58d   : > { %v4126_v49 = vsel %vm4043_vm1, %v4125_v63, %v4124_v60  ;;  %v4276_v35 = vshrl.u32 %v8583_v15, %v4264_v37  ;;  %v4278_v2 = vshll.u32 %v8583_v15, %v4263_v55  ;;  %v4279_v40 = vshrl.u32 %v8584_v47, %v4264_v37 }
 0x58e   : > { %v4129_v62 = vsel %vm8291_vm4, %v8095_v30, %v4126_v49  ;;  %v4003_v52 = vsub.s32 0, %v8341_v48  ;;  %v4268_v3 = vor.u32 %v4267_v5, %v4266_v0  ;;  %v4271_v43 = vor.u32 %v4270_v38, %v4269_v58 }
 0x58f   : > { %5065 = vcosq.f32 %v4129_v62  ;;  %v4274_v54 = vor.u32 %v4273_v11, %v4272_v57  ;;  %v4277_v22 = vor.u32 %v4276_v35, %v4275_v29  ;;  %v4297_v20 = vshll.u32 %v4257_v50, 8 }
 0x590   : > { %5067 = vsinq.f32 %v4129_v62  ;;  %v4684_v24 = vmin.u32 %v4003_v52, %v8341_v48  ;;  %v4265_v10 = vshrl.u32 %v8579_v8, %v4264_v37  ;;  %vm4281_vm13 = vcmp.lt.s32.totalorder %v4262_v16, 1 }
 0x591   : > { %v4149_v12 = vshrl.u32 %v4148_v17, 23  ;;  %vm3939_vm15 = vcmp.lt.s32.totalorder %v8185_v4, 0  ;;  %v4280_v1 = vor.u32 %v4279_v40, %v4278_v2  ;;  %vm4282_vm0 = vcmp.lt.s32.totalorder %v4262_v16, 2 }
 0x592   : > { %v4005_v13 = vclz %v4684_v24  ;;  %vm4283_vm1 = vcmp.lt.s32.totalorder %v4262_v16, 3  ;;  %vm4284_vm2 = vcmp.lt.s32.totalorder %v4262_v16, 4  ;;  %vm4137_vm3 = vcmp.eq.s32.totalorder %v8339_v41, 0 }
 0x593   : > { %v4286_v36 = vsel %vm4284_vm2, %v4274_v54, 2102212464  ;;  %v4289_v23 = vsel %vm4281_vm13, %v4268_v3, %v4271_v43  ;;  %v4290_v44 = vsel %vm4284_vm2, %v4277_v22, 920167782  ;;  %vm4136_vm4 = vcmp.lt.s32.totalorder %v8339_v41, 2 }
 0x594   : > { %v4685_v33 = vadd.s32 4294967294, %v4005_v13  ;;  %v4285_v32 = vsel %vm4281_vm13, %v4265_v10, %v4268_v3  ;;  %v4291_v46 = vsel %vm4283_vm1, %v4274_v54, %v4290_v44  ;;  %v4293_v51 = vsel %vm4281_vm13, %v4271_v43, %v4274_v54 }
 0x595   : > { %v4294_v34 = vsel %vm4284_vm2, %v4280_v1, 1326507024  ;;  %vm4133_vm5 = vweird.f32 %v8095_v30  ;;  %v4287_v56 = vsel %vm4283_vm1, %v4271_v43, %v4286_v36  ;;  %v4292_v21 = vsel %vm4282_vm0, %v4289_v23, %v4291_v46 }
 0x596   : > { %vm4686_vm6 = vcmp.lt.s32.totalorder %v4685_v33, 0  ;;  %v4295_v25 = vsel %vm4283_vm1, %v4277_v22, %v4294_v34  ;;  %v8371_v42 = vmul.u32.u64.low %v4297_v20, %v4292_v21  ;;  %v8372_v31 = vmul.u32.u64.high %v4297_v20, %v4292_v21, %v8371_v42 }
 0x597   : > { %v4008_v14 = vsel %vm4686_vm6, 0, %v4685_v33  ;;  %v4296_v53 = vsel %vm4282_vm0, %v4293_v51, %v4295_v25  ;;  %v3993_v9 = vadd.s32 %v8298_v45, %v8303_v7  ;;  %v4023_v61 = vsub.s32 4, %v8332_v27 }
 0x598   : > { %v4009_v55 = vsub.s32 32, %v4008_v14  ;;  %v4013_v60 = vsub.s32 4294967266, %v4008_v14  ;;  %v4288_v63 = vsel %vm4282_vm0, %v4285_v32, %v4287_v56  ;;  %v4691_v17 = vadd.s32 4294967169, %v4149_v12 }
 0x599   : > { %v5066_v37 = vpop.eup %5065  ;;  %v8379_v50 = vmul.u32.u64.low %v4297_v20, %v4296_v53  ;;  %v8380_v5 = vmul.u32.u64.high %v4297_v20, %v4296_v53, %v8379_v50  ;;  %v4010_v38 = vshll.u32 %v8341_v48, %v4008_v14  ;;  %vm4140_vm7 = vcmp.eq.s32.totalorder %v8339_v41, 2 }
 0x59a   : > { %v5068_v49 = vpop.eup %5067  ;;  %v4141_v0 = vxor.u32 2147483648, %v5066_v37  ;;  %v4011_v11 = vshrl.u32 %v3993_v9, %v4009_v55  ;;  %v4014_v62 = vadd.s32 127, %v4013_v60  ;;  %v4307_v45 = vadd.s32 1, %v8372_v31 }
 0x59b   : > { %v4138_v52 = vxor.u32 2147483648, %v5068_v49  ;;  %v4155_v7 = vadd.s32 1, %v4691_v17  ;;  %v4024_v3 = vsel %vm3939_vm15, %v4023_v61, %v8332_v27  ;;  %v4304_v48 = vmul.u32 %v4297_v20, %v4288_v63 }
 0x59c   : > { %v4142_v58 = vsel %vm4140_vm7, %v4141_v0, %v5068_v49  ;;  %v4012_v16 = vor.u32 %v4011_v11, %v4010_v38  ;;  %v4015_v57 = vshll.u32 %v4014_v62, 23  ;;  %vm4306_vm8 = vc.u32 %v8380_v5, %v8371_v42 }
 0x59d   : > { %v4139_v29 = vsel %vm4137_vm3, %v5066_v37, %v4138_v52  ;;  %vm4156_vm9 = vcmp.gt.s32.totalorder %v4155_v7, 0  ;;  %v4308_v43 = vsel %vm4306_vm8, %v4307_v45, %v8372_v31  ;;  %v4145_v54 = vand.u32 2147483647, %v8335_v26 }
 0x59e   : > { %v4143_v35 = vsel %vm4136_vm4, %v4139_v29, %v4142_v58  ;;  %v4016_v24 = vor.u32 4788187, %v4015_v57  ;;  %vm8400_vm10 = vcmp.le.f32.partialorder %v3937_v59, 0.7853982  ;;  %v4309_v2 = vadd.s32 %v4308_v43, %v4304_v48 }
 0x59f   : > { %v4144_v22 = vsel %vm4133_vm5, nan, %v4143_v35  ;;  %v4157_v40 = vsel %vm4156_vm9, %v4155_v7, 0  ;;  %v4019_v41 = vcvt.s32.f32 %v4012_v16  ;;  %v4026_v13 = vsel %vm8400_vm10, 0, %v4024_v3 }
 0x5a0   : > { %4382 = vst [vmem:[%s5975_s9 + $0xe8] sm:$0xff] %v4144_v22  ;;  %v4017_v20 = vand.u32 2147483647, %v4016_v24  ;;  %v4159_v10 = vand.u32 31, %v4157_v40  ;;  %v4310_v12 = vadd.s32 536870912, %v4309_v2  ;;  %v4030_v36 = vadd.s32 3, %v4026_v13 }
 0x5a1   : > { %v4152_v30 = vand.u32 8388607, %v4145_v54  ;;  %v4158_v23 = vshrl.u32 %v4157_v40, 5  ;;  %v4305_v13 = vadd.s32 %v8371_v42, %v8380_v5  ;;  %vm4029_vm3 = vweird.f32 %v8185_v4 }
 0x5a2   : > { %v4020_v1 = vmul.f32 %v4019_v41, %v4017_v20  ;;  %v4160_v33 = vsub.s32 32, %v4159_v10  ;;  %v8409_v59 = vshrl.u32 %v4310_v12, 30  ;;  %v4162_v44 = vshll.u32 %v8579_v8, %v4159_v10 }
 0x5a3   : > { %v4165_v51 = vshll.u32 %v8580_v19, %v4159_v10  ;;  %v4168_v21 = vshll.u32 %v8581_v28, %v4159_v10  ;;  %v4171_v31 = vshll.u32 %v8582_v18, %v4159_v10  ;;  %v4174_v9 = vshll.u32 %v8583_v15, %v4159_v10 }
 0x5a4   : > { %v4021_v32 = vxor.u32 2147483648, %v4020_v1  ;;  %v4163_v46 = vshrl.u32 %v8580_v19, %v4160_v33  ;;  %v4166_v34 = vshrl.u32 %v8581_v28, %v4160_v33  ;;  %v4312_v56 = vshll.u32 %v8409_v59, 30 }
 0x5a5   : > { %v4169_v25 = vshrl.u32 %v8582_v18, %v4160_v33  ;;  %v4172_v14 = vshrl.u32 %v8583_v15, %v4160_v33  ;;  %v4175_v55 = vshrl.u32 %v8584_v47, %v4160_v33  ;;  %v4153_v49 = vor.u32 8388608, %v4152_v30 }
 0x5a6   : > { %v4022_v53 = vsel %vm3939_vm15, %v4021_v32, %v4020_v1  ;;  %v4313_v60 = vsub.s32 %v4309_v2, %v4312_v56  ;;  %v4164_v61 = vor.u32 %v4163_v46, %v4162_v44  ;;  %v4167_v37 = vor.u32 %v4166_v34, %v4165_v51 }
 0x5a7   : > { %v4025_v19 = vsel %vm8400_vm10, %v8185_v4, %v4022_v53  ;;  %v4170_v28 = vor.u32 %v4169_v25, %v4168_v21  ;;  %v4173_v63 = vor.u32 %v4172_v14, %v4171_v31  ;;  %v4176_v50 = vor.u32 %v4175_v55, %v4174_v9 }
 0x5a8   : > { %5069 = vcosq.f32 %v4025_v19  ;;  %v4315_v17 = vsub.s32 0, %v4313_v60  ;;  %v4031_v0 = vand.u32 3, %v4030_v36  ;;  %vm4180_vm11 = vcmp.lt.s32.totalorder %v4158_v23, 4 }
 0x5a9   : > { %5071 = vsinq.f32 %v4025_v19  ;;  %v4161_v15 = vshrl.u32 %v8579_v8, %v4160_v33  ;;  %vm4177_vm14 = vcmp.lt.s32.totalorder %v4158_v23, 1  ;;  %v4182_v47 = vsel %vm4180_vm11, %v4170_v28, 2102212464 }
 0x5aa   : > { %v4696_v18 = vmin.u32 %v4315_v17, %v4313_v60  ;;  %v4185_v38 = vsel %vm4177_vm14, %v4164_v61, %v4167_v37  ;;  %v4186_v11 = vsel %vm4180_vm11, %v4173_v63, 920167782  ;;  %v4189_v62 = vsel %vm4177_vm14, %v4167_v37, %v4170_v28 }
 0x5ab   : > { %v4190_v52 = vsel %vm4180_vm11, %v4176_v50, 1326507024  ;;  %vm4178_vm12 = vcmp.lt.s32.totalorder %v4158_v23, 2  ;;  %vm4179_vm13 = vcmp.lt.s32.totalorder %v4158_v23, 3  ;;  %v4193_v7 = vshll.u32 %v4153_v49, 8 }
 0x5ac   : > { %v4317_v45 = vclz %v4696_v18  ;;  %v4181_v58 = vsel %vm4177_vm14, %v4161_v15, %v4164_v61  ;;  %v4183_v16 = vsel %vm4179_vm13, %v4167_v37, %v4182_v47  ;;  %v4187_v57 = vsel %vm4179_vm13, %v4170_v28, %v4186_v11 }
 0x5ad   : > { %v4191_v3 = vsel %vm4179_vm13, %v4173_v63, %v4190_v52  ;;  %v4188_v48 = vsel %vm4178_vm12, %v4185_v38, %v4187_v57  ;;  %v4184_v27 = vsel %vm4178_vm12, %v4181_v58, %v4183_v16  ;;  %vm4033_vm0 = vcmp.eq.s32.totalorder %v4031_v0, 0 }
 0x5ae   : > { %v4697_v29 = vadd.s32 4294967294, %v4317_v45  ;;  %v4192_v35 = vsel %vm4178_vm12, %v4189_v62, %v4191_v3  ;;  %v8431_v8 = vmul.u32.u64.low %v4193_v7, %v4188_v48  ;;  %v8432_v22 = vmul.u32.u64.high %v4193_v7, %v4188_v48, %v8431_v8 }
 0x5af   : > { %v8428_v24 = vmul.u32.u64.low %v4193_v7, %v4192_v35  ;;  %v8429_v43 = vmul.u32.u64.high %v4193_v7, %v4192_v35, %v8428_v24  ;;  %vm4036_vm1 = vcmp.eq.s32.totalorder %v4031_v0, 2  ;;  %v4200_v30 = vmul.u32 %v4193_v7, %v4184_v27 }
 0x5b0   : > { %vm4698_vm15 = vcmp.lt.s32.totalorder %v4697_v29, 0  ;;  %v4203_v33 = vadd.s32 1, %v8432_v22  ;;  %vm4032_vm4 = vcmp.lt.s32.totalorder %v4031_v0, 2  ;;  %v4335_v19 = vsub.s32 4, %v8409_v59 }
 0x5b1   : > { %v4320_v40 = vsel %vm4698_vm15, 0, %v4697_v29  ;;  %vm4202_vm2 = vc.u32 %v8429_v43, %v8431_v8  ;;  %vm4251_vm5 = vcmp.lt.s32.totalorder %v8282_v6, 0  ;;  %vm4250_vm6 = vcmp.le.f32.partialorder %v4249_v39, 0.7853982 }
 0x5b2   : > { %v5070_v2 = vpop.eup %5069  ;;  %v4321_v10 = vsub.s32 32, %v4320_v40  ;;  %v4325_v12 = vsub.s32 4294967266, %v4320_v40  ;;  %v4322_v23 = vshll.u32 %v4313_v60, %v4320_v40  ;;  %v4204_v42 = vsel %vm4202_vm2, %v4203_v33, %v8432_v22 }
 0x5b3   : > { %v5072_v20 = vpop.eup %5071  ;;  %v4037_v41 = vxor.u32 2147483648, %v5070_v2  ;;  %v4205_v56 = vadd.s32 %v4204_v42, %v4200_v30  ;;  %v4336_v37 = vsel %vm4251_vm5, %v4335_v19, %v8409_v59  ;;  %v4201_v11 = vadd.s32 %v8431_v8, %v8429_v43 }
 0x5b4   : > { %v4034_v1 = vxor.u32 2147483648, %v5072_v20  ;;  %v4323_v44 = vshrl.u32 %v4305_v13, %v4321_v10  ;;  %v4326_v32 = vadd.s32 127, %v4325_v12  ;;  %v4338_v49 = vsel %vm4250_vm6, 0, %v4336_v37 }
 0x5b5   : > { %v4038_v36 = vsel %vm4036_vm1, %v4037_v41, %v5072_v20  ;;  %v4206_v14 = vadd.s32 536870912, %v4205_v56  ;;  %v4342_v18 = vadd.s32 3, %v4338_v49  ;;  %vm4341_vm11 = vweird.f32 %v8282_v6 }
 0x5b6   : > { %v4035_v46 = vsel %vm4033_vm0, %v5070_v2, %v4034_v1  ;;  %v4324_v51 = vor.u32 %v4323_v44, %v4322_v23  ;;  %v4327_v34 = vshll.u32 %v4326_v32, 23  ;;  %vm4147_vm14 = vcmp.lt.s32.totalorder %v8335_v26, 0 }
 0x5b7   : > { %v4039_v5 = vsel %vm4032_vm4, %v4035_v46, %v4038_v36  ;;  %v4207_v9 = vshrl.u32 %v4206_v14, 30  ;;  %v4343_v38 = vand.u32 3, %v4342_v18  ;;  %vm4146_vm12 = vcmp.le.f32.partialorder %v4145_v54, 0.7853982 }
 0x5b8   : > { %v4040_v21 = vsel %vm4029_vm3, nan, %v4039_v5  ;;  %v4328_v25 = vor.u32 4788187, %v4327_v34  ;;  %v4331_v31 = vcvt.s32.f32 %v4324_v51  ;;  %vm4237_vm1 = vweird.f32 %v8335_v26 }
 0x5b9   : > { %4381 = vst [vmem:[%s5975_s9 + $0xe0] sm:$0xff] %v4040_v21  ;;  %v4208_v4 = vshll.u32 %v4207_v9, 30  ;;  %vm4348_vm8 = vcmp.eq.s32.totalorder %v4343_v38, 2  ;;  %vm4345_vm9 = vcmp.eq.s32.totalorder %v4343_v38, 0  ;;  %vm4344_vm10 = vcmp.lt.s32.totalorder %v4343_v38, 2 }
 0x5ba   : > { %v4329_v53 = vand.u32 2147483647, %v4328_v25  ;;  %v4231_v40 = vsub.s32 4, %v4207_v9 }
 0x5bb   : > { %v4209_v61 = vsub.s32 %v4205_v56, %v4208_v4 }
 0x5bc   : > { %v4332_v55 = vmul.f32 %v4331_v31, %v4329_v53  ;;  %v4232_v13 = vsel %vm4147_vm14, %v4231_v40, %v4207_v9 }
 0x5bd   : > { %v4211_v63 = vsub.s32 0, %v4209_v61 }
 0x5be   : > { %v4333_v60 = vxor.u32 2147483648, %v4332_v55 }
 0x5bf   : > { %v4692_v17 = vmin.u32 %v4211_v63, %v4209_v61 }
 0x5c0   : > { %v4334_v28 = vsel %vm4251_vm5, %v4333_v60, %v4332_v55 }
 0x5c1   : > { %v4337_v50 = vsel %vm4250_vm6, %v8282_v6, %v4334_v28  ;;  %v4213_v0 = vclz %v4692_v17  ;;  %v4234_v6 = vsel %vm4146_vm12, 0, %v4232_v13 }
 0x5c2   : > { %5073 = vcosq.f32 %v4337_v50  ;;  %v4238_v12 = vadd.s32 3, %v4234_v6 }
 0x5c3   : > { %5075 = vsinq.f32 %v4337_v50  ;;  %v4693_v15 = vadd.s32 4294967294, %v4213_v0 }
 0x5c4   : > { %v4239_v1 = vand.u32 3, %v4238_v12 }
 0x5c5   : > { %vm4694_vm7 = vcmp.lt.s32.totalorder %v4693_v15, 0 }
 0x5c6   : > { %v4216_v47 = vsel %vm4694_vm7, 0, %v4693_v15  ;;  %vm4244_vm13 = vcmp.eq.s32.totalorder %v4239_v1, 2  ;;  %vm4241_vm15 = vcmp.eq.s32.totalorder %v4239_v1, 0  ;;  %vm4240_vm0 = vcmp.lt.s32.totalorder %v4239_v1, 2 }
 0x5c7   : > { %v4217_v62 = vsub.s32 32, %v4216_v47  ;;  %v4221_v39 = vsub.s32 4294967266, %v4216_v47  ;;  %v4218_v45 = vshll.u32 %v4209_v61, %v4216_v47 }
 0x5c9   : > { %v4219_v59 = vshrl.u32 %v4201_v11, %v4217_v62  ;;  %v4222_v7 = vadd.s32 127, %v4221_v39 }
 0x5cb   : > { %v4220_v3 = vor.u32 %v4219_v59, %v4218_v45  ;;  %v4223_v29 = vshll.u32 %v4222_v7, 23 }
 0x5cc   : > { %v5074_v52 = vpop.eup %5073 }
 0x5cd   : > { %v5076_v58 = vpop.eup %5075  ;;  %v4349_v16 = vxor.u32 2147483648, %v5074_v52  ;;  %v4224_v24 = vor.u32 4788187, %v4223_v29  ;;  %v4227_v27 = vcvt.s32.f32 %v4220_v3 }
 0x5ce   : > { %v4346_v57 = vxor.u32 2147483648, %v5076_v58 }
 0x5cf   : > { %v4350_v48 = vsel %vm4348_vm8, %v4349_v16, %v5076_v58  ;;  %v4225_v22 = vand.u32 2147483647, %v4224_v24 }
 0x5d0   : > { %v4347_v35 = vsel %vm4345_vm9, %v5074_v52, %v4346_v57 }
 0x5d1   : > { %v4351_v43 = vsel %vm4344_vm10, %v4347_v35, %v4350_v48  ;;  %v4228_v2 = vmul.f32 %v4227_v27, %v4225_v22 }
 0x5d2   : > { %v4352_v8 = vsel %vm4341_vm11, nan, %v4351_v43 }
 0x5d3   : > { %4384 = vst [vmem:[%s5975_s9 + $0xf8] sm:$0xff] %v4352_v8  ;;  %v4229_v20 = vxor.u32 2147483648, %v4228_v2 }
 0x5d5   : > { %v4230_v41 = vsel %vm4147_vm14, %v4229_v20, %v4228_v2 }
 0x5d6   : > { %v4233_v10 = vsel %vm4146_vm12, %v8335_v26, %v4230_v41 }
 0x5d7   : > { %5077 = vcosq.f32 %v4233_v10 }
 0x5d8   : > { %5079 = vsinq.f32 %v4233_v10 }
 0x5e1   : > { %v5078_v30 = vpop.eup %5077 }
 0x5e2   : > { %v5080_v33 = vpop.eup %5079  ;;  %v4245_v36 = vxor.u32 2147483648, %v5078_v30 }
 0x5e3   : > { %v4242_v23 = vxor.u32 2147483648, %v5080_v33 }
 0x5e4   : > { %v4246_v54 = vsel %vm4244_vm13, %v4245_v36, %v5080_v33 }
 0x5e5   : > { %v4243_v44 = vsel %vm4241_vm15, %v5078_v30, %v4242_v23 }
 0x5e6   : > { %v4247_v32 = vsel %vm4240_vm0, %v4243_v44, %v4246_v54 }
 0x5e7   : > { %v4248_v46 = vsel %vm4237_vm1, nan, %v4247_v32 }
 0x5e8   : > { %4383 = vst [vmem:[%s5975_s9 + $0xf0] sm:$0xff] %v4248_v46 }
 0x5e9   : > { %5197 = shalt.err (!%p5194_p12)
}
 0x5ea   : > { %s5198_s9 = scalar_lea.hbm %s8460_s16, 4096  ;;  %s5202_s29 = scalar_lea.hbm %s8519_s6, 8192 }
 0x5eb   : > { %p5199_p11 = scmp.ne.s32.totalorder %s8460_s16, %s5198_s9  ;;  %p5203_p13 = scmp.lt.u32.totalorder %s8460_s16, %s8519_s6 }
 0x5ec   : > { %p5204_p0 = scmp.lt.u32.totalorder %s5202_s29, %s5198_s9  ;;  %p5206_p9 = scmp.lt.u32.totalorder %s5198_s9, %s8460_s16 }
 0x5ed   : > { %p5200_p3 = pnand %p5199_p11, %p5423_p10 }
 0x5ee   : > { %p5205_p5 = por %p5204_p0, %p5203_p13 }
 0x5ef   : > { %p5201_p6 = pneg %p5200_p3 }
 0x5f0   : > { %p5207_p1 = por %p5206_p9, %p5205_p5 }
 0x5f2   : > { %p5208_p2 = pnand %p5207_p1, %p5201_p6 }
 0x5f4   : > { %5211 = shalt.err (!%p5208_p2)
}
 0x5f5   : > { %s5291_s17 = smov 128   ;;  %s5292_s8 = smov 8  }
 0x5f6   : > { %4859 = dma.vmem_to_hbm [thread:$0]  (%p5423_p10), %s8462_s12, 4096, %s8460_s16, %s4386_s24, %s5291_s17, %s5291_s17, %s5292_s8  }
 0x5f7 PF: > { %s4417_s25 = sand.u32 1, %s5254_s21   ;;  %p8666_p7 = scmp.ne.s32.totalorder %s8547_s30, 0 }
 0x5f8   : > { %p8667_p4 = scmp.ge.s32.totalorder %s5274_s26, 2  ;;  %s4418_s28 = scalar_lea.sflag [#allocation4], %s4417_s25 }
 0x5fa   : > { %p4873_p8 = pnand %p8667_p4, %p8666_p7 }
 0x5fc   : > { %5249 = dma.done.wait (!%p4873_p8), %s4418_s28, 4096  }
 0x5fd   : > { %5251 = vsyncadd (!%p4873_p8), %s4418_s28, 4294963200  ;;  %s25_s26 = sadd.s32 1, %s5274_s26   ;;  %s8668_s0 = sld [smem:[#allocation15_spill]] }
 0x5fe   : > { %p22_p12 = scmp.ge.s32.totalorder %s25_s26, 4   ;;  %s8669_s24 = sld [smem:[#allocation13_spill]] }
 0x5ff   : > { %s8670_s25 = sld [smem:[#allocation14_spill]]  ;;  %s8671_s21 = smov %s5258_s22 }
 0x600   : > { %s8672_s22 = smov %s5262_s23  ;;  %24 = sbr.rel (!%p22_p12) target bundleno = 11 (0xb), region = 112 }
 0x603   : > { %s8673_s23 = smov %s8668_s0 }
 0x607   :  { %4423 = vsyncpa [#allocation3], 1 }
 0x608   :  { %4425 = vsyncpa [#allocation3 + $0x1], 1 }
 0x609   :  { %4426 = vsyncpa [#allocation6], 1 }
 0x60a   :  { %4428 = vsyncpa [#allocation6 + $0x1], 1 }
 0x60b   :  { %4429 = vsyncpa [#allocation4], 1 }
 0x60c   :  { %4431 = vsyncpa [#allocation4 + $0x1], 1 }

</bundles_post_ra>
